<compile_context>
chip_gen: v7x
topology: tpu7x:2x2x1
jax: 0.10.0
libtpu: 0.0.40
codegen_flags: <defaults>
</compile_context>

<pallas_src>
from functools import partial

import numpy as np
import jax
import jax.numpy as jnp
from jax.experimental import pallas as pl
from jax.experimental.pallas import tpu as pltpu

# ----------------- config -----------------
NEIGHBOR = 5            # deepnovo_config.neighbor_size
SR = 4                  # deepnovo_config.SPECTRUM_RESOLUTION
MZ = 256                # deepnovo_config.MZ_SIZE
RED = MZ // SR          # reduced_size = 64
OUTW = RED // 4         # width after maxpool2 (k=6, s=4, p=1) = 16
NUM_UNITS = 32          # deepnovo_config.num_units
DENSE_IN = 4 * OUTW     # dense1_input_size = 64
KW = 5                  # conv kernel width
PADW = RED + 4          # conv width incl. the 2+2 zero halo


def spectrum_cnn2_kernel(x_ref, w1_ref, b1_ref, w2_ref, b2_ref, wd_ref, bd_ref,
                         out_ref, ybuf, pad2, x2s, feat):
    f32 = jnp.float32
    TB = out_ref.shape[1]          # batch-lane tile (multiple of 128)
    LW = RED * TB                  # flattened (w, batch) interior width

    # conv2 zero halo (2 w-columns each side).  Re-written every step: it is
    # tiny and stays correct under megacore grid sharding (a pl.when(pid == 0)
    # one-shot init would only run on one core).
    zhalo = jnp.zeros((4, 2 * TB), pad2.dtype)
    pad2[:, pl.ds(0, 2 * TB)] = zhalo
    pad2[:, pl.ds((RED + 2) * TB, 2 * TB)] = zhalo

    def tap_sum(buf):
        # buf row (kw*4 + c) holds tap kw's contribution over the full padded
        # width; output column w needs it at lane (w + kw) * TB.  All lane
        # offsets are multiples of TB (>= 128); the 4-row sublane slices at
        # offsets 0/4/8/12/16 never straddle an 8-row tile.
        s = buf[pl.ds(0, 4), pl.ds(0, LW)]
        for kw in range(1, KW):
            s = s + buf[pl.ds(4 * kw, 4), pl.ds(kw * TB, LW)]
        return s

    # ---- conv1 + relu: Conv2d(1, 4, (NEIGHBOR, 5), stride=(NEIGHBOR, 1), pad=(0, 2))
    # Single fused matmul over all taps: (KW*4, NEIGHBOR) @ (NEIGHBOR, PADW*TB).
    ybuf[...] = jnp.dot(w1_ref[...], x_ref[0], preferred_element_type=f32)
    # write straight into the interior of the zero-padded conv2 input buffer
    pad2[:, pl.ds(2 * TB, LW)] = jnp.maximum(
        tap_sum(ybuf) + b1_ref[...], 0.0).astype(pad2.dtype)

    # ---- conv2 + relu: Conv2d(4, 4, (1, 5), stride=1, pad=(0, 2)) ----
    # Single fused matmul: (KW*4, 4) @ (4, PADW*TB); ybuf scratch is reused.
    ybuf[...] = jnp.dot(w2_ref[...], pad2[...], preferred_element_type=f32)
    x2s[...] = jnp.maximum(tap_sum(ybuf) + b2_ref[...], 0.0)

    # ---- maxpool2: MaxPool2d(kernel=(1, 6), stride=(1, 4), pad=(0, 1)) ----
    # x2 >= 0 (post-relu), so PyTorch's -inf padding can never win: edge windows
    # simply drop the out-of-range taps.  All reads are aligned TB-lane chunks.
    # Windows j and j+1 are packed into one aligned (8, TB) store.  feat rows
    # are (w_out, channel)-major; dense weights are host-permuted to match.
    def window_max(j):
        lo = max(4 * j - 1, 0)
        hi = min(4 * j + 4, RED - 1)
        m = x2s[:, pl.ds(lo * TB, TB)]
        for w in range(lo + 1, hi + 1):
            m = jnp.maximum(m, x2s[:, pl.ds(w * TB, TB)])
        return m

    for j in range(0, OUTW, 2):
        feat[pl.ds(4 * j, 8), :] = jnp.concatenate(
            [window_max(j), window_max(j + 1)], axis=0)

    # dropout / dropout2: identity at inference time (no-op).

    # ---- dense1 + relu: one (NUM_UNITS, DENSE_IN) @ (DENSE_IN, TB) matmul ----
    out_ref[...] = jnp.maximum(
        jnp.dot(wd_ref[...], feat[...], preferred_element_type=f32) + bd_ref[...],
        0.0)


def _pick_tile_batch(batch, cap=2048):
    """Lane tile: multiple of 128, up to `cap` (amortizes ~0.35us/step overhead).
    Doubling stops while 4*tb <= batch so large batches keep >= 2 grid tiles and
    both v7x TensorCores receive work via the 'parallel' grid axis."""
    tb = 128
    while tb < cap and tb * 4 <= batch:
        tb *= 2
    return tb


@partial(jax.jit, static_argnames=("compute_dtype",))
def spectrum_cnn2_forward(x, w1, b1, w2, b2, wd, bd, *,
                          compute_dtype=jnp.bfloat16):
    """x: (B, NEIGHBOR, MZ) float32.  Returns (1, B, NUM_UNITS) float32.

    compute_dtype: dtype of the kernel input + conv weights (MXU operands).
    bf16 (default) halves HBM traffic; float32 is the exact regression path.
    """
    B = x.shape[0]
    TB = _pick_tile_batch(B)
    NT = -(-B // TB)               # ceil(B / TB)
    BP = NT * TB
    cdt = jnp.dtype(compute_dtype)

    # ---- host-side layout pass (cheap XLA glue, fused under jit) ----
    # maxpool1: MaxPool2d((1, SR), stride (1, SR)) == reshape + max over SR.
    # Cast before the relayout so the transpose moves half the bytes (bf16).
    # TODO(synk): have the upstream producer emit the (NEIGHBOR, PADW, batch-minor)
    # layout directly to remove this HBM relayout entirely.
    pooled = x.reshape(B, NEIGHBOR, RED, SR).max(axis=-1).astype(cdt)  # (B,N,RED)
    # pad batch to a multiple of TB; add the conv1 zero halo on the w axis.
    pooled = jnp.pad(pooled, ((0, BP - B), (0, 0), (2, 2)))            # (BP,N,PADW)
    # batch to the minor (lane) axis, flattened per tile:
    #   xt[t, h, w*TB + b] = pooled[t*TB + b, h, w]
    xt = pooled.transpose(1, 2, 0).reshape(NEIGHBOR, PADW, NT, TB)
    xt = xt.transpose(2, 0, 1, 3).reshape(NT, NEIGHBOR, PADW * TB)

    # ---- weight layout glue (tiny, host-side) ----
    # conv taps stacked along M: row index = kw*4 + out_channel.
    w1m = jnp.transpose(w1[:, 0], (2, 0, 1)).reshape(KW * 4, NEIGHBOR).astype(cdt)
    w2m = jnp.transpose(w2[:, :, 0, :], (2, 0, 1)).reshape(KW * 4, 4).astype(cdt)
    # dense columns re-ordered from PyTorch's (c, w)-major flatten to the
    # kernel's (w, c)-major feature rows.
    wdr = wd.reshape(NUM_UNITS, 4, OUTW).transpose(0, 2, 1).reshape(
        NUM_UNITS, DENSE_IN).astype(jnp.float32)
    b1c = b1.reshape(4, 1).astype(jnp.float32)
    b2c = b2.reshape(4, 1).astype(jnp.float32)
    bdc = bd.reshape(NUM_UNITS, 1).astype(jnp.float32)

    # scoped-VMEM limit sized from the real per-step footprint (2x margin for
    # compiler temporaries), capped well under v7x's 64 MiB physical VMEM.
    per_lane = (2 * NEIGHBOR * PADW * cdt.itemsize   # input block, double-buffered
                + 4 * KW * PADW * 4                  # ybuf (f32)
                + 4 * PADW * cdt.itemsize            # pad2
                + 4 * RED * 4                        # x2s
                + DENSE_IN * 4                       # feat
                + 2 * NUM_UNITS * 4)                 # output block, double-buffered
    vmem_limit = int(min(2 * per_lane * TB + (8 << 20), 48 << 20))

    out = pl.pallas_call(
        spectrum_cnn2_kernel,
        out_shape=jax.ShapeDtypeStruct((NUM_UNITS, BP), jnp.float32),
        grid=(NT,),
        in_specs=[
            # If the input DMA ever becomes exposed after these compute-side
            # fixes, add pipeline_mode=pl.Buffered(3) here (costs one extra
            # input block of VMEM).
            pl.BlockSpec((1, NEIGHBOR, PADW * TB), lambda i: (i, 0, 0)),
            pl.BlockSpec((KW * 4, NEIGHBOR), lambda i: (0, 0)),
            pl.BlockSpec((4, 1), lambda i: (0, 0)),
            pl.BlockSpec((KW * 4, 4), lambda i: (0, 0)),
            pl.BlockSpec((4, 1), lambda i: (0, 0)),
            pl.BlockSpec((NUM_UNITS, DENSE_IN), lambda i: (0, 0)),
            pl.BlockSpec((NUM_UNITS, 1), lambda i: (0, 0)),
        ],
        out_specs=pl.BlockSpec((NUM_UNITS, TB), lambda i: (0, i)),
        scratch_shapes=[
            pltpu.VMEM((KW * 4, PADW * TB), jnp.float32),  # fused per-tap conv results
            pltpu.VMEM((4, PADW * TB), cdt),               # conv2 zero-padded input
            pltpu.VMEM((4, RED * TB), jnp.float32),        # conv2 output (maxpool2 input)
            pltpu.VMEM((DENSE_IN, TB), jnp.float32),       # flattened dense1 features
        ],
        compiler_params=pltpu.CompilerParams(
            dimension_semantics=("parallel",),
            vmem_limit_bytes=vmem_limit),
    )(xt, w1m, b1c, w2m, b2c, wdr, bdc)

    # (NUM_UNITS, BP) -> drop batch padding, transpose, unsqueeze(0)
    return out[:, :B].T.reshape(1, B, NUM_UNITS)


def reference_forward(x, w1, b1, w2, b2, wd, bd):
    """Pure numpy replica of the PyTorch forward (eval mode)."""
    B = x.shape[0]
    x0 = x.reshape(B, NEIGHBOR, MZ)
    pooled = x0.reshape(B, NEIGHBOR, RED, SR).max(axis=-1)          # maxpool1
    pad1 = np.pad(pooled, ((0, 0), (0, 0), (2, 2)))
    c1 = np.zeros((B, 4, RED), np.float32)
    for kw in range(KW):
        c1 += np.einsum('oh,bhw->bow', w1[:, 0, :, kw], pad1[:, :, kw:kw + RED])
    c1 = np.maximum(c1 + b1[None, :, None], 0.0)                    # conv1 + relu
    pad2 = np.pad(c1, ((0, 0), (0, 0), (2, 2)))
    c2 = np.zeros((B, 4, RED), np.float32)
    for kw in range(KW):
        c2 += np.einsum('oi,biw->bow', w2[:, :, 0, kw], pad2[:, :, kw:kw + RED])
    c2 = np.maximum(c2 + b2[None, :, None], 0.0)                    # conv2 + relu
    pad3 = np.pad(c2, ((0, 0), (0, 0), (1, 1)), constant_values=-np.inf)
    p = np.zeros((B, 4, OUTW), np.float32)
    for j in range(OUTW):
        p[:, :, j] = pad3[:, :, 4 * j:4 * j + 6].max(axis=-1)       # maxpool2
    flat = p.reshape(B, DENSE_IN)                                   # NCHW flatten
    out = np.maximum(flat @ wd.T + bd[None, :], 0.0)                # dense1 + relu
    return out[None]                                                # unsqueeze(0)


if __name__ == "__main__":
    key = jax.random.PRNGKey(0)
    ks = jax.random.split(key, 7)
    w1 = jax.random.normal(ks[1], (4, 1, NEIGHBOR, KW), jnp.float32) * 0.2
    b1 = jax.random.normal(ks[2], (4,), jnp.float32) * 0.1
    w2 = jax.random.normal(ks[3], (4, 4, 1, KW), jnp.float32) * 0.2
    b2 = jax.random.normal(ks[4], (4,), jnp.float32) * 0.1
    wd = jax.random.normal(ks[5], (NUM_UNITS, DENSE_IN), jnp.float32) * 0.1
    bd = jax.random.normal(ks[6], (NUM_UNITS,), jnp.float32) * 0.1
    wn = [np.asarray(a) for a in (w1, b1, w2, b2, wd, bd)]

    # B=2: single-tile path.  B=300: multi-tile path (NT=3, batch padding not a
    # multiple of the lane tile) — exercises grid sharding and the slice-off.
    for B in (2, 300):
        x = jax.random.uniform(jax.random.fold_in(ks[0], B),
                               (B, NEIGHBOR, MZ), jnp.float32)
        ref = reference_forward(np.asarray(x), *wn)

        # exact regression path (f32 end-to-end)
        out32 = jax.block_until_ready(
            spectrum_cnn2_forward(x, w1, b1, w2, b2, wd, bd,
                                  compute_dtype=jnp.float32))
        assert out32.shape == (1, B, NUM_UNITS), out32.shape
        np.testing.assert_allclose(np.asarray(out32), ref, rtol=1e-3, atol=1e-3)

        # default fast path (bf16 MXU operands, f32 accumulation / elementwise)
        outbf = jax.block_until_ready(
            spectrum_cnn2_forward(x, w1, b1, w2, b2, wd, bd,
                                  compute_dtype=jnp.bfloat16))
        assert outbf.shape == (1, B, NUM_UNITS), outbf.shape
        np.testing.assert_allclose(np.asarray(outbf), ref, rtol=6e-2, atol=6e-2)

    print("KERNEL_OK")
</pallas_src>

<mosaic_0001>
module attributes {stable_mosaic.version = 11 : i64} {
  func.func @spectrum_cnn2_kernel(%arg0: i32, %arg1: memref<1x5x8704xf32, #tpu.memory_space<vmem>>, %arg2: memref<20x5xf32, #tpu.memory_space<vmem>>, %arg3: memref<4x1xf32, #tpu.memory_space<vmem>>, %arg4: memref<20x4xf32, #tpu.memory_space<vmem>>, %arg5: memref<4x1xf32, #tpu.memory_space<vmem>>, %arg6: memref<32x64xf32, #tpu.memory_space<vmem>>, %arg7: memref<32x1xf32, #tpu.memory_space<vmem>>, %arg8: memref<32x128xf32, #tpu.memory_space<vmem>>, %arg9: memref<20x8704xf32, #tpu.memory_space<vmem>>, %arg10: memref<4x8704xf32, #tpu.memory_space<vmem>>, %arg11: memref<4x8192xf32, #tpu.memory_space<vmem>>, %arg12: memref<64x128xf32, #tpu.memory_space<vmem>>) attributes {dimension_semantics = [#tpu.dimension_semantics<parallel>], iteration_bounds = array<i64: 1>, scalar_prefetch = 0 : i64, scratch_operands = 4 : i64, tpu.core_type = #tpu.core_type<tc>, window_params = [{transform_indices = @transform_0, window_bounds = array<i64: 1, 5, 8704>}, {pipeline_mode = #tpu.pipeline_mode<synchronous>, transform_indices = @transform_1, window_bounds = array<i64: 20, 5>}, {pipeline_mode = #tpu.pipeline_mode<synchronous>, transform_indices = @transform_2, window_bounds = array<i64: 4, 1>}, {pipeline_mode = #tpu.pipeline_mode<synchronous>, transform_indices = @transform_3, window_bounds = array<i64: 20, 4>}, {pipeline_mode = #tpu.pipeline_mode<synchronous>, transform_indices = @transform_4, window_bounds = array<i64: 4, 1>}, {pipeline_mode = #tpu.pipeline_mode<synchronous>, transform_indices = @transform_5, window_bounds = array<i64: 32, 64>}, {pipeline_mode = #tpu.pipeline_mode<synchronous>, transform_indices = @transform_6, window_bounds = array<i64: 32, 1>}, {transform_indices = @transform_7, window_bounds = array<i64: 32, 128>}]} {
    %cst = arith.constant 0.000000e+00 : f32
    %0 = vector.broadcast %cst : f32 to vector<4x256xf32>
    %c0 = arith.constant 0 : index
    %c0_0 = arith.constant 0 : index
    %1 = vector.load %arg10[%c0, %c0_0] : memref<4x8704xf32, #tpu.memory_space<vmem>>, vector<4x256xf32>
    tpu.vector_store %arg10[%c0, %c0_0], %0 {strides = array<i32>} : memref<4x8704xf32, #tpu.memory_space<vmem>>, vector<4x256xf32>,
    %c0_1 = arith.constant 0 : index
    %c8448 = arith.constant 8448 : index
    %2 = vector.load %arg10[%c0_1, %c8448] : memref<4x8704xf32, #tpu.memory_space<vmem>>, vector<4x256xf32>
    tpu.vector_store %arg10[%c0_1, %c8448], %0 {strides = array<i32>} : memref<4x8704xf32, #tpu.memory_space<vmem>>, vector<4x256xf32>,
    %c0_2 = arith.constant 0 : index
    %c0_3 = arith.constant 0 : index
    %3 = vector.load %arg2[%c0_2, %c0_3] : memref<20x5xf32, #tpu.memory_space<vmem>>, vector<20x5xf32>
    %c0_4 = arith.constant 0 : index
    %c0_5 = arith.constant 0 : index
    %c0_6 = arith.constant 0 : index
    %4 = vector.load %arg1[%c0_4, %c0_5, %c0_6] : memref<1x5x8704xf32, #tpu.memory_space<vmem>>, vector<1x5x8704xf32>
    %5 = vector.shape_cast %4 : vector<1x5x8704xf32> to vector<5x8704xf32>
    %cst_7 = arith.constant dense<0.000000e+00> : vector<20x8704xf32>
    %6 = tpu.matmul %3, %5, %cst_7 {dimension_numbers = #tpu.dot_dimension_numbers<[1], [0], [0], [1], [0, 0, 1, 1], [], []>} : vector<20x5xf32>, vector<5x8704xf32>, vector<20x8704xf32> -> vector<20x8704xf32>
    %c0_8 = arith.constant 0 : index
    %c0_9 = arith.constant 0 : index
    %7 = vector.load %arg9[%c0_8, %c0_9] : memref<20x8704xf32, #tpu.memory_space<vmem>>, vector<20x8704xf32>
    tpu.vector_store %arg9[%c0_8, %c0_9], %6 {strides = array<i32>} : memref<20x8704xf32, #tpu.memory_space<vmem>>, vector<20x8704xf32>,
    %c0_10 = arith.constant 0 : index
    %c0_11 = arith.constant 0 : index
    %8 = vector.load %arg9[%c0_10, %c0_11] : memref<20x8704xf32, #tpu.memory_space<vmem>>, vector<4x8192xf32>
    %c4 = arith.constant 4 : index
    %c128 = arith.constant 128 : index
    %9 = vector.load %arg9[%c4, %c128] : memref<20x8704xf32, #tpu.memory_space<vmem>>, vector<4x8192xf32>
    %10 = arith.addf %8, %9 : vector<4x8192xf32>
    %c8 = arith.constant 8 : index
    %c256 = arith.constant 256 : index
    %11 = vector.load %arg9[%c8, %c256] : memref<20x8704xf32, #tpu.memory_space<vmem>>, vector<4x8192xf32>
    %12 = arith.addf %10, %11 : vector<4x8192xf32>
    %c12 = arith.constant 12 : index
    %c384 = arith.constant 384 : index
    %13 = vector.load %arg9[%c12, %c384] : memref<20x8704xf32, #tpu.memory_space<vmem>>, vector<4x8192xf32>
    %14 = arith.addf %12, %13 : vector<4x8192xf32>
    %c16 = arith.constant 16 : index
    %c512 = arith.constant 512 : index
    %15 = vector.load %arg9[%c16, %c512] : memref<20x8704xf32, #tpu.memory_space<vmem>>, vector<4x8192xf32>
    %16 = arith.addf %14, %15 : vector<4x8192xf32>
    %c0_12 = arith.constant 0 : index
    %c0_13 = arith.constant 0 : index
    %17 = vector.load %arg3[%c0_12, %c0_13] : memref<4x1xf32, #tpu.memory_space<vmem>>, vector<4x1xf32>
    %18 = vector.broadcast %17 : vector<4x1xf32> to vector<4x8192xf32>
    %19 = arith.addf %16, %18 : vector<4x8192xf32>
    %cst_14 = arith.constant 0.000000e+00 : f32
    %20 = vector.broadcast %cst_14 : f32 to vector<4x8192xf32>
    %21 = arith.maximumf %19, %20 : vector<4x8192xf32>
    %c0_15 = arith.constant 0 : index
    %c256_16 = arith.constant 256 : index
    %22 = vector.load %arg10[%c0_15, %c256_16] : memref<4x8704xf32, #tpu.memory_space<vmem>>, vector<4x8192xf32>
    tpu.vector_store %arg10[%c0_15, %c256_16], %21 {strides = array<i32>} : memref<4x8704xf32, #tpu.memory_space<vmem>>, vector<4x8192xf32>,
    %c0_17 = arith.constant 0 : index
    %c0_18 = arith.constant 0 : index
    %23 = vector.load %arg4[%c0_17, %c0_18] : memref<20x4xf32, #tpu.memory_space<vmem>>, vector<20x4xf32>
    %c0_19 = arith.constant 0 : index
    %c0_20 = arith.constant 0 : index
    %24 = vector.load %arg10[%c0_19, %c0_20] : memref<4x8704xf32, #tpu.memory_space<vmem>>, vector<4x8704xf32>
    %cst_21 = arith.constant dense<0.000000e+00> : vector<20x8704xf32>
    %25 = tpu.matmul %23, %24, %cst_21 {dimension_numbers = #tpu.dot_dimension_numbers<[1], [0], [0], [1], [0, 0, 1, 1], [], []>} : vector<20x4xf32>, vector<4x8704xf32>, vector<20x8704xf32> -> vector<20x8704xf32>
    %c0_22 = arith.constant 0 : index
    %c0_23 = arith.constant 0 : index
    %26 = vector.load %arg9[%c0_22, %c0_23] : memref<20x8704xf32, #tpu.memory_space<vmem>>, vector<20x8704xf32>
    tpu.vector_store %arg9[%c0_22, %c0_23], %25 {strides = array<i32>} : memref<20x8704xf32, #tpu.memory_space<vmem>>, vector<20x8704xf32>,
    %c0_24 = arith.constant 0 : index
    %c0_25 = arith.constant 0 : index
    %27 = vector.load %arg9[%c0_24, %c0_25] : memref<20x8704xf32, #tpu.memory_space<vmem>>, vector<4x8192xf32>
    %c4_26 = arith.constant 4 : index
    %c128_27 = arith.constant 128 : index
    %28 = vector.load %arg9[%c4_26, %c128_27] : memref<20x8704xf32, #tpu.memory_space<vmem>>, vector<4x8192xf32>
    %29 = arith.addf %27, %28 : vector<4x8192xf32>
    %c8_28 = arith.constant 8 : index
    %c256_29 = arith.constant 256 : index
    %30 = vector.load %arg9[%c8_28, %c256_29] : memref<20x8704xf32, #tpu.memory_space<vmem>>, vector<4x8192xf32>
    %31 = arith.addf %29, %30 : vector<4x8192xf32>
    %c12_30 = arith.constant 12 : index
    %c384_31 = arith.constant 384 : index
    %32 = vector.load %arg9[%c12_30, %c384_31] : memref<20x8704xf32, #tpu.memory_space<vmem>>, vector<4x8192xf32>
    %33 = arith.addf %31, %32 : vector<4x8192xf32>
    %c16_32 = arith.constant 16 : index
    %c512_33 = arith.constant 512 : index
    %34 = vector.load %arg9[%c16_32, %c512_33] : memref<20x8704xf32, #tpu.memory_space<vmem>>, vector<4x8192xf32>
    %35 = arith.addf %33, %34 : vector<4x8192xf32>
    %c0_34 = arith.constant 0 : index
    %c0_35 = arith.constant 0 : index
    %36 = vector.load %arg5[%c0_34, %c0_35] : memref<4x1xf32, #tpu.memory_space<vmem>>, vector<4x1xf32>
    %37 = vector.broadcast %36 : vector<4x1xf32> to vector<4x8192xf32>
    %38 = arith.addf %35, %37 : vector<4x8192xf32>
    %cst_36 = arith.constant 0.000000e+00 : f32
    %39 = vector.broadcast %cst_36 : f32 to vector<4x8192xf32>
    %40 = arith.maximumf %38, %39 : vector<4x8192xf32>
    %c0_37 = arith.constant 0 : index
    %c0_38 = arith.constant 0 : index
    %41 = vector.load %arg11[%c0_37, %c0_38] : memref<4x8192xf32, #tpu.memory_space<vmem>>, vector<4x8192xf32>
    tpu.vector_store %arg11[%c0_37, %c0_38], %40 {strides = array<i32>} : memref<4x8192xf32, #tpu.memory_space<vmem>>, vector<4x8192xf32>,
    %c0_39 = arith.constant 0 : index
    %c0_40 = arith.constant 0 : index
    %42 = vector.load %arg11[%c0_39, %c0_40] : memref<4x8192xf32, #tpu.memory_space<vmem>>, vector<4x128xf32>
    %c0_41 = arith.constant 0 : index
    %c128_42 = arith.constant 128 : index
    %43 = vector.load %arg11[%c0_41, %c128_42] : memref<4x8192xf32, #tpu.memory_space<vmem>>, vector<4x128xf32>
    %44 = arith.maximumf %42, %43 : vector<4x128xf32>
    %c0_43 = arith.constant 0 : index
    %c256_44 = arith.constant 256 : index
    %45 = vector.load %arg11[%c0_43, %c256_44] : memref<4x8192xf32, #tpu.memory_space<vmem>>, vector<4x128xf32>
    %46 = arith.maximumf %44, %45 : vector<4x128xf32>
    %c0_45 = arith.constant 0 : index
    %c384_46 = arith.constant 384 : index
    %47 = vector.load %arg11[%c0_45, %c384_46] : memref<4x8192xf32, #tpu.memory_space<vmem>>, vector<4x128xf32>
    %48 = arith.maximumf %46, %47 : vector<4x128xf32>
    %c0_47 = arith.constant 0 : index
    %c512_48 = arith.constant 512 : index
    %49 = vector.load %arg11[%c0_47, %c512_48] : memref<4x8192xf32, #tpu.memory_space<vmem>>, vector<4x128xf32>
    %50 = arith.maximumf %48, %49 : vector<4x128xf32>
    %c0_49 = arith.constant 0 : index
    %c384_50 = arith.constant 384 : index
    %51 = vector.load %arg11[%c0_49, %c384_50] : memref<4x8192xf32, #tpu.memory_space<vmem>>, vector<4x128xf32>
    %c0_51 = arith.constant 0 : index
    %c512_52 = arith.constant 512 : index
    %52 = vector.load %arg11[%c0_51, %c512_52] : memref<4x8192xf32, #tpu.memory_space<vmem>>, vector<4x128xf32>
    %53 = arith.maximumf %51, %52 : vector<4x128xf32>
    %c0_53 = arith.constant 0 : index
    %c640 = arith.constant 640 : index
    %54 = vector.load %arg11[%c0_53, %c640] : memref<4x8192xf32, #tpu.memory_space<vmem>>, vector<4x128xf32>
    %55 = arith.maximumf %53, %54 : vector<4x128xf32>
    %c0_54 = arith.constant 0 : index
    %c768 = arith.constant 768 : index
    %56 = vector.load %arg11[%c0_54, %c768] : memref<4x8192xf32, #tpu.memory_space<vmem>>, vector<4x128xf32>
    %57 = arith.maximumf %55, %56 : vector<4x128xf32>
    %c0_55 = arith.constant 0 : index
    %c896 = arith.constant 896 : index
    %58 = vector.load %arg11[%c0_55, %c896] : memref<4x8192xf32, #tpu.memory_space<vmem>>, vector<4x128xf32>
    %59 = arith.maximumf %57, %58 : vector<4x128xf32>
    %c0_56 = arith.constant 0 : index
    %c1024 = arith.constant 1024 : index
    %60 = vector.load %arg11[%c0_56, %c1024] : memref<4x8192xf32, #tpu.memory_space<vmem>>, vector<4x128xf32>
    %61 = arith.maximumf %59, %60 : vector<4x128xf32>
    %62 = tpu.concatenate %50, %61 in 0 : vector<4x128xf32>, vector<4x128xf32> -> vector<8x128xf32>
    %c0_57 = arith.constant 0 : index
    %c0_58 = arith.constant 0 : index
    %63 = vector.load %arg12[%c0_57, %c0_58] : memref<64x128xf32, #tpu.memory_space<vmem>>, vector<8x128xf32>
    tpu.vector_store %arg12[%c0_57, %c0_58], %62 {strides = array<i32>} : memref<64x128xf32, #tpu.memory_space<vmem>>, vector<8x128xf32>,
    %c0_59 = arith.constant 0 : index
    %c896_60 = arith.constant 896 : index
    %64 = vector.load %arg11[%c0_59, %c896_60] : memref<4x8192xf32, #tpu.memory_space<vmem>>, vector<4x128xf32>
    %c0_61 = arith.constant 0 : index
    %c1024_62 = arith.constant 1024 : index
    %65 = vector.load %arg11[%c0_61, %c1024_62] : memref<4x8192xf32, #tpu.memory_space<vmem>>, vector<4x128xf32>
    %66 = arith.maximumf %64, %65 : vector<4x128xf32>
    %c0_63 = arith.constant 0 : index
    %c1152 = arith.constant 1152 : index
    %67 = vector.load %arg11[%c0_63, %c1152] : memref<4x8192xf32, #tpu.memory_space<vmem>>, vector<4x128xf32>
    %68 = arith.maximumf %66, %67 : vector<4x128xf32>
    %c0_64 = arith.constant 0 : index
    %c1280 = arith.constant 1280 : index
    %69 = vector.load %arg11[%c0_64, %c1280] : memref<4x8192xf32, #tpu.memory_space<vmem>>, vector<4x128xf32>
    %70 = arith.maximumf %68, %69 : vector<4x128xf32>
    %c0_65 = arith.constant 0 : index
    %c1408 = arith.constant 1408 : index
    %71 = vector.load %arg11[%c0_65, %c1408] : memref<4x8192xf32, #tpu.memory_space<vmem>>, vector<4x128xf32>
    %72 = arith.maximumf %70, %71 : vector<4x128xf32>
    %c0_66 = arith.constant 0 : index
    %c1536 = arith.constant 1536 : index
    %73 = vector.load %arg11[%c0_66, %c1536] : memref<4x8192xf32, #tpu.memory_space<vmem>>, vector<4x128xf32>
    %74 = arith.maximumf %72, %73 : vector<4x128xf32>
    %c0_67 = arith.constant 0 : index
    %c1408_68 = arith.constant 1408 : index
    %75 = vector.load %arg11[%c0_67, %c1408_68] : memref<4x8192xf32, #tpu.memory_space<vmem>>, vector<4x128xf32>
    %c0_69 = arith.constant 0 : index
    %c1536_70 = arith.constant 1536 : index
    %76 = vector.load %arg11[%c0_69, %c1536_70] : memref<4x8192xf32, #tpu.memory_space<vmem>>, vector<4x128xf32>
    %77 = arith.maximumf %75, %76 : vector<4x128xf32>
    %c0_71 = arith.constant 0 : index
    %c1664 = arith.constant 1664 : index
    %78 = vector.load %arg11[%c0_71, %c1664] : memref<4x8192xf32, #tpu.memory_space<vmem>>, vector<4x128xf32>
    %79 = arith.maximumf %77, %78 : vector<4x128xf32>
    %c0_72 = arith.constant 0 : index
    %c1792 = arith.constant 1792 : index
    %80 = vector.load %arg11[%c0_72, %c1792] : memref<4x8192xf32, #tpu.memory_space<vmem>>, vector<4x128xf32>
    %81 = arith.maximumf %79, %80 : vector<4x128xf32>
    %c0_73 = arith.constant 0 : index
    %c1920 = arith.constant 1920 : index
    %82 = vector.load %arg11[%c0_73, %c1920] : memref<4x8192xf32, #tpu.memory_space<vmem>>, vector<4x128xf32>
    %83 = arith.maximumf %81, %82 : vector<4x128xf32>
    %c0_74 = arith.constant 0 : index
    %c2048 = arith.constant 2048 : index
    %84 = vector.load %arg11[%c0_74, %c2048] : memref<4x8192xf32, #tpu.memory_space<vmem>>, vector<4x128xf32>
    %85 = arith.maximumf %83, %84 : vector<4x128xf32>
    %86 = tpu.concatenate %74, %85 in 0 : vector<4x128xf32>, vector<4x128xf32> -> vector<8x128xf32>
    %c8_75 = arith.constant 8 : index
    %c0_76 = arith.constant 0 : index
    %87 = vector.load %arg12[%c8_75, %c0_76] : memref<64x128xf32, #tpu.memory_space<vmem>>, vector<8x128xf32>
    tpu.vector_store %arg12[%c8_75, %c0_76], %86 {strides = array<i32>} : memref<64x128xf32, #tpu.memory_space<vmem>>, vector<8x128xf32>,
    %c0_77 = arith.constant 0 : index
    %c1920_78 = arith.constant 1920 : index
    %88 = vector.load %arg11[%c0_77, %c1920_78] : memref<4x8192xf32, #tpu.memory_space<vmem>>, vector<4x128xf32>
    %c0_79 = arith.constant 0 : index
    %c2048_80 = arith.constant 2048 : index
    %89 = vector.load %arg11[%c0_79, %c2048_80] : memref<4x8192xf32, #tpu.memory_space<vmem>>, vector<4x128xf32>
    %90 = arith.maximumf %88, %89 : vector<4x128xf32>
    %c0_81 = arith.constant 0 : index
    %c2176 = arith.constant 2176 : index
    %91 = vector.load %arg11[%c0_81, %c2176] : memref<4x8192xf32, #tpu.memory_space<vmem>>, vector<4x128xf32>
    %92 = arith.maximumf %90, %91 : vector<4x128xf32>
    %c0_82 = arith.constant 0 : index
    %c2304 = arith.constant 2304 : index
    %93 = vector.load %arg11[%c0_82, %c2304] : memref<4x8192xf32, #tpu.memory_space<vmem>>, vector<4x128xf32>
    %94 = arith.maximumf %92, %93 : vector<4x128xf32>
    %c0_83 = arith.constant 0 : index
    %c2432 = arith.constant 2432 : index
    %95 = vector.load %arg11[%c0_83, %c2432] : memref<4x8192xf32, #tpu.memory_space<vmem>>, vector<4x128xf32>
    %96 = arith.maximumf %94, %95 : vector<4x128xf32>
    %c0_84 = arith.constant 0 : index
    %c2560 = arith.constant 2560 : index
    %97 = vector.load %arg11[%c0_84, %c2560] : memref<4x8192xf32, #tpu.memory_space<vmem>>, vector<4x128xf32>
    %98 = arith.maximumf %96, %97 : vector<4x128xf32>
    %c0_85 = arith.constant 0 : index
    %c2432_86 = arith.constant 2432 : index
    %99 = vector.load %arg11[%c0_85, %c2432_86] : memref<4x8192xf32, #tpu.memory_space<vmem>>, vector<4x128xf32>
    %c0_87 = arith.constant 0 : index
    %c2560_88 = arith.constant 2560 : index
    %100 = vector.load %arg11[%c0_87, %c2560_88] : memref<4x8192xf32, #tpu.memory_space<vmem>>, vector<4x128xf32>
    %101 = arith.maximumf %99, %100 : vector<4x128xf32>
    %c0_89 = arith.constant 0 : index
    %c2688 = arith.constant 2688 : index
    %102 = vector.load %arg11[%c0_89, %c2688] : memref<4x8192xf32, #tpu.memory_space<vmem>>, vector<4x128xf32>
    %103 = arith.maximumf %101, %102 : vector<4x128xf32>
    %c0_90 = arith.constant 0 : index
    %c2816 = arith.constant 2816 : index
    %104 = vector.load %arg11[%c0_90, %c2816] : memref<4x8192xf32, #tpu.memory_space<vmem>>, vector<4x128xf32>
    %105 = arith.maximumf %103, %104 : vector<4x128xf32>
    %c0_91 = arith.constant 0 : index
    %c2944 = arith.constant 2944 : index
    %106 = vector.load %arg11[%c0_91, %c2944] : memref<4x8192xf32, #tpu.memory_space<vmem>>, vector<4x128xf32>
    %107 = arith.maximumf %105, %106 : vector<4x128xf32>
    %c0_92 = arith.constant 0 : index
    %c3072 = arith.constant 3072 : index
    %108 = vector.load %arg11[%c0_92, %c3072] : memref<4x8192xf32, #tpu.memory_space<vmem>>, vector<4x128xf32>
    %109 = arith.maximumf %107, %108 : vector<4x128xf32>
    %110 = tpu.concatenate %98, %109 in 0 : vector<4x128xf32>, vector<4x128xf32> -> vector<8x128xf32>
    %c16_93 = arith.constant 16 : index
    %c0_94 = arith.constant 0 : index
    %111 = vector.load %arg12[%c16_93, %c0_94] : memref<64x128xf32, #tpu.memory_space<vmem>>, vector<8x128xf32>
    tpu.vector_store %arg12[%c16_93, %c0_94], %110 {strides = array<i32>} : memref<64x128xf32, #tpu.memory_space<vmem>>, vector<8x128xf32>,
    %c0_95 = arith.constant 0 : index
    %c2944_96 = arith.constant 2944 : index
    %112 = vector.load %arg11[%c0_95, %c2944_96] : memref<4x8192xf32, #tpu.memory_space<vmem>>, vector<4x128xf32>
    %c0_97 = arith.constant 0 : index
    %c3072_98 = arith.constant 3072 : index
    %113 = vector.load %arg11[%c0_97, %c3072_98] : memref<4x8192xf32, #tpu.memory_space<vmem>>, vector<4x128xf32>
    %114 = arith.maximumf %112, %113 : vector<4x128xf32>
    %c0_99 = arith.constant 0 : index
    %c3200 = arith.constant 3200 : index
    %115 = vector.load %arg11[%c0_99, %c3200] : memref<4x8192xf32, #tpu.memory_space<vmem>>, vector<4x128xf32>
    %116 = arith.maximumf %114, %115 : vector<4x128xf32>
    %c0_100 = arith.constant 0 : index
    %c3328 = arith.constant 3328 : index
    %117 = vector.load %arg11[%c0_100, %c3328] : memref<4x8192xf32, #tpu.memory_space<vmem>>, vector<4x128xf32>
    %118 = arith.maximumf %116, %117 : vector<4x128xf32>
    %c0_101 = arith.constant 0 : index
    %c3456 = arith.constant 3456 : index
    %119 = vector.load %arg11[%c0_101, %c3456] : memref<4x8192xf32, #tpu.memory_space<vmem>>, vector<4x128xf32>
    %120 = arith.maximumf %118, %119 : vector<4x128xf32>
    %c0_102 = arith.constant 0 : index
    %c3584 = arith.constant 3584 : index
    %121 = vector.load %arg11[%c0_102, %c3584] : memref<4x8192xf32, #tpu.memory_space<vmem>>, vector<4x128xf32>
    %122 = arith.maximumf %120, %121 : vector<4x128xf32>
    %c0_103 = arith.constant 0 : index
    %c3456_104 = arith.constant 3456 : index
    %123 = vector.load %arg11[%c0_103, %c3456_104] : memref<4x8192xf32, #tpu.memory_space<vmem>>, vector<4x128xf32>
    %c0_105 = arith.constant 0 : index
    %c3584_106 = arith.constant 3584 : index
    %124 = vector.load %arg11[%c0_105, %c3584_106] : memref<4x8192xf32, #tpu.memory_space<vmem>>, vector<4x128xf32>
    %125 = arith.maximumf %123, %124 : vector<4x128xf32>
    %c0_107 = arith.constant 0 : index
    %c3712 = arith.constant 3712 : index
    %126 = vector.load %arg11[%c0_107, %c3712] : memref<4x8192xf32, #tpu.memory_space<vmem>>, vector<4x128xf32>
    %127 = arith.maximumf %125, %126 : vector<4x128xf32>
    %c0_108 = arith.constant 0 : index
    %c3840 = arith.constant 3840 : index
    %128 = vector.load %arg11[%c0_108, %c3840] : memref<4x8192xf32, #tpu.memory_space<vmem>>, vector<4x128xf32>
    %129 = arith.maximumf %127, %128 : vector<4x128xf32>
    %c0_109 = arith.constant 0 : index
    %c3968 = arith.constant 3968 : index
    %130 = vector.load %arg11[%c0_109, %c3968] : memref<4x8192xf32, #tpu.memory_space<vmem>>, vector<4x128xf32>
    %131 = arith.maximumf %129, %130 : vector<4x128xf32>
    %c0_110 = arith.constant 0 : index
    %c4096 = arith.constant 4096 : index
    %132 = vector.load %arg11[%c0_110, %c4096] : memref<4x8192xf32, #tpu.memory_space<vmem>>, vector<4x128xf32>
    %133 = arith.maximumf %131, %132 : vector<4x128xf32>
    %134 = tpu.concatenate %122, %133 in 0 : vector<4x128xf32>, vector<4x128xf32> -> vector<8x128xf32>
    %c24 = arith.constant 24 : index
    %c0_111 = arith.constant 0 : index
    %135 = vector.load %arg12[%c24, %c0_111] : memref<64x128xf32, #tpu.memory_space<vmem>>, vector<8x128xf32>
    tpu.vector_store %arg12[%c24, %c0_111], %134 {strides = array<i32>} : memref<64x128xf32, #tpu.memory_space<vmem>>, vector<8x128xf32>,
    %c0_112 = arith.constant 0 : index
    %c3968_113 = arith.constant 3968 : index
    %136 = vector.load %arg11[%c0_112, %c3968_113] : memref<4x8192xf32, #tpu.memory_space<vmem>>, vector<4x128xf32>
    %c0_114 = arith.constant 0 : index
    %c4096_115 = arith.constant 4096 : index
    %137 = vector.load %arg11[%c0_114, %c4096_115] : memref<4x8192xf32, #tpu.memory_space<vmem>>, vector<4x128xf32>
    %138 = arith.maximumf %136, %137 : vector<4x128xf32>
    %c0_116 = arith.constant 0 : index
    %c4224 = arith.constant 4224 : index
    %139 = vector.load %arg11[%c0_116, %c4224] : memref<4x8192xf32, #tpu.memory_space<vmem>>, vector<4x128xf32>
    %140 = arith.maximumf %138, %139 : vector<4x128xf32>
    %c0_117 = arith.constant 0 : index
    %c4352 = arith.constant 4352 : index
    %141 = vector.load %arg11[%c0_117, %c4352] : memref<4x8192xf32, #tpu.memory_space<vmem>>, vector<4x128xf32>
    %142 = arith.maximumf %140, %141 : vector<4x128xf32>
    %c0_118 = arith.constant 0 : index
    %c4480 = arith.constant 4480 : index
    %143 = vector.load %arg11[%c0_118, %c4480] : memref<4x8192xf32, #tpu.memory_space<vmem>>, vector<4x128xf32>
    %144 = arith.maximumf %142, %143 : vector<4x128xf32>
    %c0_119 = arith.constant 0 : index
    %c4608 = arith.constant 4608 : index
    %145 = vector.load %arg11[%c0_119, %c4608] : memref<4x8192xf32, #tpu.memory_space<vmem>>, vector<4x128xf32>
    %146 = arith.maximumf %144, %145 : vector<4x128xf32>
    %c0_120 = arith.constant 0 : index
    %c4480_121 = arith.constant 4480 : index
    %147 = vector.load %arg11[%c0_120, %c4480_121] : memref<4x8192xf32, #tpu.memory_space<vmem>>, vector<4x128xf32>
    %c0_122 = arith.constant 0 : index
    %c4608_123 = arith.constant 4608 : index
    %148 = vector.load %arg11[%c0_122, %c4608_123] : memref<4x8192xf32, #tpu.memory_space<vmem>>, vector<4x128xf32>
    %149 = arith.maximumf %147, %148 : vector<4x128xf32>
    %c0_124 = arith.constant 0 : index
    %c4736 = arith.constant 4736 : index
    %150 = vector.load %arg11[%c0_124, %c4736] : memref<4x8192xf32, #tpu.memory_space<vmem>>, vector<4x128xf32>
    %151 = arith.maximumf %149, %150 : vector<4x128xf32>
    %c0_125 = arith.constant 0 : index
    %c4864 = arith.constant 4864 : index
    %152 = vector.load %arg11[%c0_125, %c4864] : memref<4x8192xf32, #tpu.memory_space<vmem>>, vector<4x128xf32>
    %153 = arith.maximumf %151, %152 : vector<4x128xf32>
    %c0_126 = arith.constant 0 : index
    %c4992 = arith.constant 4992 : index
    %154 = vector.load %arg11[%c0_126, %c4992] : memref<4x8192xf32, #tpu.memory_space<vmem>>, vector<4x128xf32>
    %155 = arith.maximumf %153, %154 : vector<4x128xf32>
    %c0_127 = arith.constant 0 : index
    %c5120 = arith.constant 5120 : index
    %156 = vector.load %arg11[%c0_127, %c5120] : memref<4x8192xf32, #tpu.memory_space<vmem>>, vector<4x128xf32>
    %157 = arith.maximumf %155, %156 : vector<4x128xf32>
    %158 = tpu.concatenate %146, %157 in 0 : vector<4x128xf32>, vector<4x128xf32> -> vector<8x128xf32>
    %c32 = arith.constant 32 : index
    %c0_128 = arith.constant 0 : index
    %159 = vector.load %arg12[%c32, %c0_128] : memref<64x128xf32, #tpu.memory_space<vmem>>, vector<8x128xf32>
    tpu.vector_store %arg12[%c32, %c0_128], %158 {strides = array<i32>} : memref<64x128xf32, #tpu.memory_space<vmem>>, vector<8x128xf32>,
    %c0_129 = arith.constant 0 : index
    %c4992_130 = arith.constant 4992 : index
    %160 = vector.load %arg11[%c0_129, %c4992_130] : memref<4x8192xf32, #tpu.memory_space<vmem>>, vector<4x128xf32>
    %c0_131 = arith.constant 0 : index
    %c5120_132 = arith.constant 5120 : index
    %161 = vector.load %arg11[%c0_131, %c5120_132] : memref<4x8192xf32, #tpu.memory_space<vmem>>, vector<4x128xf32>
    %162 = arith.maximumf %160, %161 : vector<4x128xf32>
    %c0_133 = arith.constant 0 : index
    %c5248 = arith.constant 5248 : index
    %163 = vector.load %arg11[%c0_133, %c5248] : memref<4x8192xf32, #tpu.memory_space<vmem>>, vector<4x128xf32>
    %164 = arith.maximumf %162, %163 : vector<4x128xf32>
    %c0_134 = arith.constant 0 : index
    %c5376 = arith.constant 5376 : index
    %165 = vector.load %arg11[%c0_134, %c5376] : memref<4x8192xf32, #tpu.memory_space<vmem>>, vector<4x128xf32>
    %166 = arith.maximumf %164, %165 : vector<4x128xf32>
    %c0_135 = arith.constant 0 : index
    %c5504 = arith.constant 5504 : index
    %167 = vector.load %arg11[%c0_135, %c5504] : memref<4x8192xf32, #tpu.memory_space<vmem>>, vector<4x128xf32>
    %168 = arith.maximumf %166, %167 : vector<4x128xf32>
    %c0_136 = arith.constant 0 : index
    %c5632 = arith.constant 5632 : index
    %169 = vector.load %arg11[%c0_136, %c5632] : memref<4x8192xf32, #tpu.memory_space<vmem>>, vector<4x128xf32>
    %170 = arith.maximumf %168, %169 : vector<4x128xf32>
    %c0_137 = arith.constant 0 : index
    %c5504_138 = arith.constant 5504 : index
    %171 = vector.load %arg11[%c0_137, %c5504_138] : memref<4x8192xf32, #tpu.memory_space<vmem>>, vector<4x128xf32>
    %c0_139 = arith.constant 0 : index
    %c5632_140 = arith.constant 5632 : index
    %172 = vector.load %arg11[%c0_139, %c5632_140] : memref<4x8192xf32, #tpu.memory_space<vmem>>, vector<4x128xf32>
    %173 = arith.maximumf %171, %172 : vector<4x128xf32>
    %c0_141 = arith.constant 0 : index
    %c5760 = arith.constant 5760 : index
    %174 = vector.load %arg11[%c0_141, %c5760] : memref<4x8192xf32, #tpu.memory_space<vmem>>, vector<4x128xf32>
    %175 = arith.maximumf %173, %174 : vector<4x128xf32>
    %c0_142 = arith.constant 0 : index
    %c5888 = arith.constant 5888 : index
    %176 = vector.load %arg11[%c0_142, %c5888] : memref<4x8192xf32, #tpu.memory_space<vmem>>, vector<4x128xf32>
    %177 = arith.maximumf %175, %176 : vector<4x128xf32>
    %c0_143 = arith.constant 0 : index
    %c6016 = arith.constant 6016 : index
    %178 = vector.load %arg11[%c0_143, %c6016] : memref<4x8192xf32, #tpu.memory_space<vmem>>, vector<4x128xf32>
    %179 = arith.maximumf %177, %178 : vector<4x128xf32>
    %c0_144 = arith.constant 0 : index
    %c6144 = arith.constant 6144 : index
    %180 = vector.load %arg11[%c0_144, %c6144] : memref<4x8192xf32, #tpu.memory_space<vmem>>, vector<4x128xf32>
    %181 = arith.maximumf %179, %180 : vector<4x128xf32>
    %182 = tpu.concatenate %170, %181 in 0 : vector<4x128xf32>, vector<4x128xf32> -> vector<8x128xf32>
    %c40 = arith.constant 40 : index
    %c0_145 = arith.constant 0 : index
    %183 = vector.load %arg12[%c40, %c0_145] : memref<64x128xf32, #tpu.memory_space<vmem>>, vector<8x128xf32>
    tpu.vector_store %arg12[%c40, %c0_145], %182 {strides = array<i32>} : memref<64x128xf32, #tpu.memory_space<vmem>>, vector<8x128xf32>,
    %c0_146 = arith.constant 0 : index
    %c6016_147 = arith.constant 6016 : index
    %184 = vector.load %arg11[%c0_146, %c6016_147] : memref<4x8192xf32, #tpu.memory_space<vmem>>, vector<4x128xf32>
    %c0_148 = arith.constant 0 : index
    %c6144_149 = arith.constant 6144 : index
    %185 = vector.load %arg11[%c0_148, %c6144_149] : memref<4x8192xf32, #tpu.memory_space<vmem>>, vector<4x128xf32>
    %186 = arith.maximumf %184, %185 : vector<4x128xf32>
    %c0_150 = arith.constant 0 : index
    %c6272 = arith.constant 6272 : index
    %187 = vector.load %arg11[%c0_150, %c6272] : memref<4x8192xf32, #tpu.memory_space<vmem>>, vector<4x128xf32>
    %188 = arith.maximumf %186, %187 : vector<4x128xf32>
    %c0_151 = arith.constant 0 : index
    %c6400 = arith.constant 6400 : index
    %189 = vector.load %arg11[%c0_151, %c6400] : memref<4x8192xf32, #tpu.memory_space<vmem>>, vector<4x128xf32>
    %190 = arith.maximumf %188, %189 : vector<4x128xf32>
    %c0_152 = arith.constant 0 : index
    %c6528 = arith.constant 6528 : index
    %191 = vector.load %arg11[%c0_152, %c6528] : memref<4x8192xf32, #tpu.memory_space<vmem>>, vector<4x128xf32>
    %192 = arith.maximumf %190, %191 : vector<4x128xf32>
    %c0_153 = arith.constant 0 : index
    %c6656 = arith.constant 6656 : index
    %193 = vector.load %arg11[%c0_153, %c6656] : memref<4x8192xf32, #tpu.memory_space<vmem>>, vector<4x128xf32>
    %194 = arith.maximumf %192, %193 : vector<4x128xf32>
    %c0_154 = arith.constant 0 : index
    %c6528_155 = arith.constant 6528 : index
    %195 = vector.load %arg11[%c0_154, %c6528_155] : memref<4x8192xf32, #tpu.memory_space<vmem>>, vector<4x128xf32>
    %c0_156 = arith.constant 0 : index
    %c6656_157 = arith.constant 6656 : index
    %196 = vector.load %arg11[%c0_156, %c6656_157] : memref<4x8192xf32, #tpu.memory_space<vmem>>, vector<4x128xf32>
    %197 = arith.maximumf %195, %196 : vector<4x128xf32>
    %c0_158 = arith.constant 0 : index
    %c6784 = arith.constant 6784 : index
    %198 = vector.load %arg11[%c0_158, %c6784] : memref<4x8192xf32, #tpu.memory_space<vmem>>, vector<4x128xf32>
    %199 = arith.maximumf %197, %198 : vector<4x128xf32>
    %c0_159 = arith.constant 0 : index
    %c6912 = arith.constant 6912 : index
    %200 = vector.load %arg11[%c0_159, %c6912] : memref<4x8192xf32, #tpu.memory_space<vmem>>, vector<4x128xf32>
    %201 = arith.maximumf %199, %200 : vector<4x128xf32>
    %c0_160 = arith.constant 0 : index
    %c7040 = arith.constant 7040 : index
    %202 = vector.load %arg11[%c0_160, %c7040] : memref<4x8192xf32, #tpu.memory_space<vmem>>, vector<4x128xf32>
    %203 = arith.maximumf %201, %202 : vector<4x128xf32>
    %c0_161 = arith.constant 0 : index
    %c7168 = arith.constant 7168 : index
    %204 = vector.load %arg11[%c0_161, %c7168] : memref<4x8192xf32, #tpu.memory_space<vmem>>, vector<4x128xf32>
    %205 = arith.maximumf %203, %204 : vector<4x128xf32>
    %206 = tpu.concatenate %194, %205 in 0 : vector<4x128xf32>, vector<4x128xf32> -> vector<8x128xf32>
    %c48 = arith.constant 48 : index
    %c0_162 = arith.constant 0 : index
    %207 = vector.load %arg12[%c48, %c0_162] : memref<64x128xf32, #tpu.memory_space<vmem>>, vector<8x128xf32>
    tpu.vector_store %arg12[%c48, %c0_162], %206 {strides = array<i32>} : memref<64x128xf32, #tpu.memory_space<vmem>>, vector<8x128xf32>,
    %c0_163 = arith.constant 0 : index
    %c7040_164 = arith.constant 7040 : index
    %208 = vector.load %arg11[%c0_163, %c7040_164] : memref<4x8192xf32, #tpu.memory_space<vmem>>, vector<4x128xf32>
    %c0_165 = arith.constant 0 : index
    %c7168_166 = arith.constant 7168 : index
    %209 = vector.load %arg11[%c0_165, %c7168_166] : memref<4x8192xf32, #tpu.memory_space<vmem>>, vector<4x128xf32>
    %210 = arith.maximumf %208, %209 : vector<4x128xf32>
    %c0_167 = arith.constant 0 : index
    %c7296 = arith.constant 7296 : index
    %211 = vector.load %arg11[%c0_167, %c7296] : memref<4x8192xf32, #tpu.memory_space<vmem>>, vector<4x128xf32>
    %212 = arith.maximumf %210, %211 : vector<4x128xf32>
    %c0_168 = arith.constant 0 : index
    %c7424 = arith.constant 7424 : index
    %213 = vector.load %arg11[%c0_168, %c7424] : memref<4x8192xf32, #tpu.memory_space<vmem>>, vector<4x128xf32>
    %214 = arith.maximumf %212, %213 : vector<4x128xf32>
    %c0_169 = arith.constant 0 : index
    %c7552 = arith.constant 7552 : index
    %215 = vector.load %arg11[%c0_169, %c7552] : memref<4x8192xf32, #tpu.memory_space<vmem>>, vector<4x128xf32>
    %216 = arith.maximumf %214, %215 : vector<4x128xf32>
    %c0_170 = arith.constant 0 : index
    %c7680 = arith.constant 7680 : index
    %217 = vector.load %arg11[%c0_170, %c7680] : memref<4x8192xf32, #tpu.memory_space<vmem>>, vector<4x128xf32>
    %218 = arith.maximumf %216, %217 : vector<4x128xf32>
    %c0_171 = arith.constant 0 : index
    %c7552_172 = arith.constant 7552 : index
    %219 = vector.load %arg11[%c0_171, %c7552_172] : memref<4x8192xf32, #tpu.memory_space<vmem>>, vector<4x128xf32>
    %c0_173 = arith.constant 0 : index
    %c7680_174 = arith.constant 7680 : index
    %220 = vector.load %arg11[%c0_173, %c7680_174] : memref<4x8192xf32, #tpu.memory_space<vmem>>, vector<4x128xf32>
    %221 = arith.maximumf %219, %220 : vector<4x128xf32>
    %c0_175 = arith.constant 0 : index
    %c7808 = arith.constant 7808 : index
    %222 = vector.load %arg11[%c0_175, %c7808] : memref<4x8192xf32, #tpu.memory_space<vmem>>, vector<4x128xf32>
    %223 = arith.maximumf %221, %222 : vector<4x128xf32>
    %c0_176 = arith.constant 0 : index
    %c7936 = arith.constant 7936 : index
    %224 = vector.load %arg11[%c0_176, %c7936] : memref<4x8192xf32, #tpu.memory_space<vmem>>, vector<4x128xf32>
    %225 = arith.maximumf %223, %224 : vector<4x128xf32>
    %c0_177 = arith.constant 0 : index
    %c8064 = arith.constant 8064 : index
    %226 = vector.load %arg11[%c0_177, %c8064] : memref<4x8192xf32, #tpu.memory_space<vmem>>, vector<4x128xf32>
    %227 = arith.maximumf %225, %226 : vector<4x128xf32>
    %228 = tpu.concatenate %218, %227 in 0 : vector<4x128xf32>, vector<4x128xf32> -> vector<8x128xf32>
    %c56 = arith.constant 56 : index
    %c0_178 = arith.constant 0 : index
    %229 = vector.load %arg12[%c56, %c0_178] : memref<64x128xf32, #tpu.memory_space<vmem>>, vector<8x128xf32>
    tpu.vector_store %arg12[%c56, %c0_178], %228 {strides = array<i32>} : memref<64x128xf32, #tpu.memory_space<vmem>>, vector<8x128xf32>,
    %c0_179 = arith.constant 0 : index
    %c0_180 = arith.constant 0 : index
    %230 = vector.load %arg6[%c0_179, %c0_180] : memref<32x64xf32, #tpu.memory_space<vmem>>, vector<32x64xf32>
    %c0_181 = arith.constant 0 : index
    %c0_182 = arith.constant 0 : index
    %231 = vector.load %arg12[%c0_181, %c0_182] : memref<64x128xf32, #tpu.memory_space<vmem>>, vector<64x128xf32>
    %cst_183 = arith.constant dense<0.000000e+00> : vector<32x128xf32>
    %232 = tpu.matmul %230, %231, %cst_183 {dimension_numbers = #tpu.dot_dimension_numbers<[1], [0], [0], [1], [0, 0, 1, 1], [], []>} : vector<32x64xf32>, vector<64x128xf32>, vector<32x128xf32> -> vector<32x128xf32>
    %c0_184 = arith.constant 0 : index
    %c0_185 = arith.constant 0 : index
    %233 = vector.load %arg7[%c0_184, %c0_185] : memref<32x1xf32, #tpu.memory_space<vmem>>, vector<32x1xf32>
    %234 = vector.broadcast %233 : vector<32x1xf32> to vector<32x128xf32>
    %235 = arith.addf %232, %234 : vector<32x128xf32>
    %cst_186 = arith.constant 0.000000e+00 : f32
    %236 = vector.broadcast %cst_186 : f32 to vector<32x128xf32>
    %237 = arith.maximumf %235, %236 : vector<32x128xf32>
    %c0_187 = arith.constant 0 : index
    %c0_188 = arith.constant 0 : index
    %238 = vector.load %arg8[%c0_187, %c0_188] : memref<32x128xf32, #tpu.memory_space<vmem>>, vector<32x128xf32>
    tpu.vector_store %arg8[%c0_187, %c0_188], %237 {strides = array<i32>} : memref<32x128xf32, #tpu.memory_space<vmem>>, vector<32x128xf32>,
    return
  }
  func.func @transform_0(%arg0: i32) -> (i32, i32, i32) {
    %c0_i32 = arith.constant 0 : i32
    %c0_i32_0 = arith.constant 0 : i32
    %c0_i32_1 = arith.constant 0 : i32
    return %arg0, %c0_i32, %c0_i32_0 : i32, i32, i32
  }
  func.func @transform_1(%arg0: i32) -> (i32, i32) {
    %c0_i32 = arith.constant 0 : i32
    %c0_i32_0 = arith.constant 0 : i32
    %c0_i32_1 = arith.constant 0 : i32
    return %c0_i32, %c0_i32_0 : i32, i32
  }
  func.func @transform_2(%arg0: i32) -> (i32, i32) {
    %c0_i32 = arith.constant 0 : i32
    %c0_i32_0 = arith.constant 0 : i32
    %c0_i32_1 = arith.constant 0 : i32
    return %c0_i32, %c0_i32_0 : i32, i32
  }
  func.func @transform_3(%arg0: i32) -> (i32, i32) {
    %c0_i32 = arith.constant 0 : i32
    %c0_i32_0 = arith.constant 0 : i32
    %c0_i32_1 = arith.constant 0 : i32
    return %c0_i32, %c0_i32_0 : i32, i32
  }
  func.func @transform_4(%arg0: i32) -> (i32, i32) {
    %c0_i32 = arith.constant 0 : i32
    %c0_i32_0 = arith.constant 0 : i32
    %c0_i32_1 = arith.constant 0 : i32
    return %c0_i32, %c0_i32_0 : i32, i32
  }
  func.func @transform_5(%arg0: i32) -> (i32, i32) {
    %c0_i32 = arith.constant 0 : i32
    %c0_i32_0 = arith.constant 0 : i32
    %c0_i32_1 = arith.constant 0 : i32
    return %c0_i32, %c0_i32_0 : i32, i32
  }
  func.func @transform_6(%arg0: i32) -> (i32, i32) {
    %c0_i32 = arith.constant 0 : i32
    %c0_i32_0 = arith.constant 0 : i32
    %c0_i32_1 = arith.constant 0 : i32
    return %c0_i32, %c0_i32_0 : i32, i32
  }
  func.func @transform_7(%arg0: i32) -> (i32, i32) {
    %c0_i32 = arith.constant 0 : i32
    %c0_i32_0 = arith.constant 0 : i32
    return %c0_i32, %arg0 : i32, i32
  }
}

</mosaic_0001>

<bundles_post_ra>
// kernel: spectrum_cnn2_forward.1
= control target key start
LH: loop header
LB: loop body
LE: loop exit
PB: predicated region body
PF: predicated region fallthrough
CT: control target
= control target key end

     0   :  { %vm109_vm0 = vcmask 1044480   ;;  %v9906_v2 = vmov 0.0   ;;  %vm99_vm1 = vcmask 39936   ;;  %v9907_v16 = vmov 0   ;;  %s11385_s0 = inlined_call_operand.vmem [shape: f32[1,5,8704], index: 0, kind: input, shape index: {}]   ;;  %s11386_s1 = inlined_call_operand.vmem [shape: f32[20,5], index: 1, kind: input, shape index: {}]   ;;  %s11387_s2 = inlined_call_operand.vmem [shape: f32[4,1], index: 2, kind: input, shape index: {}]   ;;  %s11388_s4 = inlined_call_operand.vmem [shape: f32[4,1], index: 4, kind: input, shape index: {}]   ;;  %s11389_s6 = inlined_call_operand.vmem [shape: f32[32,1], index: 6, kind: input, shape index: {}]   ;;  %s11390_s3 = inlined_call_operand.vmem [shape: f32[20,4], index: 3, kind: input, shape index: {}]   ;;  %s11391_s5 = inlined_call_operand.vmem [shape: f32[32,64], index: 5, kind: input, shape index: {}]   ;;  %s11392_s7 = inlined_call_operand.vmem [shape: f32[32,128], index: 7, kind: output, shape index: {}]  }
   0x1   :  { %v32_v0 = vld [vmem:[%s11385_s0 + $0x8] sm:$0x1f]  ;;  %v31_v1 = vld [vmem:[%s11385_s0] sm:$0x1f]  ;;  %384 = vmatprep.mubr.f32.mxu1 %v9906_v2  ;;  %378 = vmatprep.mubr.f32.mxu0 %v9906_v2  ;;  %v34_v7 = vld [vmem:[%s11385_s0 + $0x18] sm:$0x1f] }
   0x2   :  { %v9958_v3 = vld [vmem:[%s11386_s1 + $0x8] sm:$0xff]  ;;  %9894 = vmatprep.subr.msk.mxu1 %vm109_vm0, %v32_v0  ;;  %9468 = vmatprep.subr.msk.mxu0 %vm109_vm0, %v32_v0  ;;  %v9966_v4 = vld [vmem:[%s11386_s1] sm:$0xff]  ;;  %v9990_v9 = vld [vmem:[%s11386_s1 + $0x10] sm:$0xf]  ;;  %vm4709_vm2 = vcmask 1043456   ;;  %vm4699_vm3 = vcmask 31744  }
   0x3   :  { %v36_v5 = vld [vmem:[%s11385_s0 + $0x28] sm:$0x1f]  ;;  %9895 = vmatpush1.msk.msra.mxu1 %vm109_vm0, %v31_v1  ;;  %9469 = vmatpush1.msk.msra.mxu0 %vm109_vm0, %v31_v1  ;;  %v35_v6 = vld [vmem:[%s11385_s0 + $0x20] sm:$0x1f]  ;;  %v33_v10 = vld [vmem:[%s11385_s0 + $0x10] sm:$0x1f] }
   0x4   :  { %9471 = vmatmul.mubr.msk.f32.vlgmr.msra.gmra.mrb[0].mxu1 %vm99_vm1, %v9958_v3  ;;  %9470 = vmatmul.mubr.msk.f32.vlgmr.msra.gmra.mrb[0].mxu0 %vm99_vm1, %v9966_v4  ;;  %v40_v8 = vld [vmem:[%s11385_s0 + $0x48] sm:$0x1f]  ;;  %v39_v11 = vld [vmem:[%s11385_s0 + $0x40] sm:$0x1f]  ;;  %v38_v12 = vld [vmem:[%s11385_s0 + $0x38] sm:$0x1f] }
   0x5   :  { %390 = vmatprep.mubr.f32.mxu1 %v9906_v2  ;;  %9478 = vmatprep.subr.msk.mxu0 %vm109_vm0, %v36_v5  ;;  %v44_v13 = vld [vmem:[%s11385_s0 + $0x68] sm:$0x1f]  ;;  %v37_v14 = vld [vmem:[%s11385_s0 + $0x30] sm:$0x1f]  ;;  %v42_v15 = vld [vmem:[%s11385_s0 + $0x58] sm:$0x1f] }
   0x6   :  { %9479 = vmatpush1.msk.msra.mxu0 %vm109_vm0, %v35_v6  ;;  %544 = vmatprep.mubr.f32.mxu0 %v9906_v2  ;;  %v4300_v17 = vld [vmem:[%s11387_s2] sm:$0xf]  ;;  %v48_v20 = vld [vmem:[%s11385_s0 + $0x88] sm:$0x1f]  ;;  %v9336_v21 = vld [vmem:[%s11389_s6 + $0x10] sm:$0xff]  ;;  %vm9358_vm4 = vcmask 523264  }
   0x7   :  { %9473 = vmatprep.subr.msk.mxu1 %vm109_vm0, %v34_v7  ;;  %9488 = vmatprep.subr.msk.mxu0 %vm109_vm0, %v40_v8  ;;  %v8832_v18 = vld [vmem:[%s11388_s4] sm:$0xf]  ;;  %v41_v22 = vld [vmem:[%s11385_s0 + $0x50] sm:$0x1f]  ;;  %v46_v23 = vld [vmem:[%s11385_s0 + $0x78] sm:$0x1f] }
   0x8   :  { %9472 = vmatmul.mubr.msk.f32.gmra.mrb[2].mxu1 %vm99_vm1, %v9990_v9  ;;  %9480 = vmatmul.mubr.msk.f32.vlgmr.msra.gmra.mrb[2].mxu0 %vm99_vm1, %v9966_v4  ;;  %v43_v19 = vld [vmem:[%s11385_s0 + $0x60] sm:$0x1f]  ;;  %v52_v25 = vld [vmem:[%s11385_s0 + $0xa8] sm:$0x1f]  ;;  %v45_v26 = vld [vmem:[%s11385_s0 + $0x70] sm:$0x1f] }
   0x9   :  { %9474 = vmatpush1.msk.msra.mxu1 %vm109_vm0, %v33_v10  ;;  %461 = vmatprep.mubr.f32.mxu1 %v9906_v2  ;;  %v47_v24 = vld [vmem:[%s11385_s0 + $0x80] sm:$0x1f]  ;;  %v50_v27 = vld [vmem:[%s11385_s0 + $0x98] sm:$0x1f]  ;;  %v56_v29 = vld [vmem:[%s11385_s0 + $0xc8] sm:$0x1f] }
   0xa   :  { %550 = vmatprep.mubr.f32.mxu0 %v9906_v2  ;;  %9489 = vmatpush1.msk.msra.mxu0 %vm109_vm0, %v39_v11  ;;  %v51_v28 = vld [vmem:[%s11385_s0 + $0xa0] sm:$0x1f]  ;;  %v49_v30 = vld [vmem:[%s11385_s0 + $0x90] sm:$0x1f]  ;;  %v54_v31 = vld [vmem:[%s11385_s0 + $0xb8] sm:$0x1f] }
   0xb   :  { %9483 = vmatprep.subr.msk.mxu1 %vm109_vm0, %v38_v12  ;;  %9498 = vmatprep.subr.msk.mxu0 %vm109_vm0, %v44_v13  ;;  %v55_v32 = vld [vmem:[%s11385_s0 + $0xc0] sm:$0x1f]  ;;  %v60_v33 = vld [vmem:[%s11385_s0 + $0xe8] sm:$0x1f]  ;;  %v53_v34 = vld [vmem:[%s11385_s0 + $0xb0] sm:$0x1f]  ;;  %v10495_v13 = vcombine.high %v9906_v2, %v9906_v2 }
   0xc   :  { %9475 = vmatmul.mubr.msk.f32.vlgmr.msra.gmra.mrb[4].mxu1 %vm99_vm1, %v9966_v4  ;;  %9481 = vmatmul.mubr.msk.f32.gmra.mrb[4].mxu0 %vm99_vm1, %v9958_v3  ;;  %v58_v35 = vld [vmem:[%s11385_s0 + $0xd8] sm:$0x1f]  ;;  %v59_v36 = vld [vmem:[%s11385_s0 + $0xe0] sm:$0x1f]  ;;  %v64_v37 = vld [vmem:[%s11385_s0 + $0x108] sm:$0x1f] }
   0xd   :  { %467 = vmatprep.mubr.f32.mxu1 %v9906_v2  ;;  %556 = vmatprep.mubr.f32.mxu0 %v9906_v2  ;;  %v57_v38 = vld [vmem:[%s11385_s0 + $0xd0] sm:$0x1f]  ;;  %v62_v39 = vld [vmem:[%s11385_s0 + $0xf8] sm:$0x1f]  ;;  %v63_v40 = vld [vmem:[%s11385_s0 + $0x100] sm:$0x1f] }
   0xe   :  { %9484 = vmatpush1.msk.msra.mxu1 %vm109_vm0, %v37_v14  ;;  %9898 = vset.pattern.permute.xlu0 %v9907_v16  ;;  %v68_v41 = vld [vmem:[%s11385_s0 + $0x128] sm:$0x1f]  ;;  %v61_v42 = vld [vmem:[%s11385_s0 + $0xf0] sm:$0x1f]  ;;  %v66_v43 = vld [vmem:[%s11385_s0 + $0x118] sm:$0x1f] }
   0xf   :  { %9493 = vmatprep.subr.msk.mxu1 %vm109_vm0, %v42_v15  ;;  %4303 = vperm.xlu0 %9898, %v4300_v17   ;;  %v67_v44 = vld [vmem:[%s11385_s0 + $0x120] sm:$0x1f]  ;;  %v72_v45 = vld [vmem:[%s11385_s0 + $0x148] sm:$0x1f]  ;;  %v65_v46 = vld [vmem:[%s11385_s0 + $0x110] sm:$0x1f] }
  0x10   :  { %9476 = vmatmul.mubr.msk.f32.gmra.mrb[6].mxu1 %vm99_vm1, %v9958_v3  ;;  %9482 = vmatmul.mubr.msk.f32.gmra.mrb[6].mxu0 %vm99_vm1, %v9990_v9  ;;  %v70_v47 = vld [vmem:[%s11385_s0 + $0x138] sm:$0x1f]  ;;  %v71_v48 = vld [vmem:[%s11385_s0 + $0x140] sm:$0x1f]  ;;  %v76_v49 = vld [vmem:[%s11385_s0 + $0x168] sm:$0x1f] }
  0x11   :  { %473 = vmatprep.mubr.f32.mxu1 %v9906_v2  ;;  %710 = vmatprep.mubr.f32.mxu0 %v9906_v2  ;;  %v69_v50 = vld [vmem:[%s11385_s0 + $0x130] sm:$0x1f]  ;;  %v74_v51 = vld [vmem:[%s11385_s0 + $0x158] sm:$0x1f]  ;;  %v75_v52 = vld [vmem:[%s11385_s0 + $0x160] sm:$0x1f] }
  0x12   :  { %9899 = vset.pattern.permute.xlu1 %v9907_v16  ;;  %v80_v53 = vld [vmem:[%s11385_s0 + $0x188] sm:$0x1f]  ;;  %v73_v54 = vld [vmem:[%s11385_s0 + $0x150] sm:$0x1f]  ;;  %v78_v55 = vld [vmem:[%s11385_s0 + $0x178] sm:$0x1f] }
  0x13   :  { %8835 = vperm.xlu0 %9898, %v8832_v18   ;;  %v79_v56 = vld [vmem:[%s11385_s0 + $0x180] sm:$0x1f]  ;;  %v84_v57 = vld [vmem:[%s11385_s0 + $0x1a8] sm:$0x1f]  ;;  %v77_v58 = vld [vmem:[%s11385_s0 + $0x170] sm:$0x1f] }
  0x14   :  { %9477 = vmatmul.mubr.msk.f32.gmra.mrb[8].mxu1 %vm99_vm1, %v9990_v9  ;;  %9490 = vmatmul.mubr.msk.f32.vlgmr.msra.gmra.mrb[8].mxu0 %vm99_vm1, %v9966_v4  ;;  %v82_v59 = vld [vmem:[%s11385_s0 + $0x198] sm:$0x1f]  ;;  %v83_v60 = vld [vmem:[%s11385_s0 + $0x1a0] sm:$0x1f]  ;;  %v88_v61 = vld [vmem:[%s11385_s0 + $0x1c8] sm:$0x1f] }
  0x15   :  { %627 = vmatprep.mubr.f32.mxu1 %v9906_v2  ;;  %716 = vmatprep.mubr.f32.mxu0 %v9906_v2  ;;  %v81_v62 = vld [vmem:[%s11385_s0 + $0x190] sm:$0x1f]  ;;  %v86_v63 = vld [vmem:[%s11385_s0 + $0x1b8] sm:$0x1f]  ;;  %v87_v0 = vld [vmem:[%s11385_s0 + $0x1c0] sm:$0x1f] }
  0x16   :  { %9499 = vmatpush1.msk.msra.mxu0 %vm109_vm0, %v43_v19  ;;  %v92_v1 = vld [vmem:[%s11385_s0 + $0x1e8] sm:$0x1f]  ;;  %v85_v5 = vld [vmem:[%s11385_s0 + $0x1b0] sm:$0x1f]  ;;  %v90_v6 = vld [vmem:[%s11385_s0 + $0x1d8] sm:$0x1f] }
  0x17   :  { %9508 = vmatprep.subr.msk.mxu0 %vm109_vm0, %v48_v20  ;;  %9350 = vperm.xlu0 %9898, %v9336_v21   ;;  %v91_v7 = vld [vmem:[%s11385_s0 + $0x1e0] sm:$0x1f]  ;;  %v96_v8 = vld [vmem:[%s11385_s0 + $0x208] sm:$0x1f]  ;;  %v89_v10 = vld [vmem:[%s11385_s0 + $0x1d0] sm:$0x1f] }
  0x18   :  { %9485 = vmatmul.mubr.msk.f32.vlgmr.msra.gmra.mrb[10].mxu1 %vm99_vm1, %v9966_v4  ;;  %9491 = vmatmul.mubr.msk.f32.gmra.mrb[10].mxu0 %vm99_vm1, %v9958_v3  ;;  %v94_v11 = vld [vmem:[%s11385_s0 + $0x1f8] sm:$0x1f]  ;;  %v95_v12 = vld [vmem:[%s11385_s0 + $0x200] sm:$0x1f]  ;;  %v93_v14 = vld [vmem:[%s11385_s0 + $0x1f0] sm:$0x1f] }
  0x19   :  { %633 = vmatprep.mubr.f32.mxu1 %v9906_v2  ;;  %722 = vmatprep.mubr.f32.mxu0 %v9906_v2  ;;  %v98_v15 = vld [vmem:[%s11385_s0 + $0x218] sm:$0x1f]  ;;  %v97_v16 = vld [vmem:[%s11385_s0 + $0x210] sm:$0x1f]  ;;  %v10553_v17 = vld [vmem:[%s11390_s3] sm:$0xff] }
  0x1a   :  { %9494 = vmatpush1.msk.msra.mxu1 %vm109_vm0, %v41_v22  ;;  %v10564_v18 = vld [vmem:[%s11390_s3 + $0x8] sm:$0xff]  ;;  %v10575_v19 = vld [vmem:[%s11390_s3 + $0x10] sm:$0xf] }
  0x1b   :  { %9503 = vmatprep.subr.msk.mxu1 %vm109_vm0, %v46_v23 }
  0x1c   :  { %9486 = vmatmul.mubr.msk.f32.gmra.mrb[12].mxu1 %vm99_vm1, %v9958_v3  ;;  %9492 = vmatmul.mubr.msk.f32.gmra.mrb[12].mxu0 %vm99_vm1, %v9990_v9 }
  0x1d   :  { %639 = vmatprep.mubr.f32.mxu1 %v9906_v2  ;;  %876 = vmatprep.mubr.f32.mxu0 %v9906_v2 }
  0x20   :  { %9487 = vmatmul.mubr.msk.f32.gmra.mrb[14].mxu1 %vm99_vm1, %v9990_v9  ;;  %9500 = vmatmul.mubr.msk.f32.vlgmr.msra.gmra.mrb[14].mxu0 %vm99_vm1, %v9966_v4 }
  0x21   :  { %793 = vmatprep.mubr.f32.mxu1 %v9906_v2  ;;  %882 = vmatprep.mubr.f32.mxu0 %v9906_v2 }
  0x22   :  { %9509 = vmatpush1.msk.msra.mxu0 %vm109_vm0, %v47_v24 }
  0x23   :  { %9518 = vmatprep.subr.msk.mxu0 %vm109_vm0, %v52_v25 }
  0x24   :  { %9495 = vmatmul.mubr.msk.f32.vlgmr.msra.gmra.mrb[16].mxu1 %vm99_vm1, %v9966_v4  ;;  %9501 = vmatmul.mubr.msk.f32.gmra.mrb[16].mxu0 %vm99_vm1, %v9958_v3 }
  0x25   :  { %799 = vmatprep.mubr.f32.mxu1 %v9906_v2  ;;  %888 = vmatprep.mubr.f32.mxu0 %v9906_v2 }
  0x26   :  { %9504 = vmatpush1.msk.msra.mxu1 %vm109_vm0, %v45_v26 }
  0x27   :  { %9513 = vmatprep.subr.msk.mxu1 %vm109_vm0, %v50_v27 }
  0x28   :  { %9496 = vmatmul.mubr.msk.f32.gmra.mrb[18].mxu1 %vm99_vm1, %v9958_v3  ;;  %9502 = vmatmul.mubr.msk.f32.gmra.mrb[18].mxu0 %vm99_vm1, %v9990_v9 }
  0x29   :  { %805 = vmatprep.mubr.f32.mxu1 %v9906_v2  ;;  %1042 = vmatprep.mubr.f32.mxu0 %v9906_v2 }
  0x2c   :  { %9497 = vmatmul.mubr.msk.f32.gmra.mrb[20].mxu1 %vm99_vm1, %v9990_v9  ;;  %9510 = vmatmul.mubr.msk.f32.vlgmr.msra.gmra.mrb[20].mxu0 %vm99_vm1, %v9966_v4 }
  0x2d   :  { %959 = vmatprep.mubr.f32.mxu1 %v9906_v2  ;;  %1048 = vmatprep.mubr.f32.mxu0 %v9906_v2 }
  0x2e   :  { %9519 = vmatpush1.msk.msra.mxu0 %vm109_vm0, %v51_v28 }
  0x2f   :  { %9528 = vmatprep.subr.msk.mxu0 %vm109_vm0, %v56_v29 }
  0x30   :  { %9505 = vmatmul.mubr.msk.f32.vlgmr.msra.gmra.mrb[22].mxu1 %vm99_vm1, %v9966_v4  ;;  %9511 = vmatmul.mubr.msk.f32.gmra.mrb[22].mxu0 %vm99_vm1, %v9958_v3 }
  0x31   :  { %965 = vmatprep.mubr.f32.mxu1 %v9906_v2  ;;  %1054 = vmatprep.mubr.f32.mxu0 %v9906_v2 }
  0x32   :  { %9514 = vmatpush1.msk.msra.mxu1 %vm109_vm0, %v49_v30 }
  0x33   :  { %9523 = vmatprep.subr.msk.mxu1 %vm109_vm0, %v54_v31 }
  0x34   :  { %9506 = vmatmul.mubr.msk.f32.gmra.mrb[24].mxu1 %vm99_vm1, %v9958_v3  ;;  %9512 = vmatmul.mubr.msk.f32.gmra.mrb[24].mxu0 %vm99_vm1, %v9990_v9 }
  0x35   :  { %971 = vmatprep.mubr.f32.mxu1 %v9906_v2  ;;  %1208 = vmatprep.mubr.f32.mxu0 %v9906_v2 }
  0x38   :  { %9507 = vmatmul.mubr.msk.f32.gmra.mrb[26].mxu1 %vm99_vm1, %v9990_v9  ;;  %9520 = vmatmul.mubr.msk.f32.vlgmr.msra.gmra.mrb[26].mxu0 %vm99_vm1, %v9966_v4 }
  0x39   :  { %1125 = vmatprep.mubr.f32.mxu1 %v9906_v2  ;;  %1214 = vmatprep.mubr.f32.mxu0 %v9906_v2 }
  0x3a   :  { %9529 = vmatpush1.msk.msra.mxu0 %vm109_vm0, %v55_v32 }
  0x3b   :  { %9538 = vmatprep.subr.msk.mxu0 %vm109_vm0, %v60_v33 }
  0x3c   :  { %9515 = vmatmul.mubr.msk.f32.vlgmr.msra.gmra.mrb[28].mxu1 %vm99_vm1, %v9966_v4  ;;  %9521 = vmatmul.mubr.msk.f32.gmra.mrb[28].mxu0 %vm99_vm1, %v9958_v3 }
  0x3d   :  { %1131 = vmatprep.mubr.f32.mxu1 %v9906_v2  ;;  %1220 = vmatprep.mubr.f32.mxu0 %v9906_v2 }
  0x3e   :  { %9524 = vmatpush1.msk.msra.mxu1 %vm109_vm0, %v53_v34 }
  0x3f   :  { %9533 = vmatprep.subr.msk.mxu1 %vm109_vm0, %v58_v35 }
  0x40   :  { %9516 = vmatmul.mubr.msk.f32.gmra.mrb[30].mxu1 %vm99_vm1, %v9958_v3  ;;  %9522 = vmatmul.mubr.msk.f32.gmra.mrb[30].mxu0 %vm99_vm1, %v9990_v9 }
  0x41   :  { %1137 = vmatprep.mubr.f32.mxu1 %v9906_v2  ;;  %1374 = vmatprep.mubr.f32.mxu0 %v9906_v2 }
  0x44   :  { %9517 = vmatmul.mubr.msk.f32.gmra.mrb[32].mxu1 %vm99_vm1, %v9990_v9  ;;  %9530 = vmatmul.mubr.msk.f32.vlgmr.msra.gmra.mrb[32].mxu0 %vm99_vm1, %v9966_v4 }
  0x45   :  { %1291 = vmatprep.mubr.f32.mxu1 %v9906_v2  ;;  %1380 = vmatprep.mubr.f32.mxu0 %v9906_v2 }
  0x46   :  { %9539 = vmatpush1.msk.msra.mxu0 %vm109_vm0, %v59_v36 }
  0x47   :  { %9548 = vmatprep.subr.msk.mxu0 %vm109_vm0, %v64_v37 }
  0x48   :  { %9525 = vmatmul.mubr.msk.f32.vlgmr.msra.gmra.mrb[34].mxu1 %vm99_vm1, %v9966_v4  ;;  %9531 = vmatmul.mubr.msk.f32.gmra.mrb[34].mxu0 %vm99_vm1, %v9958_v3 }
  0x49   :  { %1297 = vmatprep.mubr.f32.mxu1 %v9906_v2  ;;  %1386 = vmatprep.mubr.f32.mxu0 %v9906_v2 }
  0x4a   :  { %9534 = vmatpush1.msk.msra.mxu1 %vm109_vm0, %v57_v38 }
  0x4b   :  { %9543 = vmatprep.subr.msk.mxu1 %vm109_vm0, %v62_v39 }
  0x4c   :  { %9526 = vmatmul.mubr.msk.f32.gmra.mrb[36].mxu1 %vm99_vm1, %v9958_v3  ;;  %9532 = vmatmul.mubr.msk.f32.gmra.mrb[36].mxu0 %vm99_vm1, %v9990_v9 }
  0x4d   :  { %1303 = vmatprep.mubr.f32.mxu1 %v9906_v2  ;;  %1540 = vmatprep.mubr.f32.mxu0 %v9906_v2 }
  0x50   :  { %9527 = vmatmul.mubr.msk.f32.gmra.mrb[38].mxu1 %vm99_vm1, %v9990_v9  ;;  %9540 = vmatmul.mubr.msk.f32.vlgmr.msra.gmra.mrb[38].mxu0 %vm99_vm1, %v9966_v4 }
  0x51   :  { %1457 = vmatprep.mubr.f32.mxu1 %v9906_v2  ;;  %1546 = vmatprep.mubr.f32.mxu0 %v9906_v2 }
  0x52   :  { %9549 = vmatpush1.msk.msra.mxu0 %vm109_vm0, %v63_v40 }
  0x53   :  { %9558 = vmatprep.subr.msk.mxu0 %vm109_vm0, %v68_v41 }
  0x54   :  { %9535 = vmatmul.mubr.msk.f32.vlgmr.msra.gmra.mrb[40].mxu1 %vm99_vm1, %v9966_v4  ;;  %9541 = vmatmul.mubr.msk.f32.gmra.mrb[40].mxu0 %vm99_vm1, %v9958_v3 }
  0x55   :  { %1463 = vmatprep.mubr.f32.mxu1 %v9906_v2  ;;  %1552 = vmatprep.mubr.f32.mxu0 %v9906_v2 }
  0x56   :  { %9544 = vmatpush1.msk.msra.mxu1 %vm109_vm0, %v61_v42 }
  0x57   :  { %9553 = vmatprep.subr.msk.mxu1 %vm109_vm0, %v66_v43 }
  0x58   :  { %9536 = vmatmul.mubr.msk.f32.gmra.mrb[42].mxu1 %vm99_vm1, %v9958_v3  ;;  %9542 = vmatmul.mubr.msk.f32.gmra.mrb[42].mxu0 %vm99_vm1, %v9990_v9 }
  0x59   :  { %1469 = vmatprep.mubr.f32.mxu1 %v9906_v2  ;;  %1706 = vmatprep.mubr.f32.mxu0 %v9906_v2 }
  0x5c   :  { %9537 = vmatmul.mubr.msk.f32.gmra.mrb[44].mxu1 %vm99_vm1, %v9990_v9  ;;  %9550 = vmatmul.mubr.msk.f32.vlgmr.msra.gmra.mrb[44].mxu0 %vm99_vm1, %v9966_v4 }
  0x5d   :  { %1623 = vmatprep.mubr.f32.mxu1 %v9906_v2  ;;  %1712 = vmatprep.mubr.f32.mxu0 %v9906_v2 }
  0x5e   :  { %9559 = vmatpush1.msk.msra.mxu0 %vm109_vm0, %v67_v44 }
  0x5f   :  { %9568 = vmatprep.subr.msk.mxu0 %vm109_vm0, %v72_v45 }
  0x60   :  { %9545 = vmatmul.mubr.msk.f32.vlgmr.msra.gmra.mrb[46].mxu1 %vm99_vm1, %v9966_v4  ;;  %9551 = vmatmul.mubr.msk.f32.gmra.mrb[46].mxu0 %vm99_vm1, %v9958_v3 }
  0x61   :  { %1629 = vmatprep.mubr.f32.mxu1 %v9906_v2  ;;  %1718 = vmatprep.mubr.f32.mxu0 %v9906_v2 }
  0x62   :  { %9554 = vmatpush1.msk.msra.mxu1 %vm109_vm0, %v65_v46 }
  0x63   :  { %9563 = vmatprep.subr.msk.mxu1 %vm109_vm0, %v70_v47 }
  0x64   :  { %9546 = vmatmul.mubr.msk.f32.gmra.mrb[48].mxu1 %vm99_vm1, %v9958_v3  ;;  %9552 = vmatmul.mubr.msk.f32.gmra.mrb[48].mxu0 %vm99_vm1, %v9990_v9 }
  0x65   :  { %1635 = vmatprep.mubr.f32.mxu1 %v9906_v2  ;;  %1872 = vmatprep.mubr.f32.mxu0 %v9906_v2 }
  0x68   :  { %9547 = vmatmul.mubr.msk.f32.gmra.mrb[50].mxu1 %vm99_vm1, %v9990_v9  ;;  %9560 = vmatmul.mubr.msk.f32.vlgmr.msra.gmra.mrb[50].mxu0 %vm99_vm1, %v9966_v4 }
  0x69   :  { %1789 = vmatprep.mubr.f32.mxu1 %v9906_v2  ;;  %1878 = vmatprep.mubr.f32.mxu0 %v9906_v2 }
  0x6a   :  { %9569 = vmatpush1.msk.msra.mxu0 %vm109_vm0, %v71_v48 }
  0x6b   :  { %9578 = vmatprep.subr.msk.mxu0 %vm109_vm0, %v76_v49 }
  0x6c   :  { %9555 = vmatmul.mubr.msk.f32.vlgmr.msra.gmra.mrb[52].mxu1 %vm99_vm1, %v9966_v4  ;;  %9561 = vmatmul.mubr.msk.f32.gmra.mrb[52].mxu0 %vm99_vm1, %v9958_v3 }
  0x6d   :  { %1795 = vmatprep.mubr.f32.mxu1 %v9906_v2  ;;  %1884 = vmatprep.mubr.f32.mxu0 %v9906_v2 }
  0x6e   :  { %9564 = vmatpush1.msk.msra.mxu1 %vm109_vm0, %v69_v50 }
  0x6f   :  { %9573 = vmatprep.subr.msk.mxu1 %vm109_vm0, %v74_v51 }
  0x70   :  { %9556 = vmatmul.mubr.msk.f32.gmra.mrb[54].mxu1 %vm99_vm1, %v9958_v3  ;;  %9562 = vmatmul.mubr.msk.f32.gmra.mrb[54].mxu0 %vm99_vm1, %v9990_v9 }
  0x71   :  { %1801 = vmatprep.mubr.f32.mxu1 %v9906_v2  ;;  %2038 = vmatprep.mubr.f32.mxu0 %v9906_v2 }
  0x74   :  { %9557 = vmatmul.mubr.msk.f32.gmra.mrb[56].mxu1 %vm99_vm1, %v9990_v9  ;;  %9570 = vmatmul.mubr.msk.f32.vlgmr.msra.gmra.mrb[56].mxu0 %vm99_vm1, %v9966_v4 }
  0x75   :  { %1955 = vmatprep.mubr.f32.mxu1 %v9906_v2  ;;  %2044 = vmatprep.mubr.f32.mxu0 %v9906_v2 }
  0x76   :  { %9579 = vmatpush1.msk.msra.mxu0 %vm109_vm0, %v75_v52 }
  0x77   :  { %9588 = vmatprep.subr.msk.mxu0 %vm109_vm0, %v80_v53 }
  0x78   :  { %9565 = vmatmul.mubr.msk.f32.vlgmr.msra.gmra.mrb[58].mxu1 %vm99_vm1, %v9966_v4  ;;  %9571 = vmatmul.mubr.msk.f32.gmra.mrb[58].mxu0 %vm99_vm1, %v9958_v3 }
  0x79   :  { %1961 = vmatprep.mubr.f32.mxu1 %v9906_v2  ;;  %2050 = vmatprep.mubr.f32.mxu0 %v9906_v2 }
  0x7a   :  { %9574 = vmatpush1.msk.msra.mxu1 %vm109_vm0, %v73_v54 }
  0x7b   :  { %9583 = vmatprep.subr.msk.mxu1 %vm109_vm0, %v78_v55 }
  0x7c   :  { %9566 = vmatmul.mubr.msk.f32.gmra.mrb[60].mxu1 %vm99_vm1, %v9958_v3  ;;  %9572 = vmatmul.mubr.msk.f32.gmra.mrb[60].mxu0 %vm99_vm1, %v9990_v9 }
  0x7d   :  { %1967 = vmatprep.mubr.f32.mxu1 %v9906_v2  ;;  %2204 = vmatprep.mubr.f32.mxu0 %v9906_v2 }
  0x80   :  { %9567 = vmatmul.mubr.msk.f32.gmra.mrb[62].mxu1 %vm99_vm1, %v9990_v9  ;;  %9580 = vmatmul.mubr.msk.f32.vlgmr.msra.gmra.mrb[62].mxu0 %vm99_vm1, %v9966_v4 }
  0x81   :  { %2121 = vmatprep.mubr.f32.mxu1 %v9906_v2  ;;  %2210 = vmatprep.mubr.f32.mxu0 %v9906_v2 }
  0x82   :  { %9589 = vmatpush1.msk.msra.mxu0 %vm109_vm0, %v79_v56 }
  0x83   :  { %9598 = vmatprep.subr.msk.mxu0 %vm109_vm0, %v84_v57 }
  0x84   :  { %9575 = vmatmul.mubr.msk.f32.vlgmr.msra.gmra.mrb[64].mxu1 %vm99_vm1, %v9966_v4  ;;  %9581 = vmatmul.mubr.msk.f32.gmra.mrb[64].mxu0 %vm99_vm1, %v9958_v3 }
  0x85   :  { %2127 = vmatprep.mubr.f32.mxu1 %v9906_v2  ;;  %2216 = vmatprep.mubr.f32.mxu0 %v9906_v2 }
  0x86   :  { %9584 = vmatpush1.msk.msra.mxu1 %vm109_vm0, %v77_v58 }
  0x87   :  { %9593 = vmatprep.subr.msk.mxu1 %vm109_vm0, %v82_v59 }
  0x88   :  { %9576 = vmatmul.mubr.msk.f32.gmra.mrb[66].mxu1 %vm99_vm1, %v9958_v3  ;;  %9582 = vmatmul.mubr.msk.f32.gmra.mrb[66].mxu0 %vm99_vm1, %v9990_v9 }
  0x89   :  { %2133 = vmatprep.mubr.f32.mxu1 %v9906_v2  ;;  %2370 = vmatprep.mubr.f32.mxu0 %v9906_v2 }
  0x8c   :  { %9577 = vmatmul.mubr.msk.f32.gmra.mrb[68].mxu1 %vm99_vm1, %v9990_v9  ;;  %9590 = vmatmul.mubr.msk.f32.vlgmr.msra.gmra.mrb[68].mxu0 %vm99_vm1, %v9966_v4 }
  0x8d   :  { %2287 = vmatprep.mubr.f32.mxu1 %v9906_v2  ;;  %2376 = vmatprep.mubr.f32.mxu0 %v9906_v2 }
  0x8e   :  { %9599 = vmatpush1.msk.msra.mxu0 %vm109_vm0, %v83_v60 }
  0x8f   :  { %9608 = vmatprep.subr.msk.mxu0 %vm109_vm0, %v88_v61 }
  0x90   :  { %9585 = vmatmul.mubr.msk.f32.vlgmr.msra.gmra.mrb[70].mxu1 %vm99_vm1, %v9966_v4  ;;  %9591 = vmatmul.mubr.msk.f32.gmra.mrb[70].mxu0 %vm99_vm1, %v9958_v3 }
  0x91   :  { %2293 = vmatprep.mubr.f32.mxu1 %v9906_v2  ;;  %2382 = vmatprep.mubr.f32.mxu0 %v9906_v2 }
  0x92   :  { %9594 = vmatpush1.msk.msra.mxu1 %vm109_vm0, %v81_v62 }
  0x93   :  { %9603 = vmatprep.subr.msk.mxu1 %vm109_vm0, %v86_v63 }
  0x94   :  { %9586 = vmatmul.mubr.msk.f32.gmra.mrb[72].mxu1 %vm99_vm1, %v9958_v3  ;;  %9592 = vmatmul.mubr.msk.f32.gmra.mrb[72].mxu0 %vm99_vm1, %v9990_v9 }
  0x95   :  { %2299 = vmatprep.mubr.f32.mxu1 %v9906_v2  ;;  %2536 = vmatprep.mubr.f32.mxu0 %v9906_v2 }
  0x98   :  { %9587 = vmatmul.mubr.msk.f32.gmra.mrb[74].mxu1 %vm99_vm1, %v9990_v9  ;;  %9600 = vmatmul.mubr.msk.f32.vlgmr.msra.gmra.mrb[74].mxu0 %vm99_vm1, %v9966_v4 }
  0x99   :  { %2453 = vmatprep.mubr.f32.mxu1 %v9906_v2  ;;  %2542 = vmatprep.mubr.f32.mxu0 %v9906_v2 }
  0x9a   :  { %9609 = vmatpush1.msk.msra.mxu0 %vm109_vm0, %v87_v0 }
  0x9b   :  { %9618 = vmatprep.subr.msk.mxu0 %vm109_vm0, %v92_v1 }
  0x9c   :  { %9595 = vmatmul.mubr.msk.f32.vlgmr.msra.gmra.mrb[76].mxu1 %vm99_vm1, %v9966_v4  ;;  %9601 = vmatmul.mubr.msk.f32.gmra.mrb[76].mxu0 %vm99_vm1, %v9958_v3 }
  0x9d   :  { %2459 = vmatprep.mubr.f32.mxu1 %v9906_v2  ;;  %2548 = vmatprep.mubr.f32.mxu0 %v9906_v2 }
  0x9e   :  { %9604 = vmatpush1.msk.msra.mxu1 %vm109_vm0, %v85_v5 }
  0x9f   :  { %9613 = vmatprep.subr.msk.mxu1 %vm109_vm0, %v90_v6 }
  0xa0   :  { %9596 = vmatmul.mubr.msk.f32.gmra.mrb[78].mxu1 %vm99_vm1, %v9958_v3  ;;  %9602 = vmatmul.mubr.msk.f32.gmra.mrb[78].mxu0 %vm99_vm1, %v9990_v9 }
  0xa1   :  { %2465 = vmatprep.mubr.f32.mxu1 %v9906_v2  ;;  %2702 = vmatprep.mubr.f32.mxu0 %v9906_v2 }
  0xa4   :  { %9597 = vmatmul.mubr.msk.f32.gmra.mrb[80].mxu1 %vm99_vm1, %v9990_v9  ;;  %9610 = vmatmul.mubr.msk.f32.vlgmr.msra.gmra.mrb[80].mxu0 %vm99_vm1, %v9966_v4 }
  0xa5   :  { %2619 = vmatprep.mubr.f32.mxu1 %v9906_v2  ;;  %2708 = vmatprep.mubr.f32.mxu0 %v9906_v2 }
  0xa6   :  { %9619 = vmatpush1.msk.msra.mxu0 %vm109_vm0, %v91_v7 }
  0xa7   :  { %9628 = vmatprep.subr.msk.mxu0 %vm109_vm0, %v96_v8 }
  0xa8   :  { %9605 = vmatmul.mubr.msk.f32.vlgmr.msra.gmra.mrb[82].mxu1 %vm99_vm1, %v9966_v4  ;;  %9611 = vmatmul.mubr.msk.f32.gmra.mrb[82].mxu0 %vm99_vm1, %v9958_v3 }
  0xa9   :  { %2625 = vmatprep.mubr.f32.mxu1 %v9906_v2  ;;  %2714 = vmatprep.mubr.f32.mxu0 %v9906_v2 }
  0xaa   :  { %9614 = vmatpush1.msk.msra.mxu1 %vm109_vm0, %v89_v10 }
  0xab   :  { %9623 = vmatprep.subr.msk.mxu1 %vm109_vm0, %v94_v11 }
  0xac   :  { %9606 = vmatmul.mubr.msk.f32.gmra.mrb[84].mxu1 %vm99_vm1, %v9958_v3  ;;  %9612 = vmatmul.mubr.msk.f32.gmra.mrb[84].mxu0 %vm99_vm1, %v9990_v9 }
  0xad   :  { %2631 = vmatprep.mubr.f32.mxu1 %v9906_v2  ;;  %2868 = vmatprep.mubr.f32.mxu0 %v9906_v2 }
  0xb0   :  { %9607 = vmatmul.mubr.msk.f32.gmra.mrb[86].mxu1 %vm99_vm1, %v9990_v9  ;;  %9620 = vmatmul.mubr.msk.f32.vlgmr.msra.gmra.mrb[86].mxu0 %vm99_vm1, %v9966_v4 }
  0xb1   :  { %2785 = vmatprep.mubr.f32.mxu1 %v9906_v2  ;;  %2874 = vmatprep.mubr.f32.mxu0 %v9906_v2 }
  0xb2   :  { %9629 = vmatpush1.msk.msra.mxu0 %vm109_vm0, %v95_v12 }
  0xb3   :  { %9638 = vmatprep.subr.msk.mxu0 %vm4709_vm2, %v10495_v13 }
  0xb4   :  { %9615 = vmatmul.mubr.msk.f32.vlgmr.msra.gmra.mrb[88].mxu1 %vm99_vm1, %v9966_v4  ;;  %9621 = vmatmul.mubr.msk.f32.gmra.mrb[88].mxu0 %vm99_vm1, %v9958_v3 }
  0xb5   :  { %2791 = vmatprep.mubr.f32.mxu1 %v9906_v2  ;;  %2880 = vmatprep.mubr.f32.mxu0 %v9906_v2 }
  0xb6   :  { %9624 = vmatpush1.msk.msra.mxu1 %vm109_vm0, %v93_v14 }
  0xb7   :  { %9633 = vmatprep.subr.msk.mxu1 %vm109_vm0, %v98_v15 }
  0xb8   :  { %9616 = vmatmul.mubr.msk.f32.gmra.mrb[90].mxu1 %vm99_vm1, %v9958_v3  ;;  %9622 = vmatmul.mubr.msk.f32.gmra.mrb[90].mxu0 %vm99_vm1, %v9990_v9 }
  0xb9   :  { %2797 = vmatprep.mubr.f32.mxu1 %v9906_v2  ;;  %3034 = vmatprep.mubr.f32.mxu0 %v9906_v2 }
  0xbc   :  { %9617 = vmatmul.mubr.msk.f32.gmra.mrb[92].mxu1 %vm99_vm1, %v9990_v9  ;;  %9630 = vmatmul.mubr.msk.f32.vlgmr.msra.gmra.mrb[92].mxu0 %vm99_vm1, %v9966_v4 }
  0xbd   :  { %2951 = vmatprep.mubr.f32.mxu1 %v9906_v2  ;;  %3040 = vmatprep.mubr.f32.mxu0 %v9906_v2 }
  0xbe   :  { %9639 = vmatpush1.msk.msra.mxu0 %vm4709_vm2, %v9906_v2 }
  0xc0   :  { %9625 = vmatmul.mubr.msk.f32.vlgmr.msra.gmra.mrb[94].mxu1 %vm99_vm1, %v9966_v4  ;;  %9631 = vmatmul.mubr.msk.f32.gmra.mrb[94].mxu0 %vm99_vm1, %v9958_v3 }
  0xc1   :  { %2957 = vmatprep.mubr.f32.mxu1 %v9906_v2  ;;  %3046 = vmatprep.mubr.f32.mxu0 %v9906_v2 }
  0xc2   :  { %9634 = vmatpush1.msk.msra.mxu1 %vm109_vm0, %v97_v16  ;;  %v10586_v16 = vpop.permute.xlu0 %4303 }
  0xc4   :  { %9626 = vmatmul.mubr.msk.f32.gmra.mrb[96].mxu1 %vm99_vm1, %v9958_v3  ;;  %9632 = vmatmul.mubr.msk.f32.gmra.mrb[96].mxu0 %vm99_vm1, %v9990_v9 }
  0xc5   :  { %2963 = vmatprep.mubr.f32.mxu1 %v9906_v2  ;;  %4910 = vmatprep.mubr.f32.mxu0 %v9906_v2 }
  0xc8   :  { %9627 = vmatmul.mubr.msk.f32.gmra.mrb[98].mxu1 %vm99_vm1, %v9990_v9  ;;  %9640 = vmatmul.mubr.msk.f32.vlgmr.msra.gmra.mrb[98].mxu0 %vm4699_vm3, %v10553_v17 }
  0xc9   :  { %3117 = vmatprep.mubr.f32.mxu1 %v9906_v2  ;;  %4916 = vmatprep.mubr.f32.mxu0 %v9906_v2 }
  0xcc   :  { %9635 = vmatmul.mubr.msk.f32.vlgmr.msra.gmra.mrb[100].mxu1 %vm99_vm1, %v9966_v4  ;;  %9641 = vmatmul.mubr.msk.f32.gmra.mrb[100].mxu0 %vm4699_vm3, %v10564_v18 }
  0xcd   :  { %3123 = vmatprep.mubr.f32.mxu1 %v9906_v2  ;;  %4922 = vmatprep.mubr.f32.mxu0 %v9906_v2 }
  0xd0   :  { %9636 = vmatmul.mubr.msk.f32.gmra.mrb[102].mxu1 %vm99_vm1, %v9958_v3  ;;  %9642 = vmatmul.mubr.msk.f32.gmra.mrb[102].mxu0 %vm4699_vm3, %v10575_v19 }
  0xd1   :  { %3129 = vmatprep.mubr.f32.mxu1 %v9906_v2  ;;  %5076 = vmatprep.mubr.f32.mxu0 %v9906_v2 }
  0xd4   :  { %9637 = vmatmul.mubr.msk.f32.gmra.mrb[104].mxu1 %vm99_vm1, %v9990_v9 }
  0xd5   :  { %4993 = vmatprep.mubr.f32.mxu1 %v9906_v2 }
  0xd7   :  { %v386_v4 = vpop.f32.mrb[0].mxu1  ;;  %v380_v20 = vpop.f32.mrb[0].mxu0 }
  0xd8   :  { %v388_v21 = vpop.f32.mrb[1].mxu1  ;;  %3136 = vst [vmem:[#allocation2] sm:$0xff] %v380_v20  ;;  %v382_v22 = vpop.f32.mrb[1].mxu0 }
  0xd9   :  { %3137 = vst [vmem:[#allocation2 + $0x8] sm:$0xff] %v382_v22 }
  0xdb   :  { %v392_v23 = vpop.f32.mrb[2].mxu1  ;;  %v546_v3 = vpop.f32.mrb[2].mxu0 }
  0xdc   :  { %v394_v24 = vpop.f32.mrb[3].mxu1  ;;  %3140 = vst [vmem:[#allocation2 + $0x20] sm:$0xff] %v546_v3  ;;  %v548_v25 = vpop.f32.mrb[3].mxu0 }
  0xdd   :  { %3141 = vst [vmem:[#allocation2 + $0x28] sm:$0xff] %v548_v25 }
  0xdf   :  { %v463_v26 = vpop.f32.mrb[4].mxu1  ;;  %v552_v27 = vpop.f32.mrb[4].mxu0  ;;  %v3340_v34 = vld [vmem:[#allocation2] sm:$0xf] }
  0xe0   :  { %3138 = vst [vmem:[#allocation2 + $0x10] sm:$0xff] %v463_v26  ;;  %v465_v28 = vpop.f32.mrb[5].mxu1  ;;  %3208 = vst [vmem:[#allocation2 + $0x240] sm:$0xff] %v552_v27  ;;  %v554_v9 = vpop.f32.mrb[5].mxu0  ;;  %v3404_v31 = vld [vmem:[#allocation2 + $0x8] sm:$0xf0] }
  0xe1   :  { %3139 = vst [vmem:[#allocation2 + $0x18] sm:$0xff] %v465_v28  ;;  %3209 = vst [vmem:[#allocation2 + $0x248] sm:$0xff] %v554_v9  ;;  %v3532_v35 = vrot.slane %v3404_v31, 4  ;;  %v3341_v43 = vld [vmem:[#allocation2 + $0x8] sm:$0xf] }
  0xe3   :  { %v469_v29 = vpop.f32.mrb[6].mxu1  ;;  %v558_v30 = vpop.f32.mrb[6].mxu0  ;;  %v3660_v44 = vadd.f32 %v3532_v35, %v3340_v34  ;;  %v3407_v58 = vld [vmem:[#allocation2 + $0x20] sm:$0xf0]  ;;  %v3344_v22 = vld [vmem:[#allocation2 + $0x20] sm:$0xf] }
  0xe4   :  { %3206 = vst [vmem:[#allocation2 + $0x230] sm:$0xff] %v469_v29  ;;  %v471_v32 = vpop.f32.mrb[7].mxu1  ;;  %3276 = vst [vmem:[#allocation2 + $0x460] sm:$0xf] %v558_v30  ;;  %v560_v33 = vpop.f32.mrb[7].mxu0  ;;  %v3535_v8 = vrot.slane %v3407_v58, 4 }
  0xe5   :  { %3207 = vst [vmem:[#allocation2 + $0x238] sm:$0xff] %v471_v32  ;;  %3277 = vst [vmem:[#allocation2 + $0x468] sm:$0xf] %v560_v33  ;;  %v3408_v59 = vld [vmem:[#allocation2 + $0x28] sm:$0xf0] }
  0xe6   :  { %v3536_v15 = vrot.slane %v3408_v59, 4  ;;  %v3345_v34 = vld [vmem:[#allocation2 + $0x28] sm:$0xf] }
  0xe7   :  { %v475_v36 = vpop.f32.mrb[8].mxu1  ;;  %v712_v37 = vpop.f32.mrb[8].mxu0  ;;  %v3405_v38 = vld [vmem:[#allocation2 + $0x10] sm:$0xf0]  ;;  %v3853_v39 = vld [vmem:[#allocation2 + $0x240] sm:$0xf0] }
  0xe8   :  { %v477_v40 = vpop.f32.mrb[9].mxu1  ;;  %3144 = vst [vmem:[#allocation2 + $0x40] sm:$0xff] %v712_v37  ;;  %v714_v41 = vpop.f32.mrb[9].mxu0  ;;  %v3533_v42 = vrot.slane %v3405_v38, 4  ;;  %v3981_v46 = vrot.slane %v3853_v39, 4  ;;  %v3664_v35 = vadd.f32 %v3536_v15, %v3344_v22 }
  0xe9   :  { %3145 = vst [vmem:[#allocation2 + $0x48] sm:$0xff] %v714_v41  ;;  %v3406_v50 = vld [vmem:[#allocation2 + $0x18] sm:$0xf0]  ;;  %v3342_v12 = vld [vmem:[#allocation2 + $0x10] sm:$0xf] }
  0xea   :  { %v3661_v45 = vadd.f32 %v3533_v42, %v3341_v43  ;;  %v3534_v62 = vrot.slane %v3406_v50, 4  ;;  %v3343_v14 = vld [vmem:[#allocation2 + $0x18] sm:$0xf]  ;;  %v3726_v20 = vld [vmem:[#allocation2 + $0x240] sm:$0xf] }
  0xeb   :  { %v629_v47 = vpop.f32.mrb[10].mxu1  ;;  %v718_v48 = vpop.f32.mrb[10].mxu0  ;;  %v3724_v49 = vld [vmem:[#allocation2 + $0x230] sm:$0xf]  ;;  %v4172_v60 = vld [vmem:[#allocation2 + $0x460] sm:$0xf]  ;;  %v3663_v29 = vadd.f32 %v3535_v8, %v3343_v14 }
  0xec   :  { %3142 = vst [vmem:[#allocation2 + $0x30] sm:$0xff] %v629_v47  ;;  %v631_v51 = vpop.f32.mrb[11].mxu1  ;;  %3212 = vst [vmem:[#allocation2 + $0x260] sm:$0xff] %v718_v48  ;;  %v720_v52 = vpop.f32.mrb[11].mxu0  ;;  %v3725_v53 = vld [vmem:[#allocation2 + $0x238] sm:$0xf]  ;;  %v3788_v54 = vadd.f32 %v3724_v49, %v3660_v44  ;;  %v3662_v4 = vadd.f32 %v3534_v62, %v3342_v12 }
  0xed   :  { %v3852_v55 = vld [vmem:[#allocation2 + $0x238] sm:$0xf0]  ;;  %3143 = vst [vmem:[#allocation2 + $0x38] sm:$0xff] %v631_v51  ;;  %3213 = vst [vmem:[#allocation2 + $0x268] sm:$0xff] %v720_v52  ;;  %v3789_v56 = vadd.f32 %v3725_v53, %v3661_v45  ;;  %v4173_v61 = vld [vmem:[#allocation2 + $0x468] sm:$0xf] }
  0xee   :  { %v3980_v57 = vrot.slane %v3852_v55, 4  ;;  %v3854_v21 = vld [vmem:[#allocation2 + $0x248] sm:$0xf0]  ;;  %v3727_v33 = vld [vmem:[#allocation2 + $0x248] sm:$0xf]  ;;  %v3790_v36 = vadd.f32 %v3726_v20, %v3662_v4 }
  0xef   :  { %v635_v63 = vpop.f32.mrb[12].mxu1  ;;  %v724_v0 = vpop.f32.mrb[12].mxu0  ;;  %v4109_v5 = vadd.f32 %v3981_v46, %v3789_v56  ;;  %v3982_v37 = vrot.slane %v3854_v21, 4  ;;  %v10590_v41 = vld [vmem:[#allocation2 + $0x40] sm:$0xf0]  ;;  %v3791_v50 = vadd.f32 %v3727_v33, %v3663_v29 }
  0xf0   :  { %v4108_v1 = vadd.f32 %v3980_v57, %v3788_v54  ;;  %3210 = vst [vmem:[#allocation2 + $0x250] sm:$0xff] %v635_v63  ;;  %v637_v6 = vpop.f32.mrb[13].mxu1  ;;  %3280 = vst [vmem:[#allocation2 + $0x480] sm:$0xf] %v724_v0  ;;  %v726_v7 = vpop.f32.mrb[13].mxu0 }
  0xf1   :  { %3211 = vst [vmem:[#allocation2 + $0x258] sm:$0xff] %v637_v6  ;;  %3281 = vst [vmem:[#allocation2 + $0x488] sm:$0xf] %v726_v7  ;;  %v4237_v11 = vadd.f32 %v4173_v61, %v4109_v5  ;;  %v4110_v57 = vadd.f32 %v3982_v37, %v3790_v36  ;;  %v3539_v61 = vrot.slane %v10590_v41, 4  ;;  %v3412_v62 = vld [vmem:[#allocation2 + $0x48] sm:$0xf0] }
  0xf2   :  { %v4236_v10 = vadd.f32 %v4172_v60, %v4108_v1  ;;  %v3540_v22 = vrot.slane %v3412_v62, 4 }
  0xf3   :  { %v641_v23 = vpop.f32.mrb[14].mxu1  ;;  %v878_v3 = vpop.f32.mrb[14].mxu0  ;;  %v4307_v25 = vadd.f32 %v10586_v16, %v4237_v11  ;;  %v3409_v26 = vld [vmem:[#allocation2 + $0x30] sm:$0xf0]  ;;  %v3857_v27 = vld [vmem:[#allocation2 + $0x260] sm:$0xf0] }
  0xf4   :  { %v4306_v24 = vadd.f32 %v10586_v16, %v4236_v10  ;;  %3278 = vst [vmem:[#allocation2 + $0x470] sm:$0xf] %v641_v23  ;;  %v643_v28 = vpop.f32.mrb[15].mxu1  ;;  %3148 = vst [vmem:[#allocation2 + $0x60] sm:$0xff] %v878_v3  ;;  %v880_v9 = vpop.f32.mrb[15].mxu0  ;;  %v3537_v30 = vrot.slane %v3409_v26, 4 }
  0xf5   :  { %3279 = vst [vmem:[#allocation2 + $0x478] sm:$0xf] %v643_v28  ;;  %3149 = vst [vmem:[#allocation2 + $0x68] sm:$0xff] %v880_v9  ;;  %v4371_v32 = vmax.f32 %v4307_v25, 0.0  ;;  %v3985_v39 = vrot.slane %v3857_v27, 4 }
  0xf6   :  { %v4370_v31 = vmax.f32 %v4306_v24, 0.0  ;;  %v3665_v38 = vadd.f32 %v3537_v30, %v3345_v34  ;;  %v3410_v40 = vld [vmem:[#allocation2 + $0x38] sm:$0xf0]  ;;  %v3346_v14 = vld [vmem:[#allocation2 + $0x30] sm:$0xf] }
  0xf7   :  { %v795_v42 = vpop.f32.mrb[16].mxu1  ;;  %v884_v43 = vpop.f32.mrb[16].mxu0  ;;  %v9812_v45 = vcombine.low %v4371_v32, %v4371_v32  ;;  %v3855_v46 = vld [vmem:[#allocation2 + $0x250] sm:$0xf0]  ;;  %v3728_v47 = vld [vmem:[#allocation2 + $0x250] sm:$0xf] }
  0xf8   :  { %v4498_v44 = vcombine.low %v4370_v31, %v4371_v32  ;;  %3146 = vst [vmem:[#allocation2 + $0x50] sm:$0xff] %v795_v42  ;;  %v797_v48 = vpop.f32.mrb[17].mxu1  ;;  %3216 = vst [vmem:[#allocation2 + $0x280] sm:$0xff] %v884_v43  ;;  %v886_v49 = vpop.f32.mrb[17].mxu0  ;;  %v3983_v51 = vrot.slane %v3855_v46, 4  ;;  %v3792_v53 = vadd.f32 %v3728_v47, %v3664_v35  ;;  %v3538_v56 = vrot.slane %v3410_v40, 4 }
  0xf9   :  { %v3729_v52 = vld [vmem:[#allocation2 + $0x258] sm:$0xf]  ;;  %3147 = vst [vmem:[#allocation2 + $0x58] sm:$0xff] %v797_v48  ;;  %9643 = vmatprep.subr.msk.mxu1 %vm4709_vm2, %v9812_v45  ;;  %3217 = vst [vmem:[#allocation2 + $0x288] sm:$0xff] %v886_v49  ;;  %v3856_v55 = vld [vmem:[#allocation2 + $0x258] sm:$0xf0] }
  0xfa   :  { %v3793_v54 = vadd.f32 %v3729_v52, %v3665_v38  ;;  %9644 = vmatpush1.msk.msra.mxu1 %vm4709_vm2, %v4498_v44  ;;  %v4111_v58 = vadd.f32 %v3983_v51, %v3791_v50  ;;  %v3984_v59 = vrot.slane %v3856_v55, 4  ;;  %v4177_v60 = vld [vmem:[#allocation2 + $0x488] sm:$0xf]  ;;  %v4176_v6 = vld [vmem:[#allocation2 + $0x480] sm:$0xf]  ;;  %v3666_v21 = vadd.f32 %v3538_v56, %v3346_v14 }
  0xfb   :  { %v801_v63 = vpop.f32.mrb[18].mxu1  ;;  %9645 = vmatmul.mubr.msk.f32.vlgmr.msra.gmra.mrb[106].mxu1 %vm4699_vm3, %v10553_v17  ;;  %v890_v0 = vpop.f32.mrb[18].mxu0  ;;  %v4174_v1 = vld [vmem:[#allocation2 + $0x470] sm:$0xf]  ;;  %v3347_v20 = vld [vmem:[#allocation2 + $0x38] sm:$0xf] }
  0xfc   :  { %v4113_v5 = vadd.f32 %v3985_v39, %v3793_v54  ;;  %3214 = vst [vmem:[#allocation2 + $0x270] sm:$0xff] %v801_v63  ;;  %v803_v7 = vpop.f32.mrb[19].mxu1  ;;  %4999 = vmatprep.mubr.f32.mxu1 %v9906_v2  ;;  %3284 = vst [vmem:[#allocation2 + $0x4a0] sm:$0xf] %v890_v0  ;;  %v892_v8 = vpop.f32.mrb[19].mxu0  ;;  %v4238_v11 = vadd.f32 %v4174_v1, %v4110_v57  ;;  %v4112_v12 = vadd.f32 %v3984_v59, %v3792_v53 }
  0xfd   :  { %v4175_v10 = vld [vmem:[#allocation2 + $0x478] sm:$0xf]  ;;  %3215 = vst [vmem:[#allocation2 + $0x278] sm:$0xff] %v803_v7  ;;  %3285 = vst [vmem:[#allocation2 + $0x4a8] sm:$0xf] %v892_v8  ;;  %v3667_v36 = vadd.f32 %v3539_v61, %v3347_v20 }
  0xfe   :  { %v4239_v15 = vadd.f32 %v4175_v10, %v4111_v58  ;;  %v4241_v4 = vadd.f32 %v4177_v60, %v4113_v5  ;;  %v4308_v23 = vadd.f32 %v10586_v16, %v4238_v11  ;;  %v4240_v3 = vadd.f32 %v4176_v6, %v4112_v12  ;;  %v3730_v24 = vld [vmem:[#allocation2 + $0x260] sm:$0xf]  ;;  %v3858_v25 = vld [vmem:[#allocation2 + $0x268] sm:$0xf0]  ;;  %v3731_v40 = vld [vmem:[#allocation2 + $0x268] sm:$0xf] }
  0xff   :  { %v3348_v26 = vld [vmem:[#allocation2 + $0x40] sm:$0xf]  ;;  %v807_v27 = vpop.f32.mrb[20].mxu1  ;;  %9646 = vmatmul.mubr.msk.f32.gmra.mrb[108].mxu1 %vm4699_vm3, %v10564_v18  ;;  %v1044_v28 = vpop.f32.mrb[20].mxu0  ;;  %v3413_v30 = vld [vmem:[#allocation2 + $0x50] sm:$0xf0]  ;;  %v3794_v41 = vadd.f32 %v3730_v24, %v3666_v21  ;;  %v3795_v59 = vadd.f32 %v3731_v40, %v3667_v36 }
 0x100   :  { %v4309_v9 = vadd.f32 %v10586_v16, %v4239_v15  ;;  %v4311_v29 = vadd.f32 %v10586_v16, %v4241_v4  ;;  %v3861_v31 = vld [vmem:[#allocation2 + $0x280] sm:$0xf0]  ;;  %3282 = vst [vmem:[#allocation2 + $0x490] sm:$0xf] %v807_v27  ;;  %v809_v32 = vpop.f32.mrb[21].mxu1  ;;  %3152 = vst [vmem:[#allocation2 + $0x80] sm:$0xff] %v1044_v28  ;;  %5005 = vmatprep.mubr.f32.mxu1 %v9906_v2  ;;  %v4310_v35 = vadd.f32 %v10586_v16, %v4240_v3 }
 0x101   :  { %v1046_v33 = vpop.f32.mrb[21].mxu0  ;;  %v4372_v34 = vmax.f32 %v4308_v23, 0.0  ;;  %v3541_v37 = vrot.slane %v3413_v30, 4  ;;  %3283 = vst [vmem:[#allocation2 + $0x498] sm:$0xf] %v809_v32  ;;  %v3668_v43 = vadd.f32 %v3540_v22, %v3348_v26  ;;  %v3986_v45 = vrot.slane %v3858_v25, 4 }
 0x102   :  { %3153 = vst [vmem:[#allocation2 + $0x88] sm:$0xff] %v1046_v33  ;;  %v4373_v38 = vmax.f32 %v4309_v9, 0.0  ;;  %v4375_v39 = vmax.f32 %v4311_v29, 0.0  ;;  %v3349_v42 = vld [vmem:[#allocation2 + $0x48] sm:$0xf]  ;;  %v4374_v44 = vmax.f32 %v4310_v35, 0.0 }
 0x103   :  { %v3669_v46 = vadd.f32 %v3541_v37, %v3349_v42  ;;  %v3989_v47 = vrot.slane %v3861_v31, 4  ;;  %v3414_v48 = vld [vmem:[#allocation2 + $0x58] sm:$0xf0]  ;;  %v961_v49 = vpop.f32.mrb[22].mxu1  ;;  %9647 = vmatmul.mubr.msk.f32.gmra.mrb[110].mxu1 %vm4699_vm3, %v10575_v19  ;;  %v1050_v50 = vpop.f32.mrb[22].mxu0  ;;  %v4114_v5 = vadd.f32 %v3986_v45, %v3794_v41 }
 0x104   :  { %v4499_v51 = vcombine.low %v4372_v34, %v4373_v38  ;;  %v9813_v52 = vcombine.low %v4373_v38, %v4373_v38  ;;  %v9814_v53 = vcombine.low %v4375_v39, %v4375_v39  ;;  %v3859_v54 = vld [vmem:[#allocation2 + $0x270] sm:$0xf0]  ;;  %v3732_v55 = vld [vmem:[#allocation2 + $0x270] sm:$0xf]  ;;  %3150 = vst [vmem:[#allocation2 + $0x70] sm:$0xff] %v961_v49  ;;  %v963_v56 = vpop.f32.mrb[23].mxu1  ;;  %v4500_v57 = vcombine.low %v4374_v44, %v4375_v39 }
 0x105   :  { %3220 = vst [vmem:[#allocation2 + $0x2a0] sm:$0xff] %v1050_v50  ;;  %v1052_v58 = vpop.f32.mrb[23].mxu0  ;;  %5159 = vmatprep.mubr.f32.mxu1 %v9906_v2  ;;  %v3987_v60 = vrot.slane %v3859_v54, 4  ;;  %v3733_v61 = vld [vmem:[#allocation2 + $0x278] sm:$0xf]  ;;  %v3796_v62 = vadd.f32 %v3732_v55, %v3668_v43  ;;  %3151 = vst [vmem:[#allocation2 + $0x78] sm:$0xff] %v963_v56 }
 0x106   :  { %9648 = vmatprep.subr.msk.mxu0 %vm4709_vm2, %v9813_v52  ;;  %9653 = vmatprep.subr.msk.mxu1 %vm4709_vm2, %v9814_v53  ;;  %3221 = vst [vmem:[#allocation2 + $0x2a8] sm:$0xff] %v1052_v58  ;;  %v3797_v63 = vadd.f32 %v3733_v61, %v3669_v46  ;;  %v3860_v0 = vld [vmem:[#allocation2 + $0x278] sm:$0xf0]  ;;  %v3415_v1 = vld [vmem:[#allocation2 + $0x60] sm:$0xf0]  ;;  %v3542_v10 = vrot.slane %v3414_v48, 4 }
 0x107   :  { %9649 = vmatpush1.msk.msra.mxu0 %vm4709_vm2, %v4499_v51  ;;  %9654 = vmatpush1.msk.msra.mxu1 %vm4709_vm2, %v4500_v57  ;;  %v4115_v6 = vadd.f32 %v3987_v60, %v3795_v59  ;;  %v3988_v7 = vrot.slane %v3860_v0, 4  ;;  %v4181_v8 = vld [vmem:[#allocation2 + $0x4a8] sm:$0xf]  ;;  %v3416_v11 = vld [vmem:[#allocation2 + $0x68] sm:$0xf0]  ;;  %v967_v12 = vpop.f32.mrb[24].mxu1 }
 0x108   :  { %9650 = vmatmul.mubr.msk.f32.vlgmr.msra.gmra.mrb[104].mxu0 %vm4699_vm3, %v10553_v17  ;;  %9655 = vmatmul.mubr.msk.f32.vlgmr.msra.gmra.mrb[112].mxu1 %vm4699_vm3, %v10553_v17  ;;  %v1056_v14 = vpop.f32.mrb[24].mxu0  ;;  %v4178_v15 = vld [vmem:[#allocation2 + $0x490] sm:$0xf]  ;;  %v4117_v4 = vadd.f32 %v3989_v47, %v3797_v63  ;;  %v4180_v20 = vld [vmem:[#allocation2 + $0x4a0] sm:$0xf]  ;;  %3218 = vst [vmem:[#allocation2 + $0x290] sm:$0xff] %v967_v12 }
 0x109   :  { %v969_v21 = vpop.f32.mrb[25].mxu1  ;;  %5082 = vmatprep.mubr.f32.mxu0 %v9906_v2  ;;  %5165 = vmatprep.mubr.f32.mxu1 %v9906_v2  ;;  %3288 = vst [vmem:[#allocation2 + $0x4c0] sm:$0xf] %v1056_v14  ;;  %v1058_v22 = vpop.f32.mrb[25].mxu0  ;;  %v4179_v23 = vld [vmem:[#allocation2 + $0x498] sm:$0xf]  ;;  %v4242_v3 = vadd.f32 %v4178_v15, %v4114_v5  ;;  %v4116_v24 = vadd.f32 %v3988_v7, %v3796_v62 }
 0x10a   :  { %v3543_v25 = vrot.slane %v3415_v1, 4  ;;  %3219 = vst [vmem:[#allocation2 + $0x298] sm:$0xff] %v969_v21  ;;  %3289 = vst [vmem:[#allocation2 + $0x4c8] sm:$0xf] %v1058_v22  ;;  %v4243_v26 = vadd.f32 %v4179_v23, %v4115_v6  ;;  %v4245_v27 = vadd.f32 %v4181_v8, %v4117_v4  ;;  %v3350_v28 = vld [vmem:[#allocation2 + $0x50] sm:$0xf] }
 0x10b   :  { %v3351_v9 = vld [vmem:[#allocation2 + $0x58] sm:$0xf]  ;;  %v3544_v29 = vrot.slane %v3416_v11, 4  ;;  %v4312_v30 = vadd.f32 %v10586_v16, %v4242_v3  ;;  %v4244_v31 = vadd.f32 %v4180_v20, %v4116_v24  ;;  %v3670_v32 = vadd.f32 %v3542_v10, %v3350_v28  ;;  %v3734_v33 = vld [vmem:[#allocation2 + $0x280] sm:$0xf]  ;;  %v973_v36 = vpop.f32.mrb[26].mxu1 }
 0x10c   :  { %v10619_v34 = vld [vmem:[#allocation2 + $0x288] sm:$0xf0]  ;;  %v3352_v35 = vld [vmem:[#allocation2 + $0x60] sm:$0xf]  ;;  %9651 = vmatmul.mubr.msk.f32.gmra.mrb[106].mxu0 %vm4699_vm3, %v10564_v18  ;;  %9656 = vmatmul.mubr.msk.f32.gmra.mrb[114].mxu1 %vm4699_vm3, %v10564_v18  ;;  %v1210_v37 = vpop.f32.mrb[26].mxu0  ;;  %v4313_v38 = vadd.f32 %v10586_v16, %v4243_v26  ;;  %v4315_v39 = vadd.f32 %v10586_v16, %v4245_v27  ;;  %v975_v42 = vpop.f32.mrb[27].mxu1  ;;  %v3671_v46 = vadd.f32 %v3543_v25, %v3351_v9 }
 0x10d   :  { %v3417_v40 = vld [vmem:[#allocation2 + $0x70] sm:$0xf0]  ;;  %v10627_v41 = vld [vmem:[#allocation2 + $0x2a0] sm:$0xf0]  ;;  %3286 = vst [vmem:[#allocation2 + $0x4b0] sm:$0xf] %v973_v36  ;;  %5088 = vmatprep.mubr.f32.mxu0 %v9906_v2  ;;  %5171 = vmatprep.mubr.f32.mxu1 %v9906_v2  ;;  %v4314_v45 = vadd.f32 %v10586_v16, %v4244_v31  ;;  %v3672_v53 = vadd.f32 %v3544_v29, %v3352_v35 }
 0x10e   :  { %3156 = vst [vmem:[#allocation2 + $0xa0] sm:$0xff] %v1210_v37  ;;  %v1212_v43 = vpop.f32.mrb[27].mxu0  ;;  %v4376_v44 = vmax.f32 %v4312_v30, 0.0  ;;  %v3353_v47 = vld [vmem:[#allocation2 + $0x68] sm:$0xf]  ;;  %v3545_v48 = vrot.slane %v3417_v40, 4  ;;  %v3798_v55 = vadd.f32 %v3734_v33, %v3670_v32 }
 0x10f   :  { %3287 = vst [vmem:[#allocation2 + $0x4b8] sm:$0xf] %v975_v42  ;;  %3157 = vst [vmem:[#allocation2 + $0xa8] sm:$0xff] %v1212_v43  ;;  %v4377_v49 = vmax.f32 %v4313_v38, 0.0  ;;  %v4379_v50 = vmax.f32 %v4315_v39, 0.0  ;;  %v3990_v52 = vrot.slane %v10619_v34, 4 }
 0x110   :  { %v3735_v51 = vld [vmem:[#allocation2 + $0x288] sm:$0xf]  ;;  %v4378_v54 = vmax.f32 %v4314_v45, 0.0  ;;  %v3673_v56 = vadd.f32 %v3545_v48, %v3353_v47  ;;  %v3993_v57 = vrot.slane %v10627_v41, 4  ;;  %v10634_v58 = vld [vmem:[#allocation2 + $0x78] sm:$0xf0]  ;;  %9652 = vmatmul.mubr.msk.f32.gmra.mrb[108].mxu0 %vm4699_vm3, %v10575_v19  ;;  %9657 = vmatmul.mubr.msk.f32.gmra.mrb[116].mxu1 %vm4699_vm3, %v10575_v19 }
 0x111   :  { %v1127_v59 = vpop.f32.mrb[28].mxu1  ;;  %v1216_v60 = vpop.f32.mrb[28].mxu0  ;;  %v4501_v61 = vcombine.low %v4376_v44, %v4377_v49  ;;  %v9815_v62 = vcombine.low %v4377_v49, %v4377_v49  ;;  %v9816_v63 = vcombine.low %v4379_v50, %v4379_v50  ;;  %v3863_v0 = vld [vmem:[#allocation2 + $0x290] sm:$0xf0]  ;;  %v3736_v1 = vld [vmem:[#allocation2 + $0x290] sm:$0xf]  ;;  %5242 = vmatprep.mubr.f32.mxu0 %v9906_v2  ;;  %5325 = vmatprep.mubr.f32.mxu1 %v9906_v2 }
 0x112   :  { %3154 = vst [vmem:[#allocation2 + $0x90] sm:$0xff] %v1127_v59  ;;  %v1129_v5 = vpop.f32.mrb[29].mxu1  ;;  %3224 = vst [vmem:[#allocation2 + $0x2c0] sm:$0xff] %v1216_v60  ;;  %v4502_v6 = vcombine.low %v4378_v54, %v4379_v50  ;;  %v1218_v7 = vpop.f32.mrb[29].mxu0  ;;  %v3799_v8 = vadd.f32 %v3735_v51, %v3671_v46  ;;  %v3991_v10 = vrot.slane %v3863_v0, 4  ;;  %v3800_v12 = vadd.f32 %v3736_v1, %v3672_v53 }
 0x113   :  { %v3737_v11 = vld [vmem:[#allocation2 + $0x298] sm:$0xf]  ;;  %3155 = vst [vmem:[#allocation2 + $0x98] sm:$0xff] %v1129_v5  ;;  %9658 = vmatprep.subr.msk.mxu0 %vm4709_vm2, %v9815_v62  ;;  %9663 = vmatprep.subr.msk.mxu1 %vm4709_vm2, %v9816_v63  ;;  %3225 = vst [vmem:[#allocation2 + $0x2c8] sm:$0xff] %v1218_v7  ;;  %v3864_v15 = vld [vmem:[#allocation2 + $0x298] sm:$0xf0]  ;;  %v4118_v20 = vadd.f32 %v3990_v52, %v3798_v55 }
 0x114   :  { %v3801_v14 = vadd.f32 %v3737_v11, %v3673_v56  ;;  %v3419_v4 = vld [vmem:[#allocation2 + $0x80] sm:$0xf0]  ;;  %9659 = vmatpush1.msk.msra.mxu0 %vm4709_vm2, %v4501_v61  ;;  %9664 = vmatpush1.msk.msra.mxu1 %vm4709_vm2, %v4502_v6  ;;  %v4119_v21 = vadd.f32 %v3991_v10, %v3799_v8  ;;  %v3992_v22 = vrot.slane %v3864_v15, 4  ;;  %v4185_v23 = vld [vmem:[#allocation2 + $0x4c8] sm:$0xf]  ;;  %v3546_v3 = vrot.slane %v10634_v58, 4 }
 0x115   :  { %v3420_v24 = vld [vmem:[#allocation2 + $0x88] sm:$0xf0]  ;;  %v1133_v25 = vpop.f32.mrb[30].mxu1  ;;  %9660 = vmatmul.mubr.msk.f32.vlgmr.msra.gmra.mrb[110].mxu0 %vm4699_vm3, %v10553_v17  ;;  %9665 = vmatmul.mubr.msk.f32.vlgmr.msra.gmra.mrb[118].mxu1 %vm4699_vm3, %v10553_v17  ;;  %v1222_v26 = vpop.f32.mrb[30].mxu0  ;;  %v4182_v27 = vld [vmem:[#allocation2 + $0x4b0] sm:$0xf] }
 0x116   :  { %v4121_v28 = vadd.f32 %v3993_v57, %v3801_v14  ;;  %v4184_v9 = vld [vmem:[#allocation2 + $0x4c0] sm:$0xf]  ;;  %3222 = vst [vmem:[#allocation2 + $0x2b0] sm:$0xff] %v1133_v25  ;;  %v1135_v29 = vpop.f32.mrb[31].mxu1  ;;  %5248 = vmatprep.mubr.f32.mxu0 %v9906_v2  ;;  %5331 = vmatprep.mubr.f32.mxu1 %v9906_v2  ;;  %3292 = vst [vmem:[#allocation2 + $0x4e0] sm:$0xf] %v1222_v26  ;;  %v4246_v32 = vadd.f32 %v4182_v27, %v4118_v20 }
 0x117   :  { %v1224_v30 = vpop.f32.mrb[31].mxu0  ;;  %v4183_v31 = vld [vmem:[#allocation2 + $0x4b8] sm:$0xf]  ;;  %v4120_v33 = vadd.f32 %v3992_v22, %v3800_v12  ;;  %v3547_v34 = vrot.slane %v3419_v4, 4  ;;  %3223 = vst [vmem:[#allocation2 + $0x2b8] sm:$0xff] %v1135_v29  ;;  %v3548_v39 = vrot.slane %v3420_v24, 4 }
 0x118   :  { %3293 = vst [vmem:[#allocation2 + $0x4e8] sm:$0xf] %v1224_v30  ;;  %v4247_v35 = vadd.f32 %v4183_v31, %v4119_v21  ;;  %v4249_v36 = vadd.f32 %v4185_v23, %v4121_v28  ;;  %v3354_v37 = vld [vmem:[#allocation2 + $0x70] sm:$0xf]  ;;  %v3355_v38 = vld [vmem:[#allocation2 + $0x78] sm:$0xf]  ;;  %v4316_v40 = vadd.f32 %v10586_v16, %v4246_v32 }
 0x119   :  { %v4248_v41 = vadd.f32 %v4184_v9, %v4120_v33  ;;  %v3674_v42 = vadd.f32 %v3546_v3, %v3354_v37  ;;  %v3738_v43 = vld [vmem:[#allocation2 + $0x2a0] sm:$0xf]  ;;  %v10654_v44 = vld [vmem:[#allocation2 + $0x2a8] sm:$0xf0]  ;;  %v1139_v46 = vpop.f32.mrb[32].mxu1  ;;  %9661 = vmatmul.mubr.msk.f32.gmra.mrb[112].mxu0 %vm4699_vm3, %v10564_v18  ;;  %9666 = vmatmul.mubr.msk.f32.gmra.mrb[120].mxu1 %vm4699_vm3, %v10564_v18  ;;  %v1376_v47 = vpop.f32.mrb[32].mxu0  ;;  %v3675_v56 = vadd.f32 %v3547_v34, %v3355_v38 }
 0x11a   :  { %v3356_v45 = vld [vmem:[#allocation2 + $0x80] sm:$0xf]  ;;  %v4317_v48 = vadd.f32 %v10586_v16, %v4247_v35  ;;  %v4319_v49 = vadd.f32 %v10586_v16, %v4249_v36  ;;  %v3421_v50 = vld [vmem:[#allocation2 + $0x90] sm:$0xf0]  ;;  %v10662_v51 = vld [vmem:[#allocation2 + $0x2c0] sm:$0xf0]  ;;  %5254 = vmatprep.mubr.f32.mxu0 %v9906_v2  ;;  %5337 = vmatprep.mubr.f32.mxu1 %v9906_v2 }
 0x11b   :  { %3290 = vst [vmem:[#allocation2 + $0x4d0] sm:$0xf] %v1139_v46  ;;  %v1141_v52 = vpop.f32.mrb[33].mxu1  ;;  %3160 = vst [vmem:[#allocation2 + $0xc0] sm:$0xff] %v1376_v47  ;;  %v1378_v53 = vpop.f32.mrb[33].mxu0  ;;  %v4380_v54 = vmax.f32 %v4316_v40, 0.0  ;;  %v4318_v55 = vadd.f32 %v10586_v16, %v4248_v41  ;;  %v3676_v63 = vadd.f32 %v3548_v39, %v3356_v45  ;;  %v3802_v1 = vadd.f32 %v3738_v43, %v3674_v42 }
 0x11c   :  { %v3357_v57 = vld [vmem:[#allocation2 + $0x88] sm:$0xf]  ;;  %v3549_v58 = vrot.slane %v3421_v50, 4  ;;  %3291 = vst [vmem:[#allocation2 + $0x4d8] sm:$0xf] %v1141_v52  ;;  %3161 = vst [vmem:[#allocation2 + $0xc8] sm:$0xff] %v1378_v53 }
 0x11d   :  { %v4381_v59 = vmax.f32 %v4317_v48, 0.0  ;;  %v4383_v60 = vmax.f32 %v4319_v49, 0.0  ;;  %v3739_v61 = vld [vmem:[#allocation2 + $0x2a8] sm:$0xf]  ;;  %v3994_v62 = vrot.slane %v10654_v44, 4  ;;  %v4382_v0 = vmax.f32 %v4318_v55, 0.0  ;;  %9662 = vmatmul.mubr.msk.f32.gmra.mrb[114].mxu0 %vm4699_vm3, %v10575_v19  ;;  %9667 = vmatmul.mubr.msk.f32.gmra.mrb[122].mxu1 %vm4699_vm3, %v10575_v19 }
 0x11e   :  { %v3677_v5 = vadd.f32 %v3549_v58, %v3357_v57  ;;  %v3997_v6 = vrot.slane %v10662_v51, 4  ;;  %v10669_v7 = vld [vmem:[#allocation2 + $0x98] sm:$0xf0]  ;;  %v1293_v8 = vpop.f32.mrb[34].mxu1  ;;  %v1382_v10 = vpop.f32.mrb[34].mxu0  ;;  %5408 = vmatprep.mubr.f32.mxu0 %v9906_v2  ;;  %5491 = vmatprep.mubr.f32.mxu1 %v9906_v2  ;;  %v3803_v23 = vadd.f32 %v3739_v61, %v3675_v56 }
 0x11f   :  { %v4503_v11 = vcombine.low %v4380_v54, %v4381_v59  ;;  %v9817_v12 = vcombine.low %v4381_v59, %v4381_v59  ;;  %v9818_v14 = vcombine.low %v4383_v60, %v4383_v60  ;;  %v3867_v15 = vld [vmem:[#allocation2 + $0x2b0] sm:$0xf0]  ;;  %v3740_v4 = vld [vmem:[#allocation2 + $0x2b0] sm:$0xf]  ;;  %3158 = vst [vmem:[#allocation2 + $0xb0] sm:$0xff] %v1293_v8  ;;  %v1295_v20 = vpop.f32.mrb[35].mxu1  ;;  %v4504_v21 = vcombine.low %v4382_v0, %v4383_v60 }
 0x120   :  { %3228 = vst [vmem:[#allocation2 + $0x2e0] sm:$0xff] %v1382_v10  ;;  %v1384_v22 = vpop.f32.mrb[35].mxu0  ;;  %v3995_v3 = vrot.slane %v3867_v15, 4  ;;  %v3741_v24 = vld [vmem:[#allocation2 + $0x2b8] sm:$0xf]  ;;  %v3804_v25 = vadd.f32 %v3740_v4, %v3676_v63  ;;  %3159 = vst [vmem:[#allocation2 + $0xb8] sm:$0xff] %v1295_v20  ;;  %v4122_v9 = vadd.f32 %v3994_v62, %v3802_v1 }
 0x121   :  { %9668 = vmatprep.subr.msk.mxu0 %vm4709_vm2, %v9817_v12  ;;  %9673 = vmatprep.subr.msk.mxu1 %vm4709_vm2, %v9818_v14  ;;  %3229 = vst [vmem:[#allocation2 + $0x2e8] sm:$0xff] %v1384_v22  ;;  %v3805_v26 = vadd.f32 %v3741_v24, %v3677_v5  ;;  %v3868_v27 = vld [vmem:[#allocation2 + $0x2b8] sm:$0xf0]  ;;  %v3423_v28 = vld [vmem:[#allocation2 + $0xa0] sm:$0xf0]  ;;  %v3550_v32 = vrot.slane %v10669_v7, 4 }
 0x122   :  { %9669 = vmatpush1.msk.msra.mxu0 %vm4709_vm2, %v4503_v11  ;;  %9674 = vmatpush1.msk.msra.mxu1 %vm4709_vm2, %v4504_v21  ;;  %v4123_v29 = vadd.f32 %v3995_v3, %v3803_v23  ;;  %v3996_v30 = vrot.slane %v3868_v27, 4  ;;  %v4189_v31 = vld [vmem:[#allocation2 + $0x4e8] sm:$0xf]  ;;  %v3424_v33 = vld [vmem:[#allocation2 + $0xa8] sm:$0xf0]  ;;  %v1299_v34 = vpop.f32.mrb[36].mxu1 }
 0x123   :  { %9670 = vmatmul.mubr.msk.f32.vlgmr.msra.gmra.mrb[116].mxu0 %vm4699_vm3, %v10553_v17  ;;  %9675 = vmatmul.mubr.msk.f32.vlgmr.msra.gmra.mrb[124].mxu1 %vm4699_vm3, %v10553_v17  ;;  %v1388_v35 = vpop.f32.mrb[36].mxu0  ;;  %v4186_v36 = vld [vmem:[#allocation2 + $0x4d0] sm:$0xf]  ;;  %v4125_v37 = vadd.f32 %v3997_v6, %v3805_v26  ;;  %v4188_v38 = vld [vmem:[#allocation2 + $0x4e0] sm:$0xf]  ;;  %3226 = vst [vmem:[#allocation2 + $0x2d0] sm:$0xff] %v1299_v34 }
 0x124   :  { %v1301_v39 = vpop.f32.mrb[37].mxu1  ;;  %5414 = vmatprep.mubr.f32.mxu0 %v9906_v2  ;;  %5497 = vmatprep.mubr.f32.mxu1 %v9906_v2  ;;  %3296 = vst [vmem:[#allocation2 + $0x500] sm:$0xf] %v1388_v35  ;;  %v1390_v40 = vpop.f32.mrb[37].mxu0  ;;  %v4187_v41 = vld [vmem:[#allocation2 + $0x4d8] sm:$0xf]  ;;  %v4250_v42 = vadd.f32 %v4186_v36, %v4122_v9  ;;  %v4124_v43 = vadd.f32 %v3996_v30, %v3804_v25 }
 0x125   :  { %v3551_v44 = vrot.slane %v3423_v28, 4  ;;  %3227 = vst [vmem:[#allocation2 + $0x2d8] sm:$0xff] %v1301_v39  ;;  %3297 = vst [vmem:[#allocation2 + $0x508] sm:$0xf] %v1390_v40  ;;  %v4251_v45 = vadd.f32 %v4187_v41, %v4123_v29  ;;  %v4253_v17 = vadd.f32 %v4189_v31, %v4125_v37  ;;  %v3358_v46 = vld [vmem:[#allocation2 + $0x90] sm:$0xf] }
 0x126   :  { %v3359_v47 = vld [vmem:[#allocation2 + $0x98] sm:$0xf]  ;;  %v3552_v48 = vrot.slane %v3424_v33, 4  ;;  %v4320_v49 = vadd.f32 %v10586_v16, %v4250_v42  ;;  %v4252_v50 = vadd.f32 %v4188_v38, %v4124_v43  ;;  %v3678_v51 = vadd.f32 %v3550_v32, %v3358_v46  ;;  %v3742_v52 = vld [vmem:[#allocation2 + $0x2c0] sm:$0xf]  ;;  %v1305_v55 = vpop.f32.mrb[38].mxu1 }
 0x127   :  { %v10689_v53 = vld [vmem:[#allocation2 + $0x2c8] sm:$0xf0]  ;;  %v3360_v54 = vld [vmem:[#allocation2 + $0xa0] sm:$0xf]  ;;  %9671 = vmatmul.mubr.msk.f32.gmra.mrb[118].mxu0 %vm4699_vm3, %v10564_v18  ;;  %9676 = vmatmul.mubr.msk.f32.gmra.mrb[126].mxu1 %vm4699_vm3, %v10564_v18  ;;  %v1542_v56 = vpop.f32.mrb[38].mxu0  ;;  %v4321_v57 = vadd.f32 %v10586_v16, %v4251_v45  ;;  %v4323_v58 = vadd.f32 %v10586_v16, %v4253_v17  ;;  %v1307_v61 = vpop.f32.mrb[39].mxu1  ;;  %v3679_v18 = vadd.f32 %v3551_v44, %v3359_v47 }
 0x128   :  { %v3425_v59 = vld [vmem:[#allocation2 + $0xb0] sm:$0xf0]  ;;  %v10697_v60 = vld [vmem:[#allocation2 + $0x2e0] sm:$0xf0]  ;;  %3294 = vst [vmem:[#allocation2 + $0x4f0] sm:$0xf] %v1305_v55  ;;  %5420 = vmatprep.mubr.f32.mxu0 %v9906_v2  ;;  %5503 = vmatprep.mubr.f32.mxu1 %v9906_v2  ;;  %v4322_v0 = vadd.f32 %v10586_v16, %v4252_v50  ;;  %v3680_v11 = vadd.f32 %v3552_v48, %v3360_v54 }
 0x129   :  { %3164 = vst [vmem:[#allocation2 + $0xe0] sm:$0xff] %v1542_v56  ;;  %v1544_v62 = vpop.f32.mrb[39].mxu0  ;;  %v4384_v63 = vmax.f32 %v4320_v49, 0.0  ;;  %v3361_v1 = vld [vmem:[#allocation2 + $0xa8] sm:$0xf]  ;;  %v3553_v5 = vrot.slane %v3425_v59, 4  ;;  %v3806_v14 = vadd.f32 %v3742_v52, %v3678_v51 }
 0x12a   :  { %3295 = vst [vmem:[#allocation2 + $0x4f8] sm:$0xf] %v1307_v61  ;;  %3165 = vst [vmem:[#allocation2 + $0xe8] sm:$0xff] %v1544_v62  ;;  %v4385_v6 = vmax.f32 %v4321_v57, 0.0  ;;  %v4387_v7 = vmax.f32 %v4323_v58, 0.0  ;;  %v3998_v10 = vrot.slane %v10689_v53, 4 }
 0x12b   :  { %v3743_v8 = vld [vmem:[#allocation2 + $0x2c8] sm:$0xf]  ;;  %v4386_v12 = vmax.f32 %v4322_v0, 0.0  ;;  %v3681_v15 = vadd.f32 %v3553_v5, %v3361_v1  ;;  %v4001_v4 = vrot.slane %v10697_v60, 4  ;;  %v10704_v20 = vld [vmem:[#allocation2 + $0xb8] sm:$0xf0]  ;;  %9672 = vmatmul.mubr.msk.f32.gmra.mrb[120].mxu0 %vm4699_vm3, %v10575_v19  ;;  %9677 = vmatmul.mubr.msk.f32.gmra.mrb[128].mxu1 %vm4699_vm3, %v10575_v19 }
 0x12c   :  { %v1459_v21 = vpop.f32.mrb[40].mxu1  ;;  %v1548_v22 = vpop.f32.mrb[40].mxu0  ;;  %v4505_v23 = vcombine.low %v4384_v63, %v4385_v6  ;;  %v9819_v3 = vcombine.low %v4385_v6, %v4385_v6  ;;  %v9820_v24 = vcombine.low %v4387_v7, %v4387_v7  ;;  %v3871_v25 = vld [vmem:[#allocation2 + $0x2d0] sm:$0xf0]  ;;  %v3744_v26 = vld [vmem:[#allocation2 + $0x2d0] sm:$0xf]  ;;  %5574 = vmatprep.mubr.f32.mxu0 %v9906_v2  ;;  %5657 = vmatprep.mubr.f32.mxu1 %v9906_v2 }
 0x12d   :  { %3162 = vst [vmem:[#allocation2 + $0xd0] sm:$0xff] %v1459_v21  ;;  %v1461_v27 = vpop.f32.mrb[41].mxu1  ;;  %3232 = vst [vmem:[#allocation2 + $0x300] sm:$0xff] %v1548_v22  ;;  %v4506_v28 = vcombine.low %v4386_v12, %v4387_v7  ;;  %v1550_v9 = vpop.f32.mrb[41].mxu0  ;;  %v3807_v29 = vadd.f32 %v3743_v8, %v3679_v18  ;;  %v3999_v30 = vrot.slane %v3871_v25, 4  ;;  %v3808_v32 = vadd.f32 %v3744_v26, %v3680_v11  ;;  %v10720_v42 = vld [vmem:[%s11390_s3] sm:$0xff] }
 0x12e   :  { %v3745_v31 = vld [vmem:[#allocation2 + $0x2d8] sm:$0xf]  ;;  %3163 = vst [vmem:[#allocation2 + $0xd8] sm:$0xff] %v1461_v27  ;;  %9678 = vmatprep.subr.msk.mxu0 %vm4709_vm2, %v9819_v3  ;;  %9683 = vmatprep.subr.msk.mxu1 %vm4709_vm2, %v9820_v24  ;;  %3233 = vst [vmem:[#allocation2 + $0x308] sm:$0xff] %v1550_v9  ;;  %v3872_v33 = vld [vmem:[#allocation2 + $0x2d8] sm:$0xf0]  ;;  %v4126_v35 = vadd.f32 %v3998_v10, %v3806_v14 }
 0x12f   :  { %v3809_v19 = vadd.f32 %v3745_v31, %v3681_v15  ;;  %v3427_v34 = vld [vmem:[#allocation2 + $0xc0] sm:$0xf0]  ;;  %9679 = vmatpush1.msk.msra.mxu0 %vm4709_vm2, %v4505_v23  ;;  %9684 = vmatpush1.msk.msra.mxu1 %vm4709_vm2, %v4506_v28  ;;  %v4127_v36 = vadd.f32 %v3999_v30, %v3807_v29  ;;  %v4000_v37 = vrot.slane %v3872_v33, 4  ;;  %v4193_v38 = vld [vmem:[#allocation2 + $0x508] sm:$0xf]  ;;  %v3554_v39 = vrot.slane %v10704_v20, 4 }
 0x130   :  { %v3428_v40 = vld [vmem:[#allocation2 + $0xc8] sm:$0xf0]  ;;  %v1465_v41 = vpop.f32.mrb[42].mxu1  ;;  %9680 = vmatmul.mubr.msk.f32.vlgmr.msra.gmra.mrb[122].mxu0 %vm4699_vm3, %v10720_v42  ;;  %9685 = vmatmul.mubr.msk.f32.vlgmr.msra.gmra.mrb[130].mxu1 %vm4699_vm3, %v10720_v42  ;;  %v1554_v43 = vpop.f32.mrb[42].mxu0  ;;  %v4190_v44 = vld [vmem:[#allocation2 + $0x4f0] sm:$0xf] }
 0x131   :  { %v4129_v45 = vadd.f32 %v4001_v4, %v3809_v19  ;;  %v4192_v17 = vld [vmem:[#allocation2 + $0x500] sm:$0xf]  ;;  %3230 = vst [vmem:[#allocation2 + $0x2f0] sm:$0xff] %v1465_v41  ;;  %v1467_v46 = vpop.f32.mrb[43].mxu1  ;;  %5580 = vmatprep.mubr.f32.mxu0 %v9906_v2  ;;  %5663 = vmatprep.mubr.f32.mxu1 %v9906_v2  ;;  %3300 = vst [vmem:[#allocation2 + $0x520] sm:$0xf] %v1554_v43  ;;  %v4254_v49 = vadd.f32 %v4190_v44, %v4126_v35 }
 0x132   :  { %v1556_v47 = vpop.f32.mrb[43].mxu0  ;;  %v4191_v48 = vld [vmem:[#allocation2 + $0x4f8] sm:$0xf]  ;;  %v4128_v50 = vadd.f32 %v4000_v37, %v3808_v32  ;;  %v3555_v51 = vrot.slane %v3427_v34, 4  ;;  %3231 = vst [vmem:[#allocation2 + $0x2f8] sm:$0xff] %v1467_v46  ;;  %v3556_v56 = vrot.slane %v3428_v40, 4 }
 0x133   :  { %3301 = vst [vmem:[#allocation2 + $0x528] sm:$0xf] %v1556_v47  ;;  %v4255_v52 = vadd.f32 %v4191_v48, %v4127_v36  ;;  %v4257_v53 = vadd.f32 %v4193_v38, %v4129_v45  ;;  %v3362_v54 = vld [vmem:[#allocation2 + $0xb0] sm:$0xf]  ;;  %v3363_v55 = vld [vmem:[#allocation2 + $0xb8] sm:$0xf]  ;;  %v4324_v57 = vadd.f32 %v10586_v16, %v4254_v49 }
 0x134   :  { %v4256_v58 = vadd.f32 %v4192_v17, %v4128_v50  ;;  %v3682_v59 = vadd.f32 %v3554_v39, %v3362_v54  ;;  %v3746_v60 = vld [vmem:[#allocation2 + $0x2e0] sm:$0xf]  ;;  %v10729_v61 = vld [vmem:[#allocation2 + $0x2e8] sm:$0xf0]  ;;  %v1471_v63 = vpop.f32.mrb[44].mxu1  ;;  %v1708_v18 = vpop.f32.mrb[44].mxu0  ;;  %v3683_v14 = vadd.f32 %v3555_v51, %v3363_v55 }
 0x135   :  { %v3364_v62 = vld [vmem:[#allocation2 + $0xc0] sm:$0xf]  ;;  %v10734_v0 = vld [vmem:[%s11390_s3 + $0x8] sm:$0xff]  ;;  %v4325_v1 = vadd.f32 %v10586_v16, %v4255_v52  ;;  %v4327_v5 = vadd.f32 %v10586_v16, %v4257_v53  ;;  %v3429_v6 = vld [vmem:[#allocation2 + $0xd0] sm:$0xf0]  ;;  %v1473_v8 = vpop.f32.mrb[45].mxu1 }
 0x136   :  { %9681 = vmatmul.mubr.msk.f32.gmra.mrb[124].mxu0 %vm4699_vm3, %v10734_v0  ;;  %9686 = vmatmul.mubr.msk.f32.gmra.mrb[132].mxu1 %vm4699_vm3, %v10734_v0  ;;  %v10742_v7 = vld [vmem:[#allocation2 + $0x300] sm:$0xf0]  ;;  %3298 = vst [vmem:[#allocation2 + $0x510] sm:$0xf] %v1471_v63  ;;  %3168 = vst [vmem:[#allocation2 + $0x100] sm:$0xff] %v1708_v18  ;;  %v1710_v10 = vpop.f32.mrb[45].mxu0  ;;  %v4326_v12 = vadd.f32 %v10586_v16, %v4256_v58  ;;  %v3684_v3 = vadd.f32 %v3556_v56, %v3364_v62 }
 0x137   :  { %5586 = vmatprep.mubr.f32.mxu0 %v9906_v2  ;;  %5669 = vmatprep.mubr.f32.mxu1 %v9906_v2  ;;  %v4388_v11 = vmax.f32 %v4324_v57, 0.0  ;;  %v3365_v15 = vld [vmem:[#allocation2 + $0xc8] sm:$0xf]  ;;  %v3557_v4 = vrot.slane %v3429_v6, 4  ;;  %3299 = vst [vmem:[#allocation2 + $0x518] sm:$0xf] %v1473_v8  ;;  %v3810_v25 = vadd.f32 %v3746_v60, %v3682_v59 }
 0x138   :  { %3169 = vst [vmem:[#allocation2 + $0x108] sm:$0xff] %v1710_v10  ;;  %v4389_v20 = vmax.f32 %v4325_v1, 0.0  ;;  %v4391_v21 = vmax.f32 %v4327_v5, 0.0  ;;  %v3747_v22 = vld [vmem:[#allocation2 + $0x2e8] sm:$0xf]  ;;  %v4002_v23 = vrot.slane %v10729_v61, 4 }
 0x139   :  { %v4390_v24 = vmax.f32 %v4326_v12, 0.0  ;;  %v3685_v26 = vadd.f32 %v3557_v4, %v3365_v15  ;;  %v4005_v27 = vrot.slane %v10742_v7, 4  ;;  %v10749_v28 = vld [vmem:[#allocation2 + $0xd8] sm:$0xf0]  ;;  %v1625_v9 = vpop.f32.mrb[46].mxu1  ;;  %v1714_v30 = vpop.f32.mrb[46].mxu0  ;;  %v3811_v38 = vadd.f32 %v3747_v22, %v3683_v14 }
 0x13a   :  { %v10754_v29 = vld [vmem:[%s11390_s3 + $0x10] sm:$0xf]  ;;  %v4507_v31 = vcombine.low %v4388_v11, %v4389_v20  ;;  %v9821_v32 = vcombine.low %v4389_v20, %v4389_v20  ;;  %v9822_v19 = vcombine.low %v4391_v21, %v4391_v21  ;;  %v3875_v33 = vld [vmem:[#allocation2 + $0x2f0] sm:$0xf0]  ;;  %3166 = vst [vmem:[#allocation2 + $0xf0] sm:$0xff] %v1625_v9  ;;  %v1627_v35 = vpop.f32.mrb[47].mxu1  ;;  %v4130_v17 = vadd.f32 %v4002_v23, %v3810_v25 }
 0x13b   :  { %9682 = vmatmul.mubr.msk.f32.gmra.mrb[126].mxu0 %vm4699_vm3, %v10754_v29  ;;  %9687 = vmatmul.mubr.msk.f32.gmra.mrb[134].mxu1 %vm4699_vm3, %v10754_v29  ;;  %v3748_v34 = vld [vmem:[#allocation2 + $0x2f0] sm:$0xf]  ;;  %3236 = vst [vmem:[#allocation2 + $0x320] sm:$0xff] %v1714_v30  ;;  %v4508_v36 = vcombine.low %v4390_v24, %v4391_v21  ;;  %v1716_v37 = vpop.f32.mrb[47].mxu0  ;;  %v4003_v39 = vrot.slane %v3875_v33, 4  ;;  %3167 = vst [vmem:[#allocation2 + $0xf8] sm:$0xff] %v1627_v35 }
 0x13c   :  { %5740 = vmatprep.mubr.f32.mxu0 %v9906_v2  ;;  %5823 = vmatprep.mubr.f32.mxu1 %v9906_v2  ;;  %v3749_v40 = vld [vmem:[#allocation2 + $0x2f8] sm:$0xf]  ;;  %v3812_v41 = vadd.f32 %v3748_v34, %v3684_v3  ;;  %3237 = vst [vmem:[#allocation2 + $0x328] sm:$0xff] %v1716_v37  ;;  %v3876_v44 = vld [vmem:[#allocation2 + $0x2f8] sm:$0xf0]  ;;  %v3558_v49 = vrot.slane %v10749_v28, 4 }
 0x13d   :  { %9688 = vmatprep.subr.msk.mxu0 %vm4709_vm2, %v9821_v32  ;;  %9693 = vmatprep.subr.msk.mxu1 %vm4709_vm2, %v9822_v19  ;;  %v3813_v43 = vadd.f32 %v3749_v40, %v3685_v26  ;;  %v3431_v45 = vld [vmem:[#allocation2 + $0xe0] sm:$0xf0]  ;;  %v4131_v46 = vadd.f32 %v4003_v39, %v3811_v38  ;;  %v4004_v47 = vrot.slane %v3876_v44, 4  ;;  %v4197_v48 = vld [vmem:[#allocation2 + $0x528] sm:$0xf]  ;;  %v1631_v51 = vpop.f32.mrb[48].mxu1 }
 0x13e   :  { %9689 = vmatpush1.msk.msra.mxu0 %vm4709_vm2, %v4507_v31  ;;  %9694 = vmatpush1.msk.msra.mxu1 %vm4709_vm2, %v4508_v36  ;;  %v3432_v50 = vld [vmem:[#allocation2 + $0xe8] sm:$0xf0]  ;;  %v1720_v52 = vpop.f32.mrb[48].mxu0  ;;  %v4194_v53 = vld [vmem:[#allocation2 + $0x510] sm:$0xf]  ;;  %3234 = vst [vmem:[#allocation2 + $0x310] sm:$0xff] %v1631_v51 }
 0x13f   :  { %9690 = vmatmul.mubr.msk.f32.vlgmr.msra.gmra.mrb[128].mxu0 %vm4699_vm3, %v10720_v42  ;;  %9695 = vmatmul.mubr.msk.f32.vlgmr.msra.gmra.mrb[136].mxu1 %vm4699_vm3, %v10720_v42  ;;  %v4133_v54 = vadd.f32 %v4005_v27, %v3813_v43  ;;  %v4196_v55 = vld [vmem:[#allocation2 + $0x520] sm:$0xf]  ;;  %v1633_v56 = vpop.f32.mrb[49].mxu1  ;;  %3304 = vst [vmem:[#allocation2 + $0x540] sm:$0xf] %v1720_v52  ;;  %v1722_v57 = vpop.f32.mrb[49].mxu0  ;;  %v4258_v59 = vadd.f32 %v4194_v53, %v4130_v17 }
 0x140   :  { %5746 = vmatprep.mubr.f32.mxu0 %v9906_v2  ;;  %5829 = vmatprep.mubr.f32.mxu1 %v9906_v2  ;;  %v4195_v58 = vld [vmem:[#allocation2 + $0x518] sm:$0xf]  ;;  %v4132_v60 = vadd.f32 %v4004_v47, %v3812_v41  ;;  %v3559_v61 = vrot.slane %v3431_v45, 4  ;;  %3235 = vst [vmem:[#allocation2 + $0x318] sm:$0xff] %v1633_v56  ;;  %3305 = vst [vmem:[#allocation2 + $0x548] sm:$0xf] %v1722_v57 }
 0x141   :  { %v4259_v62 = vadd.f32 %v4195_v58, %v4131_v46  ;;  %v4261_v63 = vadd.f32 %v4197_v48, %v4133_v54  ;;  %v3366_v18 = vld [vmem:[#allocation2 + $0xd0] sm:$0xf]  ;;  %v3367_v1 = vld [vmem:[#allocation2 + $0xd8] sm:$0xf]  ;;  %v3560_v5 = vrot.slane %v3432_v50, 4  ;;  %v4328_v6 = vadd.f32 %v10586_v16, %v4258_v59  ;;  %v1637_v14 = vpop.f32.mrb[50].mxu1 }
 0x142   :  { %v4260_v7 = vadd.f32 %v4196_v55, %v4132_v60  ;;  %v3686_v8 = vadd.f32 %v3558_v49, %v3366_v18  ;;  %v3750_v10 = vld [vmem:[#allocation2 + $0x300] sm:$0xf]  ;;  %v10774_v11 = vld [vmem:[#allocation2 + $0x308] sm:$0xf0]  ;;  %v1874_v15 = vpop.f32.mrb[50].mxu0  ;;  %v1639_v23 = vpop.f32.mrb[51].mxu1  ;;  %v3687_v26 = vadd.f32 %v3559_v61, %v3367_v1 }
 0x143   :  { %v3368_v12 = vld [vmem:[#allocation2 + $0xe0] sm:$0xf]  ;;  %9691 = vmatmul.mubr.msk.f32.gmra.mrb[130].mxu0 %vm4699_vm3, %v10734_v0  ;;  %9696 = vmatmul.mubr.msk.f32.gmra.mrb[138].mxu1 %vm4699_vm3, %v10734_v0  ;;  %v4329_v4 = vadd.f32 %v10586_v16, %v4259_v62  ;;  %v4331_v20 = vadd.f32 %v10586_v16, %v4261_v63  ;;  %v3433_v21 = vld [vmem:[#allocation2 + $0xf0] sm:$0xf0]  ;;  %v10782_v22 = vld [vmem:[#allocation2 + $0x320] sm:$0xf0] }
 0x144   :  { %3302 = vst [vmem:[#allocation2 + $0x530] sm:$0xf] %v1637_v14  ;;  %3172 = vst [vmem:[#allocation2 + $0x120] sm:$0xff] %v1874_v15  ;;  %5752 = vmatprep.mubr.f32.mxu0 %v9906_v2  ;;  %5835 = vmatprep.mubr.f32.mxu1 %v9906_v2  ;;  %v1876_v3 = vpop.f32.mrb[51].mxu0  ;;  %v4392_v24 = vmax.f32 %v4328_v6, 0.0  ;;  %v4330_v25 = vadd.f32 %v10586_v16, %v4260_v7  ;;  %v3561_v28 = vrot.slane %v3433_v21, 4 }
 0x145   :  { %v3369_v27 = vld [vmem:[#allocation2 + $0xe8] sm:$0xf]  ;;  %3303 = vst [vmem:[#allocation2 + $0x538] sm:$0xf] %v1639_v23  ;;  %3173 = vst [vmem:[#allocation2 + $0x128] sm:$0xff] %v1876_v3  ;;  %v4393_v9 = vmax.f32 %v4329_v4, 0.0  ;;  %v3688_v19 = vadd.f32 %v3560_v5, %v3368_v12  ;;  %v3814_v34 = vadd.f32 %v3750_v10, %v3686_v8 }
 0x146   :  { %v4395_v30 = vmax.f32 %v4331_v20, 0.0  ;;  %v3751_v31 = vld [vmem:[#allocation2 + $0x308] sm:$0xf]  ;;  %v4006_v32 = vrot.slane %v10774_v11, 4  ;;  %v4394_v33 = vmax.f32 %v4330_v25, 0.0  ;;  %v3689_v35 = vadd.f32 %v3561_v28, %v3369_v27  ;;  %v1791_v38 = vpop.f32.mrb[52].mxu1 }
 0x147   :  { %v4009_v36 = vrot.slane %v10782_v22, 4  ;;  %v10789_v37 = vld [vmem:[#allocation2 + $0xf8] sm:$0xf0]  ;;  %9692 = vmatmul.mubr.msk.f32.gmra.mrb[132].mxu0 %vm4699_vm3, %v10754_v29  ;;  %9697 = vmatmul.mubr.msk.f32.gmra.mrb[140].mxu1 %vm4699_vm3, %v10754_v29  ;;  %v1880_v39 = vpop.f32.mrb[52].mxu0  ;;  %v4509_v40 = vcombine.low %v4392_v24, %v4393_v9  ;;  %v9823_v41 = vcombine.low %v4393_v9, %v4393_v9  ;;  %v3879_v44 = vld [vmem:[#allocation2 + $0x310] sm:$0xf0]  ;;  %v3815_v48 = vadd.f32 %v3751_v31, %v3687_v26 }
 0x148   :  { %v9824_v43 = vcombine.low %v4395_v30, %v4395_v30  ;;  %v3752_v45 = vld [vmem:[#allocation2 + $0x310] sm:$0xf]  ;;  %3170 = vst [vmem:[#allocation2 + $0x110] sm:$0xff] %v1791_v38  ;;  %v1793_v17 = vpop.f32.mrb[53].mxu1  ;;  %3240 = vst [vmem:[#allocation2 + $0x340] sm:$0xff] %v1880_v39  ;;  %v4510_v46 = vcombine.low %v4394_v33, %v4395_v30  ;;  %v1882_v47 = vpop.f32.mrb[53].mxu0  ;;  %5906 = vmatprep.mubr.f32.mxu0 %v9906_v2  ;;  %5989 = vmatprep.mubr.f32.mxu1 %v9906_v2 }
 0x149   :  { %v4007_v49 = vrot.slane %v3879_v44, 4  ;;  %v3753_v50 = vld [vmem:[#allocation2 + $0x318] sm:$0xf]  ;;  %v3816_v51 = vadd.f32 %v3752_v45, %v3688_v19  ;;  %3171 = vst [vmem:[#allocation2 + $0x118] sm:$0xff] %v1793_v17  ;;  %9698 = vmatprep.subr.msk.mxu0 %vm4709_vm2, %v9823_v41  ;;  %3241 = vst [vmem:[#allocation2 + $0x348] sm:$0xff] %v1882_v47  ;;  %v4134_v55 = vadd.f32 %v4006_v32, %v3814_v34  ;;  %v3562_v59 = vrot.slane %v10789_v37, 4 }
 0x14a   :  { %9703 = vmatprep.subr.msk.mxu1 %vm4709_vm2, %v9824_v43  ;;  %v3817_v52 = vadd.f32 %v3753_v50, %v3689_v35  ;;  %v3880_v53 = vld [vmem:[#allocation2 + $0x318] sm:$0xf0]  ;;  %v3435_v54 = vld [vmem:[#allocation2 + $0x100] sm:$0xf0]  ;;  %9699 = vmatpush1.msk.msra.mxu0 %vm4709_vm2, %v4509_v40  ;;  %v4201_v58 = vld [vmem:[#allocation2 + $0x548] sm:$0xf] }
 0x14b   :  { %9704 = vmatpush1.msk.msra.mxu1 %vm4709_vm2, %v4510_v46  ;;  %v4135_v56 = vadd.f32 %v4007_v49, %v3815_v48  ;;  %v4008_v57 = vrot.slane %v3880_v53, 4  ;;  %v3436_v60 = vld [vmem:[#allocation2 + $0x108] sm:$0xf0]  ;;  %v1797_v61 = vpop.f32.mrb[54].mxu1  ;;  %9700 = vmatmul.mubr.msk.f32.vlgmr.msra.gmra.mrb[134].mxu0 %vm4699_vm3, %v10720_v42  ;;  %v1886_v62 = vpop.f32.mrb[54].mxu0  ;;  %v3563_v11 = vrot.slane %v3435_v54, 4 }
 0x14c   :  { %9705 = vmatmul.mubr.msk.f32.vlgmr.msra.gmra.mrb[142].mxu1 %vm4699_vm3, %v10720_v42  ;;  %v4198_v63 = vld [vmem:[#allocation2 + $0x530] sm:$0xf]  ;;  %v4137_v18 = vadd.f32 %v4009_v36, %v3817_v52  ;;  %v4200_v1 = vld [vmem:[#allocation2 + $0x540] sm:$0xf]  ;;  %3238 = vst [vmem:[#allocation2 + $0x330] sm:$0xff] %v1797_v61  ;;  %v1799_v5 = vpop.f32.mrb[55].mxu1  ;;  %5912 = vmatprep.mubr.f32.mxu0 %v9906_v2 }
 0x14d   :  { %5995 = vmatprep.mubr.f32.mxu1 %v9906_v2  ;;  %3308 = vst [vmem:[#allocation2 + $0x560] sm:$0xf] %v1886_v62  ;;  %v1888_v6 = vpop.f32.mrb[55].mxu0  ;;  %v4199_v7 = vld [vmem:[#allocation2 + $0x538] sm:$0xf]  ;;  %v4262_v8 = vadd.f32 %v4198_v63, %v4134_v55  ;;  %v4136_v10 = vadd.f32 %v4008_v57, %v3816_v51  ;;  %3239 = vst [vmem:[#allocation2 + $0x338] sm:$0xff] %v1799_v5 }
 0x14e   :  { %3309 = vst [vmem:[#allocation2 + $0x568] sm:$0xf] %v1888_v6  ;;  %v4263_v12 = vadd.f32 %v4199_v7, %v4135_v56  ;;  %v4265_v14 = vadd.f32 %v4201_v58, %v4137_v18  ;;  %v3370_v15 = vld [vmem:[#allocation2 + $0xf0] sm:$0xf]  ;;  %v3371_v4 = vld [vmem:[#allocation2 + $0xf8] sm:$0xf] }
 0x14f   :  { %v3564_v20 = vrot.slane %v3436_v60, 4  ;;  %v4332_v21 = vadd.f32 %v10586_v16, %v4262_v8  ;;  %v4264_v22 = vadd.f32 %v4200_v1, %v4136_v10  ;;  %v3690_v23 = vadd.f32 %v3562_v59, %v3370_v15  ;;  %v3754_v3 = vld [vmem:[#allocation2 + $0x320] sm:$0xf]  ;;  %v10809_v24 = vld [vmem:[#allocation2 + $0x328] sm:$0xf0]  ;;  %v1803_v26 = vpop.f32.mrb[56].mxu1  ;;  %9701 = vmatmul.mubr.msk.f32.gmra.mrb[136].mxu0 %vm4699_vm3, %v10734_v0 }
 0x150   :  { %v3372_v25 = vld [vmem:[#allocation2 + $0x100] sm:$0xf]  ;;  %9706 = vmatmul.mubr.msk.f32.gmra.mrb[144].mxu1 %vm4699_vm3, %v10734_v0  ;;  %v2040_v27 = vpop.f32.mrb[56].mxu0  ;;  %v4333_v28 = vadd.f32 %v10586_v16, %v4263_v12  ;;  %v4335_v9 = vadd.f32 %v10586_v16, %v4265_v14  ;;  %v3437_v30 = vld [vmem:[#allocation2 + $0x110] sm:$0xf0]  ;;  %v1805_v32 = vpop.f32.mrb[57].mxu1  ;;  %5918 = vmatprep.mubr.f32.mxu0 %v9906_v2  ;;  %v3691_v35 = vadd.f32 %v3563_v11, %v3371_v4 }
 0x151   :  { %v10817_v31 = vld [vmem:[#allocation2 + $0x340] sm:$0xf0]  ;;  %3306 = vst [vmem:[#allocation2 + $0x550] sm:$0xf] %v1803_v26  ;;  %3176 = vst [vmem:[#allocation2 + $0x140] sm:$0xff] %v2040_v27  ;;  %6001 = vmatprep.mubr.f32.mxu1 %v9906_v2  ;;  %v2042_v19 = vpop.f32.mrb[57].mxu0  ;;  %v4334_v34 = vadd.f32 %v10586_v16, %v4264_v22  ;;  %v3692_v43 = vadd.f32 %v3564_v20, %v3372_v25  ;;  %v3818_v45 = vadd.f32 %v3754_v3, %v3690_v23 }
 0x152   :  { %v4396_v33 = vmax.f32 %v4332_v21, 0.0  ;;  %v3373_v36 = vld [vmem:[#allocation2 + $0x108] sm:$0xf]  ;;  %v3565_v37 = vrot.slane %v3437_v30, 4  ;;  %3307 = vst [vmem:[#allocation2 + $0x558] sm:$0xf] %v1805_v32 }
 0x153   :  { %3177 = vst [vmem:[#allocation2 + $0x148] sm:$0xff] %v2042_v19  ;;  %v4397_v38 = vmax.f32 %v4333_v28, 0.0  ;;  %v4399_v39 = vmax.f32 %v4335_v9, 0.0  ;;  %v3755_v40 = vld [vmem:[#allocation2 + $0x328] sm:$0xf]  ;;  %v4010_v41 = vrot.slane %v10809_v24, 4  ;;  %9702 = vmatmul.mubr.msk.f32.gmra.mrb[138].mxu0 %vm4699_vm3, %v10754_v29 }
 0x154   :  { %v4398_v44 = vmax.f32 %v4334_v34, 0.0  ;;  %v3693_v17 = vadd.f32 %v3565_v37, %v3373_v36  ;;  %v4013_v46 = vrot.slane %v10817_v31, 4  ;;  %v10824_v47 = vld [vmem:[#allocation2 + $0x118] sm:$0xf0]  ;;  %v1957_v48 = vpop.f32.mrb[58].mxu1  ;;  %9707 = vmatmul.mubr.msk.f32.gmra.mrb[146].mxu1 %vm4699_vm3, %v10754_v29  ;;  %v2046_v49 = vpop.f32.mrb[58].mxu0  ;;  %6072 = vmatprep.mubr.f32.mxu0 %v9906_v2  ;;  %v3819_v58 = vadd.f32 %v3755_v40, %v3691_v35 }
 0x155   :  { %v4511_v50 = vcombine.low %v4396_v33, %v4397_v38  ;;  %v9825_v51 = vcombine.low %v4397_v38, %v4397_v38  ;;  %v9826_v52 = vcombine.low %v4399_v39, %v4399_v39  ;;  %v3883_v53 = vld [vmem:[#allocation2 + $0x330] sm:$0xf0]  ;;  %v3756_v54 = vld [vmem:[#allocation2 + $0x330] sm:$0xf]  ;;  %3174 = vst [vmem:[#allocation2 + $0x130] sm:$0xff] %v1957_v48  ;;  %v1959_v55 = vpop.f32.mrb[59].mxu1  ;;  %6155 = vmatprep.mubr.f32.mxu1 %v9906_v2 }
 0x156   :  { %3244 = vst [vmem:[#allocation2 + $0x360] sm:$0xff] %v2046_v49  ;;  %v4512_v56 = vcombine.low %v4398_v44, %v4399_v39  ;;  %v2048_v57 = vpop.f32.mrb[59].mxu0  ;;  %v4011_v59 = vrot.slane %v3883_v53, 4  ;;  %v3757_v60 = vld [vmem:[#allocation2 + $0x338] sm:$0xf]  ;;  %v3820_v61 = vadd.f32 %v3756_v54, %v3692_v43  ;;  %3175 = vst [vmem:[#allocation2 + $0x138] sm:$0xff] %v1959_v55  ;;  %v4138_v1 = vadd.f32 %v4010_v41, %v3818_v45 }
 0x157   :  { %9708 = vmatprep.subr.msk.mxu0 %vm4709_vm2, %v9825_v51  ;;  %9713 = vmatprep.subr.msk.mxu1 %vm4709_vm2, %v9826_v52  ;;  %3245 = vst [vmem:[#allocation2 + $0x368] sm:$0xff] %v2048_v57  ;;  %v3821_v62 = vadd.f32 %v3757_v60, %v3693_v17  ;;  %v3884_v63 = vld [vmem:[#allocation2 + $0x338] sm:$0xf0]  ;;  %v3439_v18 = vld [vmem:[#allocation2 + $0x120] sm:$0xf0]  ;;  %v3566_v8 = vrot.slane %v10824_v47, 4 }
 0x158   :  { %9709 = vmatpush1.msk.msra.mxu0 %vm4709_vm2, %v4511_v50  ;;  %9714 = vmatpush1.msk.msra.mxu1 %vm4709_vm2, %v4512_v56  ;;  %v4139_v5 = vadd.f32 %v4011_v59, %v3819_v58  ;;  %v4012_v6 = vrot.slane %v3884_v63, 4  ;;  %v4205_v7 = vld [vmem:[#allocation2 + $0x568] sm:$0xf]  ;;  %v3440_v10 = vld [vmem:[#allocation2 + $0x128] sm:$0xf0]  ;;  %v1963_v11 = vpop.f32.mrb[60].mxu1 }
 0x159   :  { %9710 = vmatmul.mubr.msk.f32.vlgmr.msra.gmra.mrb[140].mxu0 %vm4699_vm3, %v10720_v42  ;;  %9715 = vmatmul.mubr.msk.f32.vlgmr.msra.gmra.mrb[148].mxu1 %vm4699_vm3, %v10720_v42  ;;  %v2052_v12 = vpop.f32.mrb[60].mxu0  ;;  %v4202_v14 = vld [vmem:[#allocation2 + $0x550] sm:$0xf]  ;;  %v4141_v15 = vadd.f32 %v4013_v46, %v3821_v62  ;;  %v4204_v4 = vld [vmem:[#allocation2 + $0x560] sm:$0xf]  ;;  %3242 = vst [vmem:[#allocation2 + $0x350] sm:$0xff] %v1963_v11 }
 0x15a   :  { %v1965_v20 = vpop.f32.mrb[61].mxu1  ;;  %6078 = vmatprep.mubr.f32.mxu0 %v9906_v2  ;;  %6161 = vmatprep.mubr.f32.mxu1 %v9906_v2  ;;  %3312 = vst [vmem:[#allocation2 + $0x580] sm:$0xf] %v2052_v12  ;;  %v2054_v21 = vpop.f32.mrb[61].mxu0  ;;  %v4203_v22 = vld [vmem:[#allocation2 + $0x558] sm:$0xf]  ;;  %v4266_v23 = vadd.f32 %v4202_v14, %v4138_v1  ;;  %v4140_v3 = vadd.f32 %v4012_v6, %v3820_v61 }
 0x15b   :  { %v3567_v24 = vrot.slane %v3439_v18, 4  ;;  %3243 = vst [vmem:[#allocation2 + $0x358] sm:$0xff] %v1965_v20  ;;  %3313 = vst [vmem:[#allocation2 + $0x588] sm:$0xf] %v2054_v21  ;;  %v4267_v25 = vadd.f32 %v4203_v22, %v4139_v5  ;;  %v4269_v26 = vadd.f32 %v4205_v7, %v4141_v15  ;;  %v3374_v27 = vld [vmem:[#allocation2 + $0x110] sm:$0xf] }
 0x15c   :  { %v3375_v28 = vld [vmem:[#allocation2 + $0x118] sm:$0xf]  ;;  %v3568_v9 = vrot.slane %v3440_v10, 4  ;;  %v4336_v30 = vadd.f32 %v10586_v16, %v4266_v23  ;;  %v4268_v31 = vadd.f32 %v4204_v4, %v4140_v3  ;;  %v3694_v32 = vadd.f32 %v3566_v8, %v3374_v27  ;;  %v3758_v19 = vld [vmem:[#allocation2 + $0x340] sm:$0xf]  ;;  %v1969_v35 = vpop.f32.mrb[62].mxu1 }
 0x15d   :  { %v10844_v33 = vld [vmem:[#allocation2 + $0x348] sm:$0xf0]  ;;  %v3376_v34 = vld [vmem:[#allocation2 + $0x120] sm:$0xf]  ;;  %9711 = vmatmul.mubr.msk.f32.gmra.mrb[142].mxu0 %vm4699_vm3, %v10734_v0  ;;  %9716 = vmatmul.mubr.msk.f32.gmra.mrb[150].mxu1 %vm4699_vm3, %v10734_v0  ;;  %v2206_v36 = vpop.f32.mrb[62].mxu0  ;;  %v4337_v37 = vadd.f32 %v10586_v16, %v4267_v25  ;;  %v4339_v38 = vadd.f32 %v10586_v16, %v4269_v26  ;;  %v1971_v41 = vpop.f32.mrb[63].mxu1  ;;  %v3695_v17 = vadd.f32 %v3567_v24, %v3375_v28 }
 0x15e   :  { %v3441_v39 = vld [vmem:[#allocation2 + $0x130] sm:$0xf0]  ;;  %v10852_v40 = vld [vmem:[#allocation2 + $0x360] sm:$0xf0]  ;;  %3310 = vst [vmem:[#allocation2 + $0x570] sm:$0xf] %v1969_v35  ;;  %6084 = vmatprep.mubr.f32.mxu0 %v9906_v2  ;;  %6167 = vmatprep.mubr.f32.mxu1 %v9906_v2  ;;  %v4338_v45 = vadd.f32 %v10586_v16, %v4268_v31  ;;  %v3696_v52 = vadd.f32 %v3568_v9, %v3376_v34 }
 0x15f   :  { %3180 = vst [vmem:[#allocation2 + $0x160] sm:$0xff] %v2206_v36  ;;  %v2208_v43 = vpop.f32.mrb[63].mxu0  ;;  %v4400_v44 = vmax.f32 %v4336_v30, 0.0  ;;  %v3377_v46 = vld [vmem:[#allocation2 + $0x128] sm:$0xf]  ;;  %v3569_v47 = vrot.slane %v3441_v39, 4  ;;  %v3822_v54 = vadd.f32 %v3758_v19, %v3694_v32 }
 0x160   :  { %3311 = vst [vmem:[#allocation2 + $0x578] sm:$0xf] %v1971_v41  ;;  %3181 = vst [vmem:[#allocation2 + $0x168] sm:$0xff] %v2208_v43  ;;  %v4401_v48 = vmax.f32 %v4337_v37, 0.0  ;;  %v4403_v49 = vmax.f32 %v4339_v38, 0.0  ;;  %v4014_v51 = vrot.slane %v10844_v33, 4 }
 0x161   :  { %v3759_v50 = vld [vmem:[#allocation2 + $0x348] sm:$0xf]  ;;  %v4402_v53 = vmax.f32 %v4338_v45, 0.0  ;;  %v3697_v55 = vadd.f32 %v3569_v47, %v3377_v46  ;;  %v4017_v56 = vrot.slane %v10852_v40, 4  ;;  %v10859_v57 = vld [vmem:[#allocation2 + $0x138] sm:$0xf0]  ;;  %9712 = vmatmul.mubr.msk.f32.gmra.mrb[144].mxu0 %vm4699_vm3, %v10754_v29  ;;  %9717 = vmatmul.mubr.msk.f32.gmra.mrb[152].mxu1 %vm4699_vm3, %v10754_v29 }
 0x162   :  { %v2123_v58 = vpop.f32.mrb[64].mxu1  ;;  %v2212_v59 = vpop.f32.mrb[64].mxu0  ;;  %v4513_v60 = vcombine.low %v4400_v44, %v4401_v48  ;;  %v9827_v61 = vcombine.low %v4401_v48, %v4401_v48  ;;  %v9828_v62 = vcombine.low %v4403_v49, %v4403_v49  ;;  %v3887_v63 = vld [vmem:[#allocation2 + $0x350] sm:$0xf0]  ;;  %v3760_v18 = vld [vmem:[#allocation2 + $0x350] sm:$0xf]  ;;  %6238 = vmatprep.mubr.f32.mxu0 %v9906_v2  ;;  %6321 = vmatprep.mubr.f32.mxu1 %v9906_v2 }
 0x163   :  { %3178 = vst [vmem:[#allocation2 + $0x150] sm:$0xff] %v2123_v58  ;;  %v2125_v1 = vpop.f32.mrb[65].mxu1  ;;  %3248 = vst [vmem:[#allocation2 + $0x380] sm:$0xff] %v2212_v59  ;;  %v4514_v5 = vcombine.low %v4402_v53, %v4403_v49  ;;  %v2214_v6 = vpop.f32.mrb[65].mxu0  ;;  %v3823_v7 = vadd.f32 %v3759_v50, %v3695_v17  ;;  %v4015_v8 = vrot.slane %v3887_v63, 4  ;;  %v3824_v11 = vadd.f32 %v3760_v18, %v3696_v52 }
 0x164   :  { %v3761_v10 = vld [vmem:[#allocation2 + $0x358] sm:$0xf]  ;;  %3179 = vst [vmem:[#allocation2 + $0x158] sm:$0xff] %v2125_v1  ;;  %9718 = vmatprep.subr.msk.mxu0 %vm4709_vm2, %v9827_v61  ;;  %9723 = vmatprep.subr.msk.mxu1 %vm4709_vm2, %v9828_v62  ;;  %3249 = vst [vmem:[#allocation2 + $0x388] sm:$0xff] %v2214_v6  ;;  %v3888_v14 = vld [vmem:[#allocation2 + $0x358] sm:$0xf0]  ;;  %v4142_v4 = vadd.f32 %v4014_v51, %v3822_v54 }
 0x165   :  { %v3825_v12 = vadd.f32 %v3761_v10, %v3697_v55  ;;  %v3443_v15 = vld [vmem:[#allocation2 + $0x140] sm:$0xf0]  ;;  %9719 = vmatpush1.msk.msra.mxu0 %vm4709_vm2, %v4513_v60  ;;  %9724 = vmatpush1.msk.msra.mxu1 %vm4709_vm2, %v4514_v5  ;;  %v4143_v20 = vadd.f32 %v4015_v8, %v3823_v7  ;;  %v4016_v21 = vrot.slane %v3888_v14, 4  ;;  %v4209_v22 = vld [vmem:[#allocation2 + $0x588] sm:$0xf]  ;;  %v3570_v23 = vrot.slane %v10859_v57, 4 }
 0x166   :  { %v3444_v3 = vld [vmem:[#allocation2 + $0x148] sm:$0xf0]  ;;  %v2129_v24 = vpop.f32.mrb[66].mxu1  ;;  %9720 = vmatmul.mubr.msk.f32.vlgmr.msra.gmra.mrb[146].mxu0 %vm4699_vm3, %v10720_v42  ;;  %9725 = vmatmul.mubr.msk.f32.vlgmr.msra.gmra.mrb[154].mxu1 %vm4699_vm3, %v10720_v42  ;;  %v2218_v25 = vpop.f32.mrb[66].mxu0  ;;  %v4206_v26 = vld [vmem:[#allocation2 + $0x570] sm:$0xf] }
 0x167   :  { %v4145_v27 = vadd.f32 %v4017_v56, %v3825_v12  ;;  %v4208_v28 = vld [vmem:[#allocation2 + $0x580] sm:$0xf]  ;;  %3246 = vst [vmem:[#allocation2 + $0x370] sm:$0xff] %v2129_v24  ;;  %v2131_v9 = vpop.f32.mrb[67].mxu1  ;;  %6244 = vmatprep.mubr.f32.mxu0 %v9906_v2  ;;  %6327 = vmatprep.mubr.f32.mxu1 %v9906_v2  ;;  %3316 = vst [vmem:[#allocation2 + $0x5a0] sm:$0xf] %v2218_v25  ;;  %v4270_v32 = vadd.f32 %v4206_v26, %v4142_v4 }
 0x168   :  { %v2220_v30 = vpop.f32.mrb[67].mxu0  ;;  %v4207_v31 = vld [vmem:[#allocation2 + $0x578] sm:$0xf]  ;;  %v4144_v19 = vadd.f32 %v4016_v21, %v3824_v11  ;;  %v3571_v33 = vrot.slane %v3443_v15, 4  ;;  %3247 = vst [vmem:[#allocation2 + $0x378] sm:$0xff] %v2131_v9  ;;  %v3572_v38 = vrot.slane %v3444_v3, 4 }
 0x169   :  { %3317 = vst [vmem:[#allocation2 + $0x5a8] sm:$0xf] %v2220_v30  ;;  %v4271_v34 = vadd.f32 %v4207_v31, %v4143_v20  ;;  %v4273_v35 = vadd.f32 %v4209_v22, %v4145_v27  ;;  %v3378_v36 = vld [vmem:[#allocation2 + $0x130] sm:$0xf]  ;;  %v3379_v37 = vld [vmem:[#allocation2 + $0x138] sm:$0xf]  ;;  %v4340_v39 = vadd.f32 %v10586_v16, %v4270_v32 }
 0x16a   :  { %v4272_v40 = vadd.f32 %v4208_v28, %v4144_v19  ;;  %v3698_v41 = vadd.f32 %v3570_v23, %v3378_v36  ;;  %v3762_v43 = vld [vmem:[#allocation2 + $0x360] sm:$0xf]  ;;  %v10879_v44 = vld [vmem:[#allocation2 + $0x368] sm:$0xf0]  ;;  %v2135_v17 = vpop.f32.mrb[68].mxu1  ;;  %9721 = vmatmul.mubr.msk.f32.gmra.mrb[148].mxu0 %vm4699_vm3, %v10734_v0  ;;  %9726 = vmatmul.mubr.msk.f32.gmra.mrb[156].mxu1 %vm4699_vm3, %v10734_v0  ;;  %v2372_v46 = vpop.f32.mrb[68].mxu0  ;;  %v3699_v55 = vadd.f32 %v3571_v33, %v3379_v37 }
 0x16b   :  { %v3380_v45 = vld [vmem:[#allocation2 + $0x140] sm:$0xf]  ;;  %v4341_v47 = vadd.f32 %v10586_v16, %v4271_v34  ;;  %v4343_v48 = vadd.f32 %v10586_v16, %v4273_v35  ;;  %v3445_v49 = vld [vmem:[#allocation2 + $0x150] sm:$0xf0]  ;;  %v10887_v50 = vld [vmem:[#allocation2 + $0x380] sm:$0xf0]  ;;  %6250 = vmatprep.mubr.f32.mxu0 %v9906_v2  ;;  %6333 = vmatprep.mubr.f32.mxu1 %v9906_v2 }
 0x16c   :  { %3314 = vst [vmem:[#allocation2 + $0x590] sm:$0xf] %v2135_v17  ;;  %v2137_v51 = vpop.f32.mrb[69].mxu1  ;;  %3184 = vst [vmem:[#allocation2 + $0x180] sm:$0xff] %v2372_v46  ;;  %v2374_v52 = vpop.f32.mrb[69].mxu0  ;;  %v4404_v53 = vmax.f32 %v4340_v39, 0.0  ;;  %v4342_v54 = vadd.f32 %v10586_v16, %v4272_v40  ;;  %v3700_v62 = vadd.f32 %v3572_v38, %v3380_v45  ;;  %v3826_v18 = vadd.f32 %v3762_v43, %v3698_v41 }
 0x16d   :  { %v3381_v56 = vld [vmem:[#allocation2 + $0x148] sm:$0xf]  ;;  %v3573_v57 = vrot.slane %v3445_v49, 4  ;;  %3315 = vst [vmem:[#allocation2 + $0x598] sm:$0xf] %v2137_v51  ;;  %3185 = vst [vmem:[#allocation2 + $0x188] sm:$0xff] %v2374_v52 }
 0x16e   :  { %v4405_v58 = vmax.f32 %v4341_v47, 0.0  ;;  %v4407_v59 = vmax.f32 %v4343_v48, 0.0  ;;  %v3763_v60 = vld [vmem:[#allocation2 + $0x368] sm:$0xf]  ;;  %v4018_v61 = vrot.slane %v10879_v44, 4  ;;  %v4406_v63 = vmax.f32 %v4342_v54, 0.0  ;;  %9722 = vmatmul.mubr.msk.f32.gmra.mrb[150].mxu0 %vm4699_vm3, %v10754_v29  ;;  %9727 = vmatmul.mubr.msk.f32.gmra.mrb[158].mxu1 %vm4699_vm3, %v10754_v29 }
 0x16f   :  { %v3701_v1 = vadd.f32 %v3573_v57, %v3381_v56  ;;  %v4021_v5 = vrot.slane %v10887_v50, 4  ;;  %v10894_v6 = vld [vmem:[#allocation2 + $0x158] sm:$0xf0]  ;;  %v2289_v7 = vpop.f32.mrb[70].mxu1  ;;  %v2378_v8 = vpop.f32.mrb[70].mxu0  ;;  %6404 = vmatprep.mubr.f32.mxu0 %v9906_v2  ;;  %6487 = vmatprep.mubr.f32.mxu1 %v9906_v2  ;;  %v3827_v22 = vadd.f32 %v3763_v60, %v3699_v55 }
 0x170   :  { %v4515_v10 = vcombine.low %v4404_v53, %v4405_v58  ;;  %v9829_v11 = vcombine.low %v4405_v58, %v4405_v58  ;;  %v9830_v12 = vcombine.low %v4407_v59, %v4407_v59  ;;  %v3891_v14 = vld [vmem:[#allocation2 + $0x370] sm:$0xf0]  ;;  %v3764_v15 = vld [vmem:[#allocation2 + $0x370] sm:$0xf]  ;;  %3182 = vst [vmem:[#allocation2 + $0x170] sm:$0xff] %v2289_v7  ;;  %v2291_v4 = vpop.f32.mrb[71].mxu1  ;;  %v4516_v20 = vcombine.low %v4406_v63, %v4407_v59 }
 0x171   :  { %3252 = vst [vmem:[#allocation2 + $0x3a0] sm:$0xff] %v2378_v8  ;;  %v2380_v21 = vpop.f32.mrb[71].mxu0  ;;  %v4019_v23 = vrot.slane %v3891_v14, 4  ;;  %v3765_v3 = vld [vmem:[#allocation2 + $0x378] sm:$0xf]  ;;  %v3828_v24 = vadd.f32 %v3764_v15, %v3700_v62  ;;  %3183 = vst [vmem:[#allocation2 + $0x178] sm:$0xff] %v2291_v4  ;;  %v4146_v28 = vadd.f32 %v4018_v61, %v3826_v18 }
 0x172   :  { %9728 = vmatprep.subr.msk.mxu0 %vm4709_vm2, %v9829_v11  ;;  %9733 = vmatprep.subr.msk.mxu1 %vm4709_vm2, %v9830_v12  ;;  %3253 = vst [vmem:[#allocation2 + $0x3a8] sm:$0xff] %v2380_v21  ;;  %v3829_v25 = vadd.f32 %v3765_v3, %v3701_v1  ;;  %v3892_v26 = vld [vmem:[#allocation2 + $0x378] sm:$0xf0]  ;;  %v3447_v27 = vld [vmem:[#allocation2 + $0x160] sm:$0xf0]  ;;  %v3574_v32 = vrot.slane %v10894_v6, 4 }
 0x173   :  { %9729 = vmatpush1.msk.msra.mxu0 %vm4709_vm2, %v4515_v10  ;;  %9734 = vmatpush1.msk.msra.mxu1 %vm4709_vm2, %v4516_v20  ;;  %v4147_v9 = vadd.f32 %v4019_v23, %v3827_v22  ;;  %v4020_v30 = vrot.slane %v3892_v26, 4  ;;  %v4213_v31 = vld [vmem:[#allocation2 + $0x5a8] sm:$0xf]  ;;  %v3448_v19 = vld [vmem:[#allocation2 + $0x168] sm:$0xf0]  ;;  %v2295_v33 = vpop.f32.mrb[72].mxu1 }
 0x174   :  { %9730 = vmatmul.mubr.msk.f32.vlgmr.msra.gmra.mrb[152].mxu0 %vm4699_vm3, %v10720_v42  ;;  %9735 = vmatmul.mubr.msk.f32.vlgmr.msra.gmra.mrb[160].mxu1 %vm4699_vm3, %v10720_v42  ;;  %v2384_v34 = vpop.f32.mrb[72].mxu0  ;;  %v4210_v35 = vld [vmem:[#allocation2 + $0x590] sm:$0xf]  ;;  %v4149_v36 = vadd.f32 %v4021_v5, %v3829_v25  ;;  %v4212_v37 = vld [vmem:[#allocation2 + $0x5a0] sm:$0xf]  ;;  %3250 = vst [vmem:[#allocation2 + $0x390] sm:$0xff] %v2295_v33 }
 0x175   :  { %v2297_v38 = vpop.f32.mrb[73].mxu1  ;;  %6410 = vmatprep.mubr.f32.mxu0 %v9906_v2  ;;  %6493 = vmatprep.mubr.f32.mxu1 %v9906_v2  ;;  %3320 = vst [vmem:[#allocation2 + $0x5c0] sm:$0xf] %v2384_v34  ;;  %v2386_v39 = vpop.f32.mrb[73].mxu0  ;;  %v4211_v40 = vld [vmem:[#allocation2 + $0x598] sm:$0xf]  ;;  %v4274_v41 = vadd.f32 %v4210_v35, %v4146_v28  ;;  %v4148_v43 = vadd.f32 %v4020_v30, %v3828_v24 }
 0x176   :  { %v3575_v44 = vrot.slane %v3447_v27, 4  ;;  %3251 = vst [vmem:[#allocation2 + $0x398] sm:$0xff] %v2297_v38  ;;  %3321 = vst [vmem:[#allocation2 + $0x5c8] sm:$0xf] %v2386_v39  ;;  %v4275_v45 = vadd.f32 %v4211_v40, %v4147_v9  ;;  %v4277_v42 = vadd.f32 %v4213_v31, %v4149_v36  ;;  %v3382_v17 = vld [vmem:[#allocation2 + $0x150] sm:$0xf] }
 0x177   :  { %v3383_v46 = vld [vmem:[#allocation2 + $0x158] sm:$0xf]  ;;  %v3576_v47 = vrot.slane %v3448_v19, 4  ;;  %v4344_v48 = vadd.f32 %v10586_v16, %v4274_v41  ;;  %v4276_v49 = vadd.f32 %v4212_v37, %v4148_v43  ;;  %v3702_v50 = vadd.f32 %v3574_v32, %v3382_v17  ;;  %v3766_v51 = vld [vmem:[#allocation2 + $0x380] sm:$0xf]  ;;  %v2301_v54 = vpop.f32.mrb[74].mxu1 }
 0x178   :  { %v10914_v52 = vld [vmem:[#allocation2 + $0x388] sm:$0xf0]  ;;  %v3384_v53 = vld [vmem:[#allocation2 + $0x160] sm:$0xf]  ;;  %9731 = vmatmul.mubr.msk.f32.gmra.mrb[154].mxu0 %vm4699_vm3, %v10734_v0  ;;  %9736 = vmatmul.mubr.msk.f32.gmra.mrb[162].mxu1 %vm4699_vm3, %v10734_v0  ;;  %v2538_v55 = vpop.f32.mrb[74].mxu0  ;;  %v4345_v56 = vadd.f32 %v10586_v16, %v4275_v45  ;;  %v4347_v57 = vadd.f32 %v10586_v16, %v4277_v42  ;;  %v2303_v60 = vpop.f32.mrb[75].mxu1  ;;  %v3703_v0 = vadd.f32 %v3575_v44, %v3383_v46 }
 0x179   :  { %v3449_v58 = vld [vmem:[#allocation2 + $0x170] sm:$0xf0]  ;;  %v10922_v59 = vld [vmem:[#allocation2 + $0x3a0] sm:$0xf0]  ;;  %3318 = vst [vmem:[#allocation2 + $0x5b0] sm:$0xf] %v2301_v54  ;;  %6416 = vmatprep.mubr.f32.mxu0 %v9906_v2  ;;  %6499 = vmatprep.mubr.f32.mxu1 %v9906_v2  ;;  %v4346_v63 = vadd.f32 %v10586_v16, %v4276_v49  ;;  %v3704_v10 = vadd.f32 %v3576_v47, %v3384_v53 }
 0x17a   :  { %3188 = vst [vmem:[#allocation2 + $0x1a0] sm:$0xff] %v2538_v55  ;;  %v2540_v61 = vpop.f32.mrb[75].mxu0  ;;  %v4408_v62 = vmax.f32 %v4344_v48, 0.0  ;;  %v3385_v18 = vld [vmem:[#allocation2 + $0x168] sm:$0xf]  ;;  %v3577_v1 = vrot.slane %v3449_v58, 4  ;;  %v3830_v12 = vadd.f32 %v3766_v51, %v3702_v50 }
 0x17b   :  { %3319 = vst [vmem:[#allocation2 + $0x5b8] sm:$0xf] %v2303_v60  ;;  %3189 = vst [vmem:[#allocation2 + $0x1a8] sm:$0xff] %v2540_v61  ;;  %v4409_v5 = vmax.f32 %v4345_v56, 0.0  ;;  %v4411_v6 = vmax.f32 %v4347_v57, 0.0  ;;  %v4022_v8 = vrot.slane %v10914_v52, 4 }
 0x17c   :  { %v3767_v7 = vld [vmem:[#allocation2 + $0x388] sm:$0xf]  ;;  %v4410_v11 = vmax.f32 %v4346_v63, 0.0  ;;  %v3705_v14 = vadd.f32 %v3577_v1, %v3385_v18  ;;  %v4025_v15 = vrot.slane %v10922_v59, 4  ;;  %v10929_v4 = vld [vmem:[#allocation2 + $0x178] sm:$0xf0]  ;;  %9732 = vmatmul.mubr.msk.f32.gmra.mrb[156].mxu0 %vm4699_vm3, %v10754_v29  ;;  %9737 = vmatmul.mubr.msk.f32.gmra.mrb[164].mxu1 %vm4699_vm3, %v10754_v29 }
 0x17d   :  { %v2455_v20 = vpop.f32.mrb[76].mxu1  ;;  %v2544_v21 = vpop.f32.mrb[76].mxu0  ;;  %v4517_v22 = vcombine.low %v4408_v62, %v4409_v5  ;;  %v9831_v23 = vcombine.low %v4409_v5, %v4409_v5  ;;  %v9832_v3 = vcombine.low %v4411_v6, %v4411_v6  ;;  %v3895_v24 = vld [vmem:[#allocation2 + $0x390] sm:$0xf0]  ;;  %v3768_v25 = vld [vmem:[#allocation2 + $0x390] sm:$0xf]  ;;  %6570 = vmatprep.mubr.f32.mxu0 %v9906_v2  ;;  %6653 = vmatprep.mubr.f32.mxu1 %v9906_v2 }
 0x17e   :  { %3186 = vst [vmem:[#allocation2 + $0x190] sm:$0xff] %v2455_v20  ;;  %v2457_v26 = vpop.f32.mrb[77].mxu1  ;;  %3256 = vst [vmem:[#allocation2 + $0x3c0] sm:$0xff] %v2544_v21  ;;  %v4518_v27 = vcombine.low %v4410_v11, %v4411_v6  ;;  %v2546_v28 = vpop.f32.mrb[77].mxu0  ;;  %v3831_v9 = vadd.f32 %v3767_v7, %v3703_v0  ;;  %v4023_v30 = vrot.slane %v3895_v24, 4  ;;  %v3832_v32 = vadd.f32 %v3768_v25, %v3704_v10  ;;  %v10945_v41 = vld [vmem:[%s11390_s3] sm:$0xff] }
 0x17f   :  { %v3769_v31 = vld [vmem:[#allocation2 + $0x398] sm:$0xf]  ;;  %3187 = vst [vmem:[#allocation2 + $0x198] sm:$0xff] %v2457_v26  ;;  %9738 = vmatprep.subr.msk.mxu0 %vm4709_vm2, %v9831_v23  ;;  %9743 = vmatprep.subr.msk.mxu1 %vm4709_vm2, %v9832_v3  ;;  %3257 = vst [vmem:[#allocation2 + $0x3c8] sm:$0xff] %v2546_v28  ;;  %v3896_v19 = vld [vmem:[#allocation2 + $0x398] sm:$0xf0]  ;;  %v4150_v34 = vadd.f32 %v4022_v8, %v3830_v12 }
 0x180   :  { %v3833_v29 = vadd.f32 %v3769_v31, %v3705_v14  ;;  %v3451_v33 = vld [vmem:[#allocation2 + $0x180] sm:$0xf0]  ;;  %9739 = vmatpush1.msk.msra.mxu0 %vm4709_vm2, %v4517_v22  ;;  %9744 = vmatpush1.msk.msra.mxu1 %vm4709_vm2, %v4518_v27  ;;  %v4151_v35 = vadd.f32 %v4023_v30, %v3831_v9  ;;  %v4024_v36 = vrot.slane %v3896_v19, 4  ;;  %v4217_v37 = vld [vmem:[#allocation2 + $0x5c8] sm:$0xf]  ;;  %v3578_v38 = vrot.slane %v10929_v4, 4 }
 0x181   :  { %v3452_v39 = vld [vmem:[#allocation2 + $0x188] sm:$0xf0]  ;;  %v2461_v40 = vpop.f32.mrb[78].mxu1  ;;  %9740 = vmatmul.mubr.msk.f32.vlgmr.msra.gmra.mrb[158].mxu0 %vm4699_vm3, %v10945_v41  ;;  %9745 = vmatmul.mubr.msk.f32.vlgmr.msra.gmra.mrb[166].mxu1 %vm4699_vm3, %v10945_v41  ;;  %v2550_v43 = vpop.f32.mrb[78].mxu0  ;;  %v4214_v44 = vld [vmem:[#allocation2 + $0x5b0] sm:$0xf] }
 0x182   :  { %v4153_v45 = vadd.f32 %v4025_v15, %v3833_v29  ;;  %v4216_v42 = vld [vmem:[#allocation2 + $0x5c0] sm:$0xf]  ;;  %3254 = vst [vmem:[#allocation2 + $0x3b0] sm:$0xff] %v2461_v40  ;;  %v2463_v17 = vpop.f32.mrb[79].mxu1  ;;  %6576 = vmatprep.mubr.f32.mxu0 %v9906_v2  ;;  %6659 = vmatprep.mubr.f32.mxu1 %v9906_v2  ;;  %3324 = vst [vmem:[#allocation2 + $0x5e0] sm:$0xf] %v2550_v43  ;;  %v4278_v48 = vadd.f32 %v4214_v44, %v4150_v34 }
 0x183   :  { %v2552_v46 = vpop.f32.mrb[79].mxu0  ;;  %v4215_v47 = vld [vmem:[#allocation2 + $0x5b8] sm:$0xf]  ;;  %v4152_v49 = vadd.f32 %v4024_v36, %v3832_v32  ;;  %v3579_v50 = vrot.slane %v3451_v33, 4  ;;  %3255 = vst [vmem:[#allocation2 + $0x3b8] sm:$0xff] %v2463_v17  ;;  %v3580_v55 = vrot.slane %v3452_v39, 4 }
 0x184   :  { %3325 = vst [vmem:[#allocation2 + $0x5e8] sm:$0xf] %v2552_v46  ;;  %v4279_v51 = vadd.f32 %v4215_v47, %v4151_v35  ;;  %v4281_v52 = vadd.f32 %v4217_v37, %v4153_v45  ;;  %v3386_v53 = vld [vmem:[#allocation2 + $0x170] sm:$0xf]  ;;  %v3387_v54 = vld [vmem:[#allocation2 + $0x178] sm:$0xf]  ;;  %v4348_v56 = vadd.f32 %v10586_v16, %v4278_v48 }
 0x185   :  { %v4280_v57 = vadd.f32 %v4216_v42, %v4152_v49  ;;  %v3706_v58 = vadd.f32 %v3578_v38, %v3386_v53  ;;  %v3770_v59 = vld [vmem:[#allocation2 + $0x3a0] sm:$0xf]  ;;  %v10954_v60 = vld [vmem:[#allocation2 + $0x3a8] sm:$0xf0]  ;;  %v2467_v62 = vpop.f32.mrb[80].mxu1  ;;  %v2704_v0 = vpop.f32.mrb[80].mxu0  ;;  %v3707_v12 = vadd.f32 %v3579_v50, %v3387_v54 }
 0x186   :  { %v3388_v61 = vld [vmem:[#allocation2 + $0x180] sm:$0xf]  ;;  %v10959_v63 = vld [vmem:[%s11390_s3 + $0x8] sm:$0xff]  ;;  %v4349_v18 = vadd.f32 %v10586_v16, %v4279_v51  ;;  %v4351_v1 = vadd.f32 %v10586_v16, %v4281_v52  ;;  %v3453_v5 = vld [vmem:[#allocation2 + $0x190] sm:$0xf0]  ;;  %v2469_v7 = vpop.f32.mrb[81].mxu1 }
 0x187   :  { %9741 = vmatmul.mubr.msk.f32.gmra.mrb[160].mxu0 %vm4699_vm3, %v10959_v63  ;;  %9746 = vmatmul.mubr.msk.f32.gmra.mrb[168].mxu1 %vm4699_vm3, %v10959_v63  ;;  %v10967_v6 = vld [vmem:[#allocation2 + $0x3c0] sm:$0xf0]  ;;  %3322 = vst [vmem:[#allocation2 + $0x5d0] sm:$0xf] %v2467_v62  ;;  %3192 = vst [vmem:[#allocation2 + $0x1c0] sm:$0xff] %v2704_v0  ;;  %v2706_v8 = vpop.f32.mrb[81].mxu0  ;;  %v4350_v11 = vadd.f32 %v10586_v16, %v4280_v57  ;;  %v3708_v23 = vadd.f32 %v3580_v55, %v3388_v61 }
 0x188   :  { %6582 = vmatprep.mubr.f32.mxu0 %v9906_v2  ;;  %6665 = vmatprep.mubr.f32.mxu1 %v9906_v2  ;;  %v4412_v10 = vmax.f32 %v4348_v56, 0.0  ;;  %v3389_v14 = vld [vmem:[#allocation2 + $0x188] sm:$0xf]  ;;  %v3581_v15 = vrot.slane %v3453_v5, 4  ;;  %3323 = vst [vmem:[#allocation2 + $0x5d8] sm:$0xf] %v2469_v7  ;;  %v3834_v24 = vadd.f32 %v3770_v59, %v3706_v58 }
 0x189   :  { %3193 = vst [vmem:[#allocation2 + $0x1c8] sm:$0xff] %v2706_v8  ;;  %v4413_v4 = vmax.f32 %v4349_v18, 0.0  ;;  %v4415_v20 = vmax.f32 %v4351_v1, 0.0  ;;  %v3771_v21 = vld [vmem:[#allocation2 + $0x3a8] sm:$0xf]  ;;  %v4026_v22 = vrot.slane %v10954_v60, 4 }
 0x18a   :  { %v4414_v3 = vmax.f32 %v4350_v11, 0.0  ;;  %v3709_v25 = vadd.f32 %v3581_v15, %v3389_v14  ;;  %v4029_v26 = vrot.slane %v10967_v6, 4  ;;  %v10974_v27 = vld [vmem:[#allocation2 + $0x198] sm:$0xf0]  ;;  %v2621_v28 = vpop.f32.mrb[82].mxu1  ;;  %v2710_v30 = vpop.f32.mrb[82].mxu0  ;;  %v3835_v37 = vadd.f32 %v3771_v21, %v3707_v12 }
 0x18b   :  { %v10979_v9 = vld [vmem:[%s11390_s3 + $0x10] sm:$0xf]  ;;  %v4519_v31 = vcombine.low %v4412_v10, %v4413_v4  ;;  %v9833_v32 = vcombine.low %v4413_v4, %v4413_v4  ;;  %v9834_v29 = vcombine.low %v4415_v20, %v4415_v20  ;;  %v3899_v19 = vld [vmem:[#allocation2 + $0x3b0] sm:$0xf0]  ;;  %3190 = vst [vmem:[#allocation2 + $0x1b0] sm:$0xff] %v2621_v28  ;;  %v2623_v34 = vpop.f32.mrb[83].mxu1  ;;  %v4154_v42 = vadd.f32 %v4026_v22, %v3834_v24 }
 0x18c   :  { %9742 = vmatmul.mubr.msk.f32.gmra.mrb[162].mxu0 %vm4699_vm3, %v10979_v9  ;;  %9747 = vmatmul.mubr.msk.f32.gmra.mrb[170].mxu1 %vm4699_vm3, %v10979_v9  ;;  %v3772_v33 = vld [vmem:[#allocation2 + $0x3b0] sm:$0xf]  ;;  %3260 = vst [vmem:[#allocation2 + $0x3e0] sm:$0xff] %v2710_v30  ;;  %v4520_v35 = vcombine.low %v4414_v3, %v4415_v20  ;;  %v2712_v36 = vpop.f32.mrb[83].mxu0  ;;  %v4027_v38 = vrot.slane %v3899_v19, 4  ;;  %3191 = vst [vmem:[#allocation2 + $0x1b8] sm:$0xff] %v2623_v34 }
 0x18d   :  { %6736 = vmatprep.mubr.f32.mxu0 %v9906_v2  ;;  %6819 = vmatprep.mubr.f32.mxu1 %v9906_v2  ;;  %v3773_v39 = vld [vmem:[#allocation2 + $0x3b8] sm:$0xf]  ;;  %v3836_v40 = vadd.f32 %v3772_v33, %v3708_v23  ;;  %3261 = vst [vmem:[#allocation2 + $0x3e8] sm:$0xff] %v2712_v36  ;;  %v3900_v44 = vld [vmem:[#allocation2 + $0x3b8] sm:$0xf0]  ;;  %v3582_v48 = vrot.slane %v10974_v27, 4 }
 0x18e   :  { %9748 = vmatprep.subr.msk.mxu0 %vm4709_vm2, %v9833_v32  ;;  %9753 = vmatprep.subr.msk.mxu1 %vm4709_vm2, %v9834_v29  ;;  %v3837_v43 = vadd.f32 %v3773_v39, %v3709_v25  ;;  %v3455_v45 = vld [vmem:[#allocation2 + $0x1a0] sm:$0xf0]  ;;  %v4155_v17 = vadd.f32 %v4027_v38, %v3835_v37  ;;  %v4028_v46 = vrot.slane %v3900_v44, 4  ;;  %v4221_v47 = vld [vmem:[#allocation2 + $0x5e8] sm:$0xf]  ;;  %v2627_v50 = vpop.f32.mrb[84].mxu1 }
 0x18f   :  { %9749 = vmatpush1.msk.msra.mxu0 %vm4709_vm2, %v4519_v31  ;;  %9754 = vmatpush1.msk.msra.mxu1 %vm4709_vm2, %v4520_v35  ;;  %v3456_v49 = vld [vmem:[#allocation2 + $0x1a8] sm:$0xf0]  ;;  %v2716_v51 = vpop.f32.mrb[84].mxu0  ;;  %v4218_v52 = vld [vmem:[#allocation2 + $0x5d0] sm:$0xf]  ;;  %3258 = vst [vmem:[#allocation2 + $0x3d0] sm:$0xff] %v2627_v50 }
 0x190   :  { %9750 = vmatmul.mubr.msk.f32.vlgmr.msra.gmra.mrb[164].mxu0 %vm4699_vm3, %v10945_v41  ;;  %9755 = vmatmul.mubr.msk.f32.vlgmr.msra.gmra.mrb[172].mxu1 %vm4699_vm3, %v10945_v41  ;;  %v4157_v53 = vadd.f32 %v4029_v26, %v3837_v43  ;;  %v4220_v54 = vld [vmem:[#allocation2 + $0x5e0] sm:$0xf]  ;;  %v2629_v55 = vpop.f32.mrb[85].mxu1  ;;  %3328 = vst [vmem:[#allocation2 + $0x600] sm:$0xf] %v2716_v51  ;;  %v2718_v56 = vpop.f32.mrb[85].mxu0  ;;  %v4282_v58 = vadd.f32 %v4218_v52, %v4154_v42 }
 0x191   :  { %6742 = vmatprep.mubr.f32.mxu0 %v9906_v2  ;;  %6825 = vmatprep.mubr.f32.mxu1 %v9906_v2  ;;  %v4219_v57 = vld [vmem:[#allocation2 + $0x5d8] sm:$0xf]  ;;  %v4156_v59 = vadd.f32 %v4028_v46, %v3836_v40  ;;  %v3583_v60 = vrot.slane %v3455_v45, 4  ;;  %3259 = vst [vmem:[#allocation2 + $0x3d8] sm:$0xff] %v2629_v55  ;;  %3329 = vst [vmem:[#allocation2 + $0x608] sm:$0xf] %v2718_v56 }
 0x192   :  { %v4283_v61 = vadd.f32 %v4219_v57, %v4155_v17  ;;  %v4285_v62 = vadd.f32 %v4221_v47, %v4157_v53  ;;  %v3390_v0 = vld [vmem:[#allocation2 + $0x190] sm:$0xf]  ;;  %v3391_v18 = vld [vmem:[#allocation2 + $0x198] sm:$0xf]  ;;  %v3584_v1 = vrot.slane %v3456_v49, 4  ;;  %v4352_v5 = vadd.f32 %v10586_v16, %v4282_v58  ;;  %v2633_v12 = vpop.f32.mrb[86].mxu1 }
 0x193   :  { %v4284_v6 = vadd.f32 %v4220_v54, %v4156_v59  ;;  %v3710_v7 = vadd.f32 %v3582_v48, %v3390_v0  ;;  %v3774_v8 = vld [vmem:[#allocation2 + $0x3c0] sm:$0xf]  ;;  %v10999_v10 = vld [vmem:[#allocation2 + $0x3c8] sm:$0xf0]  ;;  %v2870_v14 = vpop.f32.mrb[86].mxu0  ;;  %v2635_v22 = vpop.f32.mrb[87].mxu1  ;;  %v3711_v25 = vadd.f32 %v3583_v60, %v3391_v18 }
 0x194   :  { %v3392_v11 = vld [vmem:[#allocation2 + $0x1a0] sm:$0xf]  ;;  %9751 = vmatmul.mubr.msk.f32.gmra.mrb[166].mxu0 %vm4699_vm3, %v10959_v63  ;;  %9756 = vmatmul.mubr.msk.f32.gmra.mrb[174].mxu1 %vm4699_vm3, %v10959_v63  ;;  %v4353_v15 = vadd.f32 %v10586_v16, %v4283_v61  ;;  %v4355_v4 = vadd.f32 %v10586_v16, %v4285_v62  ;;  %v3457_v20 = vld [vmem:[#allocation2 + $0x1b0] sm:$0xf0]  ;;  %v11007_v21 = vld [vmem:[#allocation2 + $0x3e0] sm:$0xf0] }
 0x195   :  { %3326 = vst [vmem:[#allocation2 + $0x5f0] sm:$0xf] %v2633_v12  ;;  %3196 = vst [vmem:[#allocation2 + $0x1e0] sm:$0xff] %v2870_v14  ;;  %6748 = vmatprep.mubr.f32.mxu0 %v9906_v2  ;;  %6831 = vmatprep.mubr.f32.mxu1 %v9906_v2  ;;  %v2872_v23 = vpop.f32.mrb[87].mxu0  ;;  %v4416_v3 = vmax.f32 %v4352_v5, 0.0  ;;  %v4354_v24 = vadd.f32 %v10586_v16, %v4284_v6  ;;  %v3585_v27 = vrot.slane %v3457_v20, 4 }
 0x196   :  { %v3393_v26 = vld [vmem:[#allocation2 + $0x1a8] sm:$0xf]  ;;  %3327 = vst [vmem:[#allocation2 + $0x5f8] sm:$0xf] %v2635_v22  ;;  %3197 = vst [vmem:[#allocation2 + $0x1e8] sm:$0xff] %v2872_v23  ;;  %v4417_v28 = vmax.f32 %v4353_v15, 0.0  ;;  %v3712_v29 = vadd.f32 %v3584_v1, %v3392_v11  ;;  %v3838_v33 = vadd.f32 %v3774_v8, %v3710_v7 }
 0x197   :  { %v4419_v30 = vmax.f32 %v4355_v4, 0.0  ;;  %v3775_v31 = vld [vmem:[#allocation2 + $0x3c8] sm:$0xf]  ;;  %v4030_v32 = vrot.slane %v10999_v10, 4  ;;  %v4418_v19 = vmax.f32 %v4354_v24, 0.0  ;;  %v3713_v34 = vadd.f32 %v3585_v27, %v3393_v26  ;;  %v2787_v37 = vpop.f32.mrb[88].mxu1 }
 0x198   :  { %v4033_v35 = vrot.slane %v11007_v21, 4  ;;  %v11014_v36 = vld [vmem:[#allocation2 + $0x1b8] sm:$0xf0]  ;;  %9752 = vmatmul.mubr.msk.f32.gmra.mrb[168].mxu0 %vm4699_vm3, %v10979_v9  ;;  %9757 = vmatmul.mubr.msk.f32.gmra.mrb[176].mxu1 %vm4699_vm3, %v10979_v9  ;;  %v2876_v38 = vpop.f32.mrb[88].mxu0  ;;  %v4521_v39 = vcombine.low %v4416_v3, %v4417_v28  ;;  %v9835_v40 = vcombine.low %v4417_v28, %v4417_v28  ;;  %v3903_v44 = vld [vmem:[#allocation2 + $0x3d0] sm:$0xf0]  ;;  %v3839_v47 = vadd.f32 %v3775_v31, %v3711_v25 }
 0x199   :  { %v9836_v43 = vcombine.low %v4419_v30, %v4419_v30  ;;  %v3776_v45 = vld [vmem:[#allocation2 + $0x3d0] sm:$0xf]  ;;  %3194 = vst [vmem:[#allocation2 + $0x1d0] sm:$0xff] %v2787_v37  ;;  %v2789_v42 = vpop.f32.mrb[89].mxu1  ;;  %3264 = vst [vmem:[#allocation2 + $0x400] sm:$0xff] %v2876_v38  ;;  %v4522_v17 = vcombine.low %v4418_v19, %v4419_v30  ;;  %v2878_v46 = vpop.f32.mrb[89].mxu0  ;;  %6902 = vmatprep.mubr.f32.mxu0 %v9906_v2  ;;  %6985 = vmatprep.mubr.f32.mxu1 %v9906_v2 }
 0x19a   :  { %v4031_v48 = vrot.slane %v3903_v44, 4  ;;  %v3777_v49 = vld [vmem:[#allocation2 + $0x3d8] sm:$0xf]  ;;  %v3840_v50 = vadd.f32 %v3776_v45, %v3712_v29  ;;  %3195 = vst [vmem:[#allocation2 + $0x1d8] sm:$0xff] %v2789_v42  ;;  %9758 = vmatprep.subr.msk.mxu0 %vm4709_vm2, %v9835_v40  ;;  %3265 = vst [vmem:[#allocation2 + $0x408] sm:$0xff] %v2878_v46  ;;  %v4158_v54 = vadd.f32 %v4030_v32, %v3838_v33  ;;  %v3586_v58 = vrot.slane %v11014_v36, 4 }
 0x19b   :  { %9763 = vmatprep.subr.msk.mxu1 %vm4709_vm2, %v9836_v43  ;;  %v3841_v51 = vadd.f32 %v3777_v49, %v3713_v34  ;;  %v3904_v52 = vld [vmem:[#allocation2 + $0x3d8] sm:$0xf0]  ;;  %v3459_v53 = vld [vmem:[#allocation2 + $0x1c0] sm:$0xf0]  ;;  %9759 = vmatpush1.msk.msra.mxu0 %vm4709_vm2, %v4521_v39  ;;  %v4225_v57 = vld [vmem:[#allocation2 + $0x608] sm:$0xf] }
 0x19c   :  { %9764 = vmatpush1.msk.msra.mxu1 %vm4709_vm2, %v4522_v17  ;;  %v4159_v55 = vadd.f32 %v4031_v48, %v3839_v47  ;;  %v4032_v56 = vrot.slane %v3904_v52, 4  ;;  %v3460_v59 = vld [vmem:[#allocation2 + $0x1c8] sm:$0xf0]  ;;  %v2793_v60 = vpop.f32.mrb[90].mxu1  ;;  %9760 = vmatmul.mubr.msk.f32.vlgmr.msra.gmra.mrb[170].mxu0 %vm4699_vm3, %v10945_v41  ;;  %v2882_v61 = vpop.f32.mrb[90].mxu0  ;;  %v3587_v10 = vrot.slane %v3459_v53, 4 }
 0x19d   :  { %9765 = vmatmul.mubr.msk.f32.vlgmr.msra.gmra.mrb[178].mxu1 %vm4699_vm3, %v10945_v41  ;;  %v4222_v62 = vld [vmem:[#allocation2 + $0x5f0] sm:$0xf]  ;;  %v4161_v0 = vadd.f32 %v4033_v35, %v3841_v51  ;;  %v4224_v18 = vld [vmem:[#allocation2 + $0x600] sm:$0xf]  ;;  %3262 = vst [vmem:[#allocation2 + $0x3f0] sm:$0xff] %v2793_v60  ;;  %v2795_v1 = vpop.f32.mrb[91].mxu1  ;;  %6908 = vmatprep.mubr.f32.mxu0 %v9906_v2 }
 0x19e   :  { %6991 = vmatprep.mubr.f32.mxu1 %v9906_v2  ;;  %3332 = vst [vmem:[#allocation2 + $0x620] sm:$0xf] %v2882_v61  ;;  %v2884_v5 = vpop.f32.mrb[91].mxu0  ;;  %v4223_v6 = vld [vmem:[#allocation2 + $0x5f8] sm:$0xf]  ;;  %v4286_v7 = vadd.f32 %v4222_v62, %v4158_v54  ;;  %v4160_v8 = vadd.f32 %v4032_v56, %v3840_v50  ;;  %3263 = vst [vmem:[#allocation2 + $0x3f8] sm:$0xff] %v2795_v1 }
 0x19f   :  { %3333 = vst [vmem:[#allocation2 + $0x628] sm:$0xf] %v2884_v5  ;;  %v4287_v11 = vadd.f32 %v4223_v6, %v4159_v55  ;;  %v4289_v12 = vadd.f32 %v4225_v57, %v4161_v0  ;;  %v3394_v14 = vld [vmem:[#allocation2 + $0x1b0] sm:$0xf]  ;;  %v3395_v15 = vld [vmem:[#allocation2 + $0x1b8] sm:$0xf] }
 0x1a0   :  { %v3588_v4 = vrot.slane %v3460_v59, 4  ;;  %v4356_v20 = vadd.f32 %v10586_v16, %v4286_v7  ;;  %v4288_v21 = vadd.f32 %v4224_v18, %v4160_v8  ;;  %v3714_v22 = vadd.f32 %v3586_v58, %v3394_v14  ;;  %v3778_v23 = vld [vmem:[#allocation2 + $0x3e0] sm:$0xf]  ;;  %v3906_v3 = vld [vmem:[#allocation2 + $0x3e8] sm:$0xf0]  ;;  %v2799_v25 = vpop.f32.mrb[92].mxu1  ;;  %9761 = vmatmul.mubr.msk.f32.gmra.mrb[172].mxu0 %vm4699_vm3, %v10959_v63 }
 0x1a1   :  { %v3396_v24 = vld [vmem:[#allocation2 + $0x1c0] sm:$0xf]  ;;  %9766 = vmatmul.mubr.msk.f32.gmra.mrb[180].mxu1 %vm4699_vm3, %v10959_v63  ;;  %v3036_v26 = vpop.f32.mrb[92].mxu0  ;;  %v4357_v27 = vadd.f32 %v10586_v16, %v4287_v11  ;;  %v4359_v28 = vadd.f32 %v10586_v16, %v4289_v12  ;;  %v3461_v30 = vld [vmem:[#allocation2 + $0x1d0] sm:$0xf0]  ;;  %v2801_v32 = vpop.f32.mrb[93].mxu1  ;;  %6914 = vmatprep.mubr.f32.mxu0 %v9906_v2  ;;  %v3715_v34 = vadd.f32 %v3587_v10, %v3395_v15 }
 0x1a2   :  { %v11040_v31 = vld [vmem:[#allocation2 + $0x400] sm:$0xf0]  ;;  %3330 = vst [vmem:[#allocation2 + $0x610] sm:$0xf] %v2799_v25  ;;  %3200 = vst [vmem:[#allocation2 + $0x200] sm:$0xff] %v3036_v26  ;;  %6997 = vmatprep.mubr.f32.mxu1 %v9906_v2  ;;  %v3038_v29 = vpop.f32.mrb[93].mxu0  ;;  %v4358_v33 = vadd.f32 %v10586_v16, %v4288_v21  ;;  %v3716_v43 = vadd.f32 %v3588_v4, %v3396_v24  ;;  %v3842_v45 = vadd.f32 %v3778_v23, %v3714_v22 }
 0x1a3   :  { %v4420_v19 = vmax.f32 %v4356_v20, 0.0  ;;  %v3397_v35 = vld [vmem:[#allocation2 + $0x1c8] sm:$0xf]  ;;  %v3589_v36 = vrot.slane %v3461_v30, 4  ;;  %3331 = vst [vmem:[#allocation2 + $0x618] sm:$0xf] %v2801_v32 }
 0x1a4   :  { %v4421_v37 = vmax.f32 %v4357_v27, 0.0  ;;  %v4423_v38 = vmax.f32 %v4359_v28, 0.0  ;;  %v3779_v39 = vld [vmem:[#allocation2 + $0x3e8] sm:$0xf]  ;;  %v4034_v40 = vrot.slane %v3906_v3, 4  ;;  %v4422_v44 = vmax.f32 %v4358_v33, 0.0  ;;  %9762 = vmatmul.mubr.msk.f32.gmra.mrb[174].mxu0 %vm4699_vm3, %v10979_v9 }
 0x1a5   :  { %v3717_v42 = vadd.f32 %v3589_v36, %v3397_v35  ;;  %v4037_v17 = vrot.slane %v11040_v31, 4  ;;  %v11046_v46 = vld [vmem:[#allocation2 + $0x1d8] sm:$0xf0]  ;;  %v2953_v47 = vpop.f32.mrb[94].mxu1  ;;  %9767 = vmatmul.mubr.msk.f32.gmra.mrb[182].mxu1 %vm4699_vm3, %v10979_v9  ;;  %v3042_v48 = vpop.f32.mrb[94].mxu0  ;;  %7068 = vmatprep.mubr.f32.mxu0 %v9906_v2  ;;  %v3843_v57 = vadd.f32 %v3779_v39, %v3715_v34 }
 0x1a6   :  { %v4523_v49 = vcombine.low %v4420_v19, %v4421_v37  ;;  %v9837_v50 = vcombine.low %v4421_v37, %v4421_v37  ;;  %v9838_v51 = vcombine.low %v4423_v38, %v4423_v38  ;;  %v3907_v52 = vld [vmem:[#allocation2 + $0x3f0] sm:$0xf0]  ;;  %v3780_v53 = vld [vmem:[#allocation2 + $0x3f0] sm:$0xf]  ;;  %3198 = vst [vmem:[#allocation2 + $0x1f0] sm:$0xff] %v2953_v47  ;;  %v2955_v54 = vpop.f32.mrb[95].mxu1  ;;  %v4524_v55 = vcombine.low %v4422_v44, %v4423_v38 }
 0x1a7   :  { %3268 = vst [vmem:[#allocation2 + $0x420] sm:$0xff] %v3042_v48  ;;  %v3044_v56 = vpop.f32.mrb[95].mxu0  ;;  %7151 = vmatprep.mubr.f32.mxu1 %v9906_v2  ;;  %v4035_v58 = vrot.slane %v3907_v52, 4  ;;  %v3781_v59 = vld [vmem:[#allocation2 + $0x3f8] sm:$0xf]  ;;  %v3844_v60 = vadd.f32 %v3780_v53, %v3716_v43  ;;  %3199 = vst [vmem:[#allocation2 + $0x1f8] sm:$0xff] %v2955_v54  ;;  %v4162_v18 = vadd.f32 %v4034_v40, %v3842_v45 }
 0x1a8   :  { %9768 = vmatprep.subr.msk.mxu0 %vm4709_vm2, %v9837_v50  ;;  %9773 = vmatprep.subr.msk.mxu1 %vm4709_vm2, %v9838_v51  ;;  %3269 = vst [vmem:[#allocation2 + $0x428] sm:$0xff] %v3044_v56  ;;  %v3845_v61 = vadd.f32 %v3781_v59, %v3717_v42  ;;  %v3908_v62 = vld [vmem:[#allocation2 + $0x3f8] sm:$0xf0]  ;;  %v3463_v0 = vld [vmem:[#allocation2 + $0x1e0] sm:$0xf0]  ;;  %v3590_v7 = vrot.slane %v11046_v46, 4 }
 0x1a9   :  { %9769 = vmatpush1.msk.msra.mxu0 %vm4709_vm2, %v4523_v49  ;;  %9774 = vmatpush1.msk.msra.mxu1 %vm4709_vm2, %v4524_v55  ;;  %v4163_v1 = vadd.f32 %v4035_v58, %v3843_v57  ;;  %v4036_v5 = vrot.slane %v3908_v62, 4  ;;  %v4229_v6 = vld [vmem:[#allocation2 + $0x628] sm:$0xf]  ;;  %v3464_v8 = vld [vmem:[#allocation2 + $0x1e8] sm:$0xf0]  ;;  %v2959_v10 = vpop.f32.mrb[96].mxu1 }
 0x1aa   :  { %9770 = vmatmul.mubr.msk.f32.vlgmr.msra.gmra.mrb[176].mxu0 %vm4699_vm3, %v10945_v41  ;;  %9775 = vmatmul.mubr.msk.f32.vlgmr.msra.gmra.mrb[184].mxu1 %vm4699_vm3, %v10945_v41  ;;  %v3048_v11 = vpop.f32.mrb[96].mxu0  ;;  %v4226_v12 = vld [vmem:[#allocation2 + $0x610] sm:$0xf]  ;;  %v4165_v14 = vadd.f32 %v4037_v17, %v3845_v61  ;;  %v4228_v15 = vld [vmem:[#allocation2 + $0x620] sm:$0xf]  ;;  %3266 = vst [vmem:[#allocation2 + $0x410] sm:$0xff] %v2959_v10 }
 0x1ab   :  { %v2961_v4 = vpop.f32.mrb[97].mxu1  ;;  %7074 = vmatprep.mubr.f32.mxu0 %v9906_v2  ;;  %7157 = vmatprep.mubr.f32.mxu1 %v9906_v2  ;;  %3336 = vst [vmem:[#allocation2 + $0x640] sm:$0xf] %v3048_v11  ;;  %v3050_v20 = vpop.f32.mrb[97].mxu0  ;;  %v4227_v21 = vld [vmem:[#allocation2 + $0x618] sm:$0xf]  ;;  %v4290_v22 = vadd.f32 %v4226_v12, %v4162_v18  ;;  %v4164_v23 = vadd.f32 %v4036_v5, %v3844_v60 }
 0x1ac   :  { %v3591_v3 = vrot.slane %v3463_v0, 4  ;;  %3267 = vst [vmem:[#allocation2 + $0x418] sm:$0xff] %v2961_v4  ;;  %3337 = vst [vmem:[#allocation2 + $0x648] sm:$0xf] %v3050_v20  ;;  %v4291_v24 = vadd.f32 %v4227_v21, %v4163_v1  ;;  %v4293_v25 = vadd.f32 %v4229_v6, %v4165_v14  ;;  %v3398_v26 = vld [vmem:[#allocation2 + $0x1d0] sm:$0xf] }
 0x1ad   :  { %v3399_v27 = vld [vmem:[#allocation2 + $0x1d8] sm:$0xf]  ;;  %v3592_v28 = vrot.slane %v3464_v8, 4  ;;  %v4360_v30 = vadd.f32 %v10586_v16, %v4290_v22  ;;  %v4292_v31 = vadd.f32 %v4228_v15, %v4164_v23  ;;  %v3718_v32 = vadd.f32 %v3590_v7, %v3398_v26  ;;  %v3782_v29 = vld [vmem:[#allocation2 + $0x400] sm:$0xf]  ;;  %v2965_v34 = vpop.f32.mrb[98].mxu1 }
 0x1ae   :  { %v3910_v19 = vld [vmem:[#allocation2 + $0x408] sm:$0xf0]  ;;  %v3400_v33 = vld [vmem:[#allocation2 + $0x1e0] sm:$0xf]  ;;  %9771 = vmatmul.mubr.msk.f32.gmra.mrb[178].mxu0 %vm4699_vm3, %v10959_v63  ;;  %9776 = vmatmul.mubr.msk.f32.gmra.mrb[186].mxu1 %vm4699_vm3, %v10959_v63  ;;  %v4361_v35 = vadd.f32 %v10586_v16, %v4291_v24  ;;  %v4363_v36 = vadd.f32 %v10586_v16, %v4293_v25  ;;  %v3465_v37 = vld [vmem:[#allocation2 + $0x1f0] sm:$0xf0]  ;;  %v3719_v45 = vadd.f32 %v3591_v3, %v3399_v27 }
 0x1af   :  { %v3913_v38 = vld [vmem:[#allocation2 + $0x420] sm:$0xf0]  ;;  %v4912_v39 = vpop.f32.mrb[98].mxu0  ;;  %3334 = vst [vmem:[#allocation2 + $0x630] sm:$0xf] %v2965_v34  ;;  %v2967_v40 = vpop.f32.mrb[99].mxu1  ;;  %7080 = vmatprep.mubr.f32.mxu0 %v9906_v2  ;;  %7163 = vmatprep.mubr.f32.mxu1 %v9906_v2  ;;  %v4362_v44 = vadd.f32 %v10586_v16, %v4292_v31  ;;  %v3720_v50 = vadd.f32 %v3592_v28, %v3400_v33 }
 0x1b0   :  { %v4424_v43 = vmax.f32 %v4360_v30, 0.0  ;;  %v3401_v42 = vld [vmem:[#allocation2 + $0x1e8] sm:$0xf]  ;;  %v3593_v17 = vrot.slane %v3465_v37, 4  ;;  %7668 = vst [vmem:[#allocation2] sm:$0xff] %v4912_v39  ;;  %v4425_v46 = vmax.f32 %v4361_v35, 0.0  ;;  %v3846_v52 = vadd.f32 %v3782_v29, %v3718_v32 }
 0x1b1   :  { %3335 = vst [vmem:[#allocation2 + $0x638] sm:$0xf] %v2967_v40  ;;  %v4427_v47 = vmax.f32 %v4363_v36, 0.0  ;;  %v3783_v48 = vld [vmem:[#allocation2 + $0x408] sm:$0xf]  ;;  %v4038_v49 = vrot.slane %v3910_v19, 4 }
 0x1b2   :  { %v4426_v51 = vmax.f32 %v4362_v44, 0.0  ;;  %v3721_v53 = vadd.f32 %v3593_v17, %v3401_v42  ;;  %v4041_v54 = vrot.slane %v3913_v38, 4  ;;  %v3466_v55 = vld [vmem:[#allocation2 + $0x1f8] sm:$0xf0]  ;;  %v3119_v56 = vpop.f32.mrb[100].mxu1  ;;  %9772 = vmatmul.mubr.msk.f32.gmra.mrb[180].mxu0 %vm4699_vm3, %v10979_v9  ;;  %9777 = vmatmul.mubr.msk.f32.gmra.mrb[188].mxu1 %vm4699_vm3, %v10979_v9  ;;  %v4525_v57 = vcombine.low %v4424_v43, %v4425_v46  ;;  %v4914_v62 = vpop.f32.mrb[99].mxu0 }
 0x1b3   :  { %v9839_v58 = vcombine.low %v4425_v46, %v4425_v46  ;;  %v9840_v59 = vcombine.low %v4427_v47, %v4427_v47  ;;  %v3911_v60 = vld [vmem:[#allocation2 + $0x410] sm:$0xf0]  ;;  %v3784_v61 = vld [vmem:[#allocation2 + $0x410] sm:$0xf]  ;;  %v3121_v0 = vpop.f32.mrb[101].mxu1  ;;  %7234 = vmatprep.mubr.f32.mxu0 %v9906_v2  ;;  %7317 = vmatprep.mubr.f32.mxu1 %v9906_v2  ;;  %v3847_v1 = vadd.f32 %v3783_v48, %v3719_v45  ;;  %v4918_v14 = vpop.f32.mrb[100].mxu0 }
 0x1b4   :  { %v4526_v18 = vcombine.low %v4426_v51, %v4427_v47  ;;  %v4039_v5 = vrot.slane %v3911_v60, 4  ;;  %v3785_v6 = vld [vmem:[#allocation2 + $0x418] sm:$0xf]  ;;  %v3848_v7 = vadd.f32 %v3784_v61, %v3720_v50  ;;  %v3912_v8 = vld [vmem:[#allocation2 + $0x418] sm:$0xf0]  ;;  %7669 = vst [vmem:[#allocation2 + $0x8] sm:$0xff] %v4914_v62  ;;  %v4166_v15 = vadd.f32 %v4038_v49, %v3846_v52 }
 0x1b5   :  { %9778 = vmatprep.subr.msk.mxu0 %vm4709_vm2, %v9839_v58  ;;  %9783 = vmatprep.subr.msk.mxu1 %vm4709_vm2, %v9840_v59  ;;  %v3849_v10 = vadd.f32 %v3785_v6, %v3721_v53  ;;  %v4040_v11 = vrot.slane %v3912_v8, 4  ;;  %v3467_v12 = vld [vmem:[#allocation2 + $0x200] sm:$0xf0]  ;;  %v4232_v20 = vld [vmem:[#allocation2 + $0x640] sm:$0xf]  ;;  %v3594_v22 = vrot.slane %v3466_v55, 4 }
 0x1b6   :  { %9779 = vmatpush1.msk.msra.mxu0 %vm4709_vm2, %v4525_v57  ;;  %9784 = vmatpush1.msk.msra.mxu1 %vm4709_vm2, %v4526_v18  ;;  %v4167_v4 = vadd.f32 %v4039_v5, %v3847_v1  ;;  %v4233_v21 = vld [vmem:[#allocation2 + $0x648] sm:$0xf]  ;;  %v4920_v23 = vpop.f32.mrb[101].mxu0  ;;  %v3125_v3 = vpop.f32.mrb[102].mxu1  ;;  %v4230_v24 = vld [vmem:[#allocation2 + $0x630] sm:$0xf] }
 0x1b7   :  { %9780 = vmatmul.mubr.msk.f32.vlgmr.msra.gmra.mrb[182].mxu0 %vm4699_vm3, %v10945_v41  ;;  %9785 = vmatmul.mubr.msk.f32.vlgmr.msra.gmra.mrb[190].mxu1 %vm4699_vm3, %v10945_v41  ;;  %v4168_v25 = vadd.f32 %v4040_v11, %v3848_v7  ;;  %v4169_v26 = vadd.f32 %v4041_v54, %v3849_v10  ;;  %3270 = vst [vmem:[#allocation2 + $0x430] sm:$0xff] %v3125_v3  ;;  %v3127_v27 = vpop.f32.mrb[103].mxu1  ;;  %v3595_v31 = vrot.slane %v3467_v12, 4  ;;  %v4924_v32 = vpop.f32.mrb[102].mxu0  ;;  %v3402_v34 = vld [vmem:[#allocation2 + $0x1f0] sm:$0xf] }
 0x1b8   :  { %7240 = vmatprep.mubr.f32.mxu0 %v9906_v2  ;;  %7323 = vmatprep.mubr.f32.mxu1 %v9906_v2  ;;  %v4231_v28 = vld [vmem:[#allocation2 + $0x638] sm:$0xf]  ;;  %v4294_v30 = vadd.f32 %v4230_v24, %v4166_v15  ;;  %v4926_v36 = vpop.f32.mrb[103].mxu0  ;;  %v3722_v38 = vadd.f32 %v3594_v22, %v3402_v34  ;;  %v3131_v39 = vpop.f32.mrb[104].mxu1  ;;  %v3786_v45 = vld [vmem:[#allocation2 + $0x420] sm:$0xf] }
 0x1b9   :  { %v4295_v29 = vadd.f32 %v4231_v28, %v4167_v4  ;;  %v4296_v19 = vadd.f32 %v4232_v20, %v4168_v25  ;;  %v4297_v33 = vadd.f32 %v4233_v21, %v4169_v26  ;;  %v3403_v35 = vld [vmem:[#allocation2 + $0x1f8] sm:$0xf]  ;;  %v3914_v42 = vld [vmem:[#allocation2 + $0x428] sm:$0xf0]  ;;  %3338 = vst [vmem:[#allocation2 + $0x650] sm:$0xf] %v3131_v39 }
 0x1ba   :  { %v4364_v37 = vadd.f32 %v10586_v16, %v4294_v30  ;;  %v3133_v17 = vpop.f32.mrb[105].mxu1  ;;  %v3723_v47 = vadd.f32 %v3595_v31, %v3403_v35  ;;  %v3787_v51 = vld [vmem:[#allocation2 + $0x428] sm:$0xf]  ;;  %v3850_v52 = vadd.f32 %v3786_v45, %v3722_v38  ;;  %v4042_v53 = vrot.slane %v3914_v42, 4  ;;  %v7872_v30 = vld [vmem:[#allocation2] sm:$0xf] }
 0x1bb   :  { %9781 = vmatmul.mubr.msk.f32.gmra.mrb[184].mxu0 %vm4699_vm3, %v10959_v63  ;;  %9786 = vmatmul.mubr.msk.f32.gmra.mrb[192].mxu1 %vm4699_vm3, %v10959_v63  ;;  %v4365_v40 = vadd.f32 %v10586_v16, %v4295_v29  ;;  %v4366_v43 = vadd.f32 %v10586_v16, %v4296_v19  ;;  %v4367_v44 = vadd.f32 %v10586_v16, %v4297_v33  ;;  %v7936_v22 = vld [vmem:[#allocation2 + $0x8] sm:$0xf0]  ;;  %v7873_v32 = vld [vmem:[#allocation2 + $0x8] sm:$0xf] }
 0x1bc   :  { %7246 = vmatprep.mubr.f32.mxu0 %v9906_v2  ;;  %7329 = vmatprep.mubr.f32.mxu1 %v9906_v2  ;;  %v4428_v46 = vmax.f32 %v4364_v37, 0.0  ;;  %3339 = vst [vmem:[#allocation2 + $0x658] sm:$0xf] %v3133_v17  ;;  %v3851_v59 = vadd.f32 %v3787_v51, %v3723_v47  ;;  %v4170_v61 = vadd.f32 %v4042_v53, %v3850_v52  ;;  %v8064_v27 = vrot.slane %v7936_v22, 4  ;;  %v11153_v22 = vpop.permute.xlu0 %8835 }
 0x1bd   :  { %v4429_v48 = vmax.f32 %v4365_v40, 0.0  ;;  %v4430_v49 = vmax.f32 %v4366_v43, 0.0  ;;  %v4431_v50 = vmax.f32 %v4367_v44, 0.0 }
 0x1be   :  { %v3915_v57 = vld [vmem:[#allocation2 + $0x430] sm:$0xf0]  ;;  %v8192_v39 = vadd.f32 %v8064_v27, %v7872_v30 }
 0x1bf   :  { %9782 = vmatmul.mubr.msk.f32.gmra.mrb[186].mxu0 %vm4699_vm3, %v10979_v9  ;;  %9787 = vmatmul.mubr.msk.f32.gmra.mrb[194].mxu1 %vm4699_vm3, %v10979_v9  ;;  %v4527_v54 = vcombine.low %v4428_v46, %v4429_v48  ;;  %v9841_v55 = vcombine.low %v4429_v48, %v4429_v48  ;;  %v4528_v56 = vcombine.low %v4430_v49, %v4431_v50  ;;  %v4043_v60 = vrot.slane %v3915_v57, 4 }
 0x1c0   :  { %v9842_v58 = vcombine.low %v4431_v50, %v4431_v50  ;;  %7400 = vmatprep.mubr.f32.mxu0 %v9906_v2  ;;  %7483 = vmatprep.mubr.f32.mxu1 %v9906_v2  ;;  %v4234_v0 = vld [vmem:[#allocation2 + $0x650] sm:$0xf] }
 0x1c1   :  { %9788 = vmatprep.subr.msk.mxu0 %vm4709_vm2, %v9841_v55  ;;  %v4171_v62 = vadd.f32 %v4043_v60, %v3851_v59  ;;  %v4298_v1 = vadd.f32 %v4234_v0, %v4170_v61 }
 0x1c2   :  { %9793 = vmatprep.subr.msk.mxu1 %vm4709_vm2, %v9842_v58  ;;  %9789 = vmatpush1.msk.msra.mxu0 %vm4709_vm2, %v4527_v54 }
 0x1c3   :  { %9794 = vmatpush1.msk.msra.mxu1 %vm4709_vm2, %v4528_v56  ;;  %9790 = vmatmul.mubr.msk.f32.vlgmr.msra.gmra.mrb[188].mxu0 %vm4699_vm3, %v10945_v41  ;;  %v4235_v18 = vld [vmem:[#allocation2 + $0x658] sm:$0xf]  ;;  %v4368_v6 = vadd.f32 %v10586_v16, %v4298_v1 }
 0x1c4   :  { %9795 = vmatmul.mubr.msk.f32.vlgmr.msra.gmra.mrb[196].mxu1 %vm4699_vm3, %v10945_v41  ;;  %7406 = vmatprep.mubr.f32.mxu0 %v9906_v2  ;;  %v4299_v5 = vadd.f32 %v4235_v18, %v4171_v62 }
 0x1c5   :  { %7489 = vmatprep.mubr.f32.mxu1 %v9906_v2  ;;  %9803 = vmatprep.subr.msk.mxu1 %vm4709_vm2, %v10495_v13  ;;  %v4432_v8 = vmax.f32 %v4368_v6, 0.0 }
 0x1c6   :  { %9804 = vmatpush1.msk.msra.mxu1 %vm4709_vm2, %v9906_v2  ;;  %v4369_v7 = vadd.f32 %v10586_v16, %v4299_v5 }
 0x1c7   :  { %9791 = vmatmul.mubr.msk.f32.gmra.mrb[190].mxu0 %vm4699_vm3, %v10959_v63 }
 0x1c8   :  { %9796 = vmatmul.mubr.msk.f32.gmra.mrb[198].mxu1 %vm4699_vm3, %v10959_v63  ;;  %7412 = vmatprep.mubr.f32.mxu0 %v9906_v2  ;;  %v4433_v10 = vmax.f32 %v4369_v7, 0.0 }
 0x1c9   :  { %7495 = vmatprep.mubr.f32.mxu1 %v9906_v2 }
 0x1ca   :  { %v4529_v13 = vcombine.low %v4432_v8, %v4433_v10  ;;  %v9843_v11 = vcombine.low %v4433_v10, %v4433_v10 }
 0x1cb   :  { %9792 = vmatmul.mubr.msk.f32.gmra.mrb[192].mxu0 %vm4699_vm3, %v10979_v9 }
 0x1cc   :  { %9797 = vmatmul.mubr.msk.f32.gmra.mrb[200].mxu1 %vm4699_vm3, %v10979_v9  ;;  %7566 = vmatprep.mubr.f32.mxu0 %v9906_v2 }
 0x1cd   :  { %9798 = vmatprep.subr.msk.mxu0 %vm4709_vm2, %v9843_v11  ;;  %7649 = vmatprep.mubr.f32.mxu1 %v9906_v2 }
 0x1ce   :  { %9799 = vmatpush1.msk.msra.mxu0 %vm4709_vm2, %v4529_v13  ;;  %v4995_v16 = vpop.f32.mrb[106].mxu1 }
 0x1cf   :  { %9800 = vmatmul.mubr.msk.f32.vlgmr.msra.gmra.mrb[194].mxu0 %vm4699_vm3, %v10945_v41  ;;  %7670 = vst [vmem:[#allocation2 + $0x10] sm:$0xff] %v4995_v16 }
 0x1d0   :  { %9805 = vmatmul.mubr.msk.f32.vlgmr.msra.gmra.mrb[202].mxu1 %vm4699_vm3, %v10945_v41  ;;  %7572 = vmatprep.mubr.f32.mxu0 %v9906_v2  ;;  %v4997_v41 = vpop.f32.mrb[107].mxu1 }
 0x1d1   :  { %7655 = vmatprep.mubr.f32.mxu1 %v9906_v2  ;;  %7671 = vst [vmem:[#allocation2 + $0x18] sm:$0xff] %v4997_v41 }
 0x1d2   :  { %v5001_v12 = vpop.f32.mrb[108].mxu1 }
 0x1d3   :  { %9801 = vmatmul.mubr.msk.f32.gmra.mrb[196].mxu0 %vm4699_vm3, %v10959_v63  ;;  %7738 = vst [vmem:[#allocation2 + $0x230] sm:$0xff] %v5001_v12  ;;  %v5003_v14 = vpop.f32.mrb[109].mxu1 }
 0x1d4   :  { %9806 = vmatmul.mubr.msk.f32.gmra.mrb[204].mxu1 %vm4699_vm3, %v10959_v63  ;;  %7578 = vmatprep.mubr.f32.mxu0 %v9906_v2  ;;  %7739 = vst [vmem:[#allocation2 + $0x238] sm:$0xff] %v5003_v14 }
 0x1d5   :  { %7661 = vmatprep.mubr.f32.mxu1 %v9906_v2 }
 0x1d6   :  { %v5007_v15 = vpop.f32.mrb[110].mxu1  ;;  %v7874_v29 = vld [vmem:[#allocation2 + $0x10] sm:$0xf] }
 0x1d7   :  { %9802 = vmatmul.mubr.msk.f32.gmra.mrb[198].mxu0 %vm4699_vm3, %v10979_v9  ;;  %v5009_v63 = vpop.f32.mrb[111].mxu1 }
 0x1d8   :  { %9807 = vmatmul.mubr.msk.f32.gmra.mrb[206].mxu1 %vm4699_vm3, %v10979_v9  ;;  %v7937_v9 = vld [vmem:[#allocation2 + $0x10] sm:$0xf0]  ;;  %v7938_v23 = vld [vmem:[#allocation2 + $0x18] sm:$0xf0]  ;;  %v7875_v38 = vld [vmem:[#allocation2 + $0x18] sm:$0xf] }
 0x1d9   :  { %v8065_v28 = vrot.slane %v7937_v9, 4  ;;  %v8066_v31 = vrot.slane %v7938_v23, 4 }
 0x1da   :  { %v8256_v33 = vld [vmem:[#allocation2 + $0x230] sm:$0xf] }
 0x1db   :  { %v5078_v4 = vpop.f32.mrb[104].mxu0  ;;  %v5161_v20 = vpop.f32.mrb[112].mxu1  ;;  %v8384_v34 = vld [vmem:[#allocation2 + $0x238] sm:$0xf0]  ;;  %v8193_v37 = vadd.f32 %v8065_v28, %v7873_v32  ;;  %v8194_v43 = vadd.f32 %v8066_v31, %v7874_v29  ;;  %v8257_v44 = vld [vmem:[#allocation2 + $0x238] sm:$0xf]  ;;  %v8320_v47 = vadd.f32 %v8256_v33, %v8192_v39 }
 0x1dc   :  { %7672 = vst [vmem:[#allocation2 + $0x20] sm:$0xff] %v5078_v4  ;;  %v5080_v2 = vpop.f32.mrb[105].mxu0  ;;  %7674 = vst [vmem:[#allocation2 + $0x30] sm:$0xff] %v5161_v20  ;;  %v5163_v21 = vpop.f32.mrb[113].mxu1  ;;  %v8512_v48 = vrot.slane %v8384_v34, 4 }
 0x1dd   :  { %7673 = vst [vmem:[#allocation2 + $0x28] sm:$0xff] %v5080_v2  ;;  %7675 = vst [vmem:[#allocation2 + $0x38] sm:$0xff] %v5163_v21  ;;  %v8321_v57 = vadd.f32 %v8257_v44, %v8193_v37 }
 0x1de   :  { %v8640_v7 = vadd.f32 %v8512_v48, %v8320_v47 }
 0x1df   :  { %v5084_v3 = vpop.f32.mrb[106].mxu0  ;;  %v5167_v24 = vpop.f32.mrb[114].mxu1 }
 0x1e0   :  { %7740 = vst [vmem:[#allocation2 + $0x240] sm:$0xff] %v5084_v3  ;;  %v5086_v25 = vpop.f32.mrb[107].mxu0  ;;  %7742 = vst [vmem:[#allocation2 + $0x250] sm:$0xff] %v5167_v24  ;;  %v5169_v26 = vpop.f32.mrb[115].mxu1 }
 0x1e1   :  { %7741 = vst [vmem:[#allocation2 + $0x248] sm:$0xff] %v5086_v25  ;;  %7743 = vst [vmem:[#allocation2 + $0x258] sm:$0xff] %v5169_v26 }
 0x1e3   :  { %v7939_v19 = vld [vmem:[#allocation2 + $0x20] sm:$0xf0]  ;;  %v5090_v36 = vpop.f32.mrb[108].mxu0  ;;  %v5173_v40 = vpop.f32.mrb[116].mxu1  ;;  %v7941_v58 = vld [vmem:[#allocation2 + $0x30] sm:$0xf0] }
 0x1e4   :  { %v8067_v35 = vrot.slane %v7939_v19, 4  ;;  %7808 = vst [vmem:[#allocation2 + $0x460] sm:$0xf] %v5090_v36  ;;  %v7940_v42 = vld [vmem:[#allocation2 + $0x28] sm:$0xf0]  ;;  %v5092_v17 = vpop.f32.mrb[109].mxu0 }
 0x1e5   :  { %7810 = vst [vmem:[#allocation2 + $0x470] sm:$0xf] %v5173_v40  ;;  %v5175_v46 = vpop.f32.mrb[117].mxu1  ;;  %7809 = vst [vmem:[#allocation2 + $0x468] sm:$0xf] %v5092_v17  ;;  %v8068_v0 = vrot.slane %v7940_v42, 4 }
 0x1e6   :  { %v8195_v45 = vadd.f32 %v8067_v35, %v7875_v38  ;;  %7811 = vst [vmem:[#allocation2 + $0x478] sm:$0xf] %v5175_v46  ;;  %v7942_v18 = vld [vmem:[#allocation2 + $0x38] sm:$0xf0]  ;;  %v7876_v6 = vld [vmem:[#allocation2 + $0x20] sm:$0xf] }
 0x1e7   :  { %v8258_v49 = vld [vmem:[#allocation2 + $0x240] sm:$0xf]  ;;  %v8385_v50 = vld [vmem:[#allocation2 + $0x240] sm:$0xf0]  ;;  %v8387_v61 = vld [vmem:[#allocation2 + $0x250] sm:$0xf0]  ;;  %v8196_v9 = vadd.f32 %v8068_v0, %v7876_v6 }
 0x1e8   :  { %v5244_v51 = vpop.f32.mrb[110].mxu0  ;;  %v8322_v52 = vadd.f32 %v8258_v49, %v8194_v43  ;;  %v8513_v53 = vrot.slane %v8385_v50, 4  ;;  %v8259_v54 = vld [vmem:[#allocation2 + $0x248] sm:$0xf]  ;;  %v8386_v55 = vld [vmem:[#allocation2 + $0x248] sm:$0xf0] }
 0x1e9   :  { %7676 = vst [vmem:[#allocation2 + $0x40] sm:$0xff] %v5244_v51  ;;  %v5246_v56 = vpop.f32.mrb[111].mxu0  ;;  %v8323_v59 = vadd.f32 %v8259_v54, %v8195_v45  ;;  %v8514_v60 = vrot.slane %v8386_v55, 4  ;;  %v5327_v62 = vpop.f32.mrb[118].mxu1  ;;  %v8515_v1 = vrot.slane %v8387_v61, 4  ;;  %v8069_v41 = vrot.slane %v7941_v58, 4 }
 0x1ea   :  { %7677 = vst [vmem:[#allocation2 + $0x48] sm:$0xff] %v5246_v56  ;;  %7678 = vst [vmem:[#allocation2 + $0x50] sm:$0xff] %v5327_v62  ;;  %v5329_v5 = vpop.f32.mrb[119].mxu1  ;;  %v8641_v10 = vadd.f32 %v8513_v53, %v8321_v57  ;;  %v7878_v16 = vld [vmem:[#allocation2 + $0x30] sm:$0xf]  ;;  %v8070_v20 = vrot.slane %v7942_v18, 4 }
 0x1eb   :  { %v8642_v8 = vadd.f32 %v8514_v60, %v8322_v52  ;;  %7679 = vst [vmem:[#allocation2 + $0x58] sm:$0xff] %v5329_v5  ;;  %v8704_v12 = vld [vmem:[#allocation2 + $0x460] sm:$0xf]  ;;  %v8643_v14 = vadd.f32 %v8515_v1, %v8323_v59  ;;  %v7877_v4 = vld [vmem:[#allocation2 + $0x28] sm:$0xf] }
 0x1ec   :  { %v5250_v13 = vpop.f32.mrb[112].mxu0  ;;  %v5333_v11 = vpop.f32.mrb[120].mxu1  ;;  %v8768_v2 = vadd.f32 %v8704_v12, %v8640_v7  ;;  %v8706_v21 = vld [vmem:[#allocation2 + $0x470] sm:$0xf]  ;;  %v8705_v24 = vld [vmem:[#allocation2 + $0x468] sm:$0xf]  ;;  %v8197_v19 = vadd.f32 %v8069_v41, %v7877_v4  ;;  %v8198_v37 = vadd.f32 %v8070_v20, %v7878_v16 }
 0x1ed   :  { %7744 = vst [vmem:[#allocation2 + $0x260] sm:$0xff] %v5250_v13  ;;  %v5252_v15 = vpop.f32.mrb[113].mxu0  ;;  %7746 = vst [vmem:[#allocation2 + $0x270] sm:$0xff] %v5333_v11  ;;  %v5335_v63 = vpop.f32.mrb[121].mxu1  ;;  %v8260_v23 = vld [vmem:[#allocation2 + $0x250] sm:$0xf]  ;;  %v8770_v3 = vadd.f32 %v8706_v21, %v8642_v8  ;;  %v8769_v28 = vadd.f32 %v8705_v24, %v8641_v10 }
 0x1ee   :  { %7745 = vst [vmem:[#allocation2 + $0x268] sm:$0xff] %v5252_v15  ;;  %7747 = vst [vmem:[#allocation2 + $0x278] sm:$0xff] %v5335_v63  ;;  %v8707_v25 = vld [vmem:[#allocation2 + $0x478] sm:$0xf]  ;;  %v8388_v26 = vld [vmem:[#allocation2 + $0x258] sm:$0xf0]  ;;  %v8838_v27 = vadd.f32 %v11153_v22, %v8768_v2  ;;  %v8324_v44 = vadd.f32 %v8260_v23, %v8196_v9 }
 0x1ef   :  { %v8771_v30 = vadd.f32 %v8707_v25, %v8643_v14  ;;  %v8840_v33 = vadd.f32 %v11153_v22, %v8770_v3  ;;  %v7879_v36 = vld [vmem:[#allocation2 + $0x38] sm:$0xf]  ;;  %v8839_v40 = vadd.f32 %v11153_v22, %v8769_v28  ;;  %v8516_v45 = vrot.slane %v8388_v26, 4 }
 0x1f0   :  { %v7943_v31 = vld [vmem:[#allocation2 + $0x40] sm:$0xf0]  ;;  %v5256_v32 = vpop.f32.mrb[114].mxu0  ;;  %v5339_v29 = vpop.f32.mrb[122].mxu1  ;;  %v8261_v38 = vld [vmem:[#allocation2 + $0x258] sm:$0xf] }
 0x1f1   :  { %v8071_v34 = vrot.slane %v7943_v31, 4  ;;  %7812 = vst [vmem:[#allocation2 + $0x480] sm:$0xf] %v5256_v32  ;;  %7814 = vst [vmem:[#allocation2 + $0x490] sm:$0xf] %v5339_v29  ;;  %v5258_v35 = vpop.f32.mrb[115].mxu0  ;;  %v8841_v43 = vadd.f32 %v11153_v22, %v8771_v30  ;;  %v8325_v50 = vadd.f32 %v8261_v38, %v8197_v19  ;;  %v8644_v18 = vadd.f32 %v8516_v45, %v8324_v44 }
 0x1f2   :  { %v8902_v39 = vmax.f32 %v8838_v27, 0.0  ;;  %7813 = vst [vmem:[#allocation2 + $0x488] sm:$0xf] %v5258_v35  ;;  %v8904_v42 = vmax.f32 %v8840_v33, 0.0  ;;  %v8903_v46 = vmax.f32 %v8839_v40, 0.0  ;;  %v5341_v59 = vpop.f32.mrb[123].mxu1 }
 0x1f3   :  { %v8199_v17 = vadd.f32 %v8071_v34, %v7879_v36  ;;  %v8905_v47 = vmax.f32 %v8841_v43, 0.0  ;;  %v7944_v60 = vld [vmem:[#allocation2 + $0x48] sm:$0xf0]  ;;  %v7945_v61 = vld [vmem:[#allocation2 + $0x50] sm:$0xf0] }
 0x1f4   :  { %v8262_v48 = vld [vmem:[#allocation2 + $0x260] sm:$0xf]  ;;  %v8389_v49 = vld [vmem:[#allocation2 + $0x260] sm:$0xf0]  ;;  %v9030_v55 = vcombine.low %v8902_v39, %v8903_v46  ;;  %v8391_v58 = vld [vmem:[#allocation2 + $0x270] sm:$0xf0] }
 0x1f5   :  { %v8326_v51 = vadd.f32 %v8262_v48, %v8198_v37  ;;  %v8517_v52 = vrot.slane %v8389_v49, 4  ;;  %v8263_v53 = vld [vmem:[#allocation2 + $0x268] sm:$0xf]  ;;  %v8390_v54 = vld [vmem:[#allocation2 + $0x268] sm:$0xf0]  ;;  %v9031_v56 = vcombine.low %v8904_v42, %v8905_v47  ;;  %v8519_v0 = vrot.slane %v8391_v58, 4 }
 0x1f6   :  { %v8518_v57 = vrot.slane %v8390_v54, 4  ;;  %v8327_v62 = vadd.f32 %v8263_v53, %v8199_v17  ;;  %7815 = vst [vmem:[#allocation2 + $0x498] sm:$0xf] %v5341_v59  ;;  %v5410_v5 = vpop.f32.mrb[116].mxu0  ;;  %9094 = vst [vmem:[#allocation4] sm:$0xff] %v9030_v55  ;;  %v5493_v16 = vpop.f32.mrb[124].mxu1 }
 0x1f7   :  { %v8645_v1 = vadd.f32 %v8517_v52, %v8325_v50  ;;  %9095 = vst [vmem:[#allocation4 + $0x8] sm:$0xff] %v9031_v56  ;;  %7680 = vst [vmem:[#allocation2 + $0x60] sm:$0xff] %v5410_v5  ;;  %v5412_v10 = vpop.f32.mrb[117].mxu0  ;;  %v8072_v12 = vrot.slane %v7944_v60, 4  ;;  %v7946_v14 = vld [vmem:[#allocation2 + $0x58] sm:$0xf0] }
 0x1f8   :  { %v8708_v6 = vld [vmem:[#allocation2 + $0x480] sm:$0xf]  ;;  %v8646_v7 = vadd.f32 %v8518_v57, %v8326_v51  ;;  %v8710_v8 = vld [vmem:[#allocation2 + $0x490] sm:$0xf]  ;;  %7681 = vst [vmem:[#allocation2 + $0x68] sm:$0xff] %v5412_v10  ;;  %7682 = vst [vmem:[#allocation2 + $0x70] sm:$0xff] %v5493_v16  ;;  %v8647_v9 = vadd.f32 %v8519_v0, %v8327_v62 }
 0x1f9   :  { %v8772_v13 = vadd.f32 %v8708_v6, %v8644_v18  ;;  %v8709_v11 = vld [vmem:[#allocation2 + $0x488] sm:$0xf]  ;;  %v5495_v4 = vpop.f32.mrb[125].mxu1  ;;  %v8073_v2 = vrot.slane %v7945_v61, 4  ;;  %v7880_v27 = vld [vmem:[#allocation2 + $0x40] sm:$0xf] }
 0x1fa   :  { %v5416_v41 = vpop.f32.mrb[118].mxu0  ;;  %v8774_v15 = vadd.f32 %v8710_v8, %v8646_v7  ;;  %v8773_v63 = vadd.f32 %v8709_v11, %v8645_v1  ;;  %7683 = vst [vmem:[#allocation2 + $0x78] sm:$0xff] %v5495_v4  ;;  %v5499_v23 = vpop.f32.mrb[126].mxu1  ;;  %v7881_v3 = vld [vmem:[#allocation2 + $0x48] sm:$0xf]  ;;  %v8074_v28 = vrot.slane %v7946_v14, 4  ;;  %v8200_v19 = vadd.f32 %v8072_v12, %v7880_v27 }
 0x1fb   :  { %7748 = vst [vmem:[#allocation2 + $0x280] sm:$0xff] %v5416_v41  ;;  %v5418_v20 = vpop.f32.mrb[119].mxu0  ;;  %v8842_v21 = vadd.f32 %v11153_v22, %v8772_v13  ;;  %7750 = vst [vmem:[#allocation2 + $0x290] sm:$0xff] %v5499_v23  ;;  %v5501_v25 = vpop.f32.mrb[127].mxu1  ;;  %v7882_v33 = vld [vmem:[#allocation2 + $0x50] sm:$0xf]  ;;  %v8201_v37 = vadd.f32 %v8073_v2, %v7881_v3 }
 0x1fc   :  { %7749 = vst [vmem:[#allocation2 + $0x288] sm:$0xff] %v5418_v20  ;;  %v8843_v24 = vadd.f32 %v11153_v22, %v8773_v63  ;;  %v8844_v31 = vadd.f32 %v11153_v22, %v8774_v15  ;;  %7751 = vst [vmem:[#allocation2 + $0x298] sm:$0xff] %v5501_v25  ;;  %v8264_v38 = vld [vmem:[#allocation2 + $0x270] sm:$0xf]  ;;  %v8392_v39 = vld [vmem:[#allocation2 + $0x278] sm:$0xf0]  ;;  %v8202_v47 = vadd.f32 %v8074_v28, %v7882_v33 }
 0x1fd   :  { %v8906_v30 = vmax.f32 %v8842_v21, 0.0  ;;  %v8711_v35 = vld [vmem:[#allocation2 + $0x498] sm:$0xf]  ;;  %v8328_v51 = vadd.f32 %v8264_v38, %v8200_v19  ;;  %v8520_v52 = vrot.slane %v8392_v39, 4 }
 0x1fe   :  { %v5422_v26 = vpop.f32.mrb[120].mxu0  ;;  %v5505_v32 = vpop.f32.mrb[128].mxu1  ;;  %v8907_v34 = vmax.f32 %v8843_v24, 0.0  ;;  %v8775_v40 = vadd.f32 %v8711_v35, %v8647_v9  ;;  %v7947_v43 = vld [vmem:[#allocation2 + $0x60] sm:$0xf0]  ;;  %v8908_v48 = vmax.f32 %v8844_v31, 0.0 }
 0x1ff   :  { %7816 = vst [vmem:[#allocation2 + $0x4a0] sm:$0xf] %v5422_v26  ;;  %v5424_v29 = vpop.f32.mrb[121].mxu0  ;;  %7818 = vst [vmem:[#allocation2 + $0x4b0] sm:$0xf] %v5505_v32  ;;  %v5507_v36 = vpop.f32.mrb[129].mxu1  ;;  %v8648_v12 = vadd.f32 %v8520_v52, %v8328_v51 }
 0x200   :  { %7817 = vst [vmem:[#allocation2 + $0x4a8] sm:$0xf] %v5424_v29  ;;  %7819 = vst [vmem:[#allocation2 + $0x4b8] sm:$0xf] %v5507_v36  ;;  %v8265_v44 = vld [vmem:[#allocation2 + $0x278] sm:$0xf]  ;;  %v9032_v45 = vcombine.low %v8906_v30, %v8907_v34  ;;  %v8845_v49 = vadd.f32 %v11153_v22, %v8775_v40 }
 0x201   :  { %v8075_v42 = vrot.slane %v7947_v43, 4  ;;  %v7883_v46 = vld [vmem:[#allocation2 + $0x58] sm:$0xf]  ;;  %v8329_v57 = vadd.f32 %v8265_v44, %v8201_v37  ;;  %v7948_v59 = vld [vmem:[#allocation2 + $0x68] sm:$0xf0] }
 0x202   :  { %9096 = vst [vmem:[#allocation4 + $0x10] sm:$0xff] %v9032_v45  ;;  %v8266_v54 = vld [vmem:[#allocation2 + $0x280] sm:$0xf]  ;;  %v8393_v55 = vld [vmem:[#allocation2 + $0x280] sm:$0xf0]  ;;  %v8909_v58 = vmax.f32 %v8845_v49, 0.0 }
 0x203   :  { %v5576_v17 = vpop.f32.mrb[122].mxu0  ;;  %v8203_v53 = vadd.f32 %v8075_v42, %v7883_v46  ;;  %v5659_v56 = vpop.f32.mrb[130].mxu1  ;;  %v8330_v60 = vadd.f32 %v8266_v54, %v8202_v47  ;;  %v8521_v61 = vrot.slane %v8393_v55, 4  ;;  %v8267_v62 = vld [vmem:[#allocation2 + $0x288] sm:$0xf]  ;;  %v8076_v11 = vrot.slane %v7948_v59, 4 }
 0x204   :  { %7684 = vst [vmem:[#allocation2 + $0x80] sm:$0xff] %v5576_v17  ;;  %v5578_v50 = vpop.f32.mrb[123].mxu0  ;;  %7686 = vst [vmem:[#allocation2 + $0x90] sm:$0xff] %v5659_v56  ;;  %v8394_v0 = vld [vmem:[#allocation2 + $0x288] sm:$0xf0]  ;;  %v9033_v1 = vcombine.low %v8908_v48, %v8909_v58  ;;  %v5661_v13 = vpop.f32.mrb[131].mxu1 }
 0x205   :  { %7685 = vst [vmem:[#allocation2 + $0x88] sm:$0xff] %v5578_v50  ;;  %v7950_v5 = vld [vmem:[#allocation2 + $0x78] sm:$0xf0]  ;;  %v8331_v6 = vadd.f32 %v8267_v62, %v8203_v53  ;;  %v8522_v7 = vrot.slane %v8394_v0, 4  ;;  %v8395_v8 = vld [vmem:[#allocation2 + $0x290] sm:$0xf0]  ;;  %v8649_v10 = vadd.f32 %v8521_v61, %v8329_v57 }
 0x206   :  { %v7949_v16 = vld [vmem:[#allocation2 + $0x70] sm:$0xf0]  ;;  %v8523_v41 = vrot.slane %v8395_v8, 4  ;;  %7687 = vst [vmem:[#allocation2 + $0x98] sm:$0xff] %v5661_v13  ;;  %9097 = vst [vmem:[#allocation4 + $0x18] sm:$0xff] %v9033_v1  ;;  %v8078_v21 = vrot.slane %v7950_v5, 4 }
 0x207   :  { %v7884_v15 = vld [vmem:[#allocation2 + $0x60] sm:$0xf]  ;;  %v8650_v4 = vadd.f32 %v8522_v7, %v8330_v60  ;;  %v8714_v20 = vld [vmem:[#allocation2 + $0x4b0] sm:$0xf]  ;;  %v8713_v23 = vld [vmem:[#allocation2 + $0x4a8] sm:$0xf] }
 0x208   :  { %v8712_v63 = vld [vmem:[#allocation2 + $0x4a0] sm:$0xf]  ;;  %v8651_v3 = vadd.f32 %v8523_v41, %v8331_v6  ;;  %v8715_v24 = vld [vmem:[#allocation2 + $0x4b8] sm:$0xf]  ;;  %v7886_v25 = vld [vmem:[#allocation2 + $0x70] sm:$0xf]  ;;  %v8777_v28 = vadd.f32 %v8713_v23, %v8649_v10  ;;  %v8204_v32 = vadd.f32 %v8076_v11, %v7884_v15 }
 0x209   :  { %v5582_v18 = vpop.f32.mrb[124].mxu0  ;;  %v5665_v2 = vpop.f32.mrb[132].mxu1  ;;  %v8776_v9 = vadd.f32 %v8712_v63, %v8648_v12  ;;  %v8077_v26 = vrot.slane %v7949_v16, 4  ;;  %v8778_v27 = vadd.f32 %v8714_v20, %v8650_v4  ;;  %v7885_v31 = vld [vmem:[#allocation2 + $0x68] sm:$0xf]  ;;  %v8206_v43 = vadd.f32 %v8078_v21, %v7886_v25 }
 0x20a   :  { %7752 = vst [vmem:[#allocation2 + $0x2a0] sm:$0xff] %v5582_v18  ;;  %v5584_v14 = vpop.f32.mrb[125].mxu0  ;;  %7754 = vst [vmem:[#allocation2 + $0x2b0] sm:$0xff] %v5665_v2  ;;  %v7887_v29 = vld [vmem:[#allocation2 + $0x78] sm:$0xf]  ;;  %v8779_v33 = vadd.f32 %v8715_v24, %v8651_v3  ;;  %v8847_v38 = vadd.f32 %v11153_v22, %v8777_v28  ;;  %v5667_v39 = vpop.f32.mrb[133].mxu1 }
 0x20b   :  { %7753 = vst [vmem:[#allocation2 + $0x2a8] sm:$0xff] %v5584_v14  ;;  %v7951_v30 = vld [vmem:[#allocation2 + $0x80] sm:$0xf0]  ;;  %v8846_v19 = vadd.f32 %v11153_v22, %v8776_v9  ;;  %v8268_v35 = vld [vmem:[#allocation2 + $0x290] sm:$0xf]  ;;  %v8848_v37 = vadd.f32 %v11153_v22, %v8778_v27  ;;  %7755 = vst [vmem:[#allocation2 + $0x2b8] sm:$0xff] %v5667_v39  ;;  %v8205_v47 = vadd.f32 %v8077_v26, %v7885_v31 }
 0x20c   :  { %v8079_v34 = vrot.slane %v7951_v30, 4  ;;  %v8396_v36 = vld [vmem:[#allocation2 + $0x298] sm:$0xf0]  ;;  %v8849_v45 = vadd.f32 %v11153_v22, %v8779_v33  ;;  %v8269_v48 = vld [vmem:[#allocation2 + $0x298] sm:$0xf]  ;;  %v8911_v50 = vmax.f32 %v8847_v38, 0.0  ;;  %v8332_v52 = vadd.f32 %v8268_v35, %v8204_v32 }
 0x20d   :  { %v8910_v44 = vmax.f32 %v8846_v19, 0.0  ;;  %v8912_v49 = vmax.f32 %v8848_v37, 0.0  ;;  %v8524_v53 = vrot.slane %v8396_v36, 4  ;;  %v7952_v0 = vld [vmem:[#allocation2 + $0x88] sm:$0xf0]  ;;  %v8333_v6 = vadd.f32 %v8269_v48, %v8205_v47 }
 0x20e   :  { %v5588_v40 = vpop.f32.mrb[126].mxu0  ;;  %v5671_v46 = vpop.f32.mrb[134].mxu1  ;;  %v8207_v51 = vadd.f32 %v8079_v34, %v7887_v29  ;;  %v8913_v54 = vmax.f32 %v8849_v45, 0.0  ;;  %v7953_v7 = vld [vmem:[#allocation2 + $0x90] sm:$0xf0]  ;;  %v8080_v15 = vrot.slane %v7952_v0, 4 }
 0x20f   :  { %7820 = vst [vmem:[#allocation2 + $0x4c0] sm:$0xf] %v5588_v40  ;;  %7822 = vst [vmem:[#allocation2 + $0x4d0] sm:$0xf] %v5671_v46  ;;  %v5590_v57 = vpop.f32.mrb[127].mxu0  ;;  %v9034_v58 = vcombine.low %v8910_v44, %v8911_v50  ;;  %v5673_v1 = vpop.f32.mrb[135].mxu1  ;;  %v8652_v16 = vadd.f32 %v8524_v53, %v8332_v52 }
 0x210   :  { %7821 = vst [vmem:[#allocation2 + $0x4c8] sm:$0xf] %v5590_v57  ;;  %v9035_v62 = vcombine.low %v8912_v49, %v8913_v54  ;;  %7823 = vst [vmem:[#allocation2 + $0x4d8] sm:$0xf] %v5673_v1  ;;  %v7954_v63 = vld [vmem:[#allocation2 + $0x98] sm:$0xf0] }
 0x211   :  { %v8270_v42 = vld [vmem:[#allocation2 + $0x2a0] sm:$0xf]  ;;  %v8397_v17 = vld [vmem:[#allocation2 + $0x2a0] sm:$0xf0]  ;;  %v8399_v61 = vld [vmem:[#allocation2 + $0x2b0] sm:$0xf0] }
 0x212   :  { %v8334_v55 = vadd.f32 %v8270_v42, %v8206_v43  ;;  %v8271_v56 = vld [vmem:[#allocation2 + $0x2a8] sm:$0xf]  ;;  %v8525_v59 = vrot.slane %v8397_v17, 4  ;;  %v8398_v60 = vld [vmem:[#allocation2 + $0x2a8] sm:$0xf0]  ;;  %v5742_v5 = vpop.f32.mrb[128].mxu0 }
 0x213   :  { %v8526_v18 = vrot.slane %v8398_v60, 4  ;;  %9098 = vst [vmem:[#allocation4 + $0x20] sm:$0xff] %v9034_v58  ;;  %v8335_v8 = vadd.f32 %v8271_v56, %v8207_v51  ;;  %v8527_v10 = vrot.slane %v8399_v61, 4  ;;  %7688 = vst [vmem:[#allocation2 + $0xa0] sm:$0xff] %v5742_v5  ;;  %v5744_v13 = vpop.f32.mrb[129].mxu0  ;;  %v5825_v11 = vpop.f32.mrb[136].mxu1 }
 0x214   :  { %9099 = vst [vmem:[#allocation4 + $0x28] sm:$0xff] %v9035_v62  ;;  %7689 = vst [vmem:[#allocation2 + $0xa8] sm:$0xff] %v5744_v13  ;;  %v5827_v14 = vpop.f32.mrb[137].mxu1  ;;  %v8653_v20 = vadd.f32 %v8525_v59, %v8333_v6  ;;  %v8081_v2 = vrot.slane %v7953_v7, 4  ;;  %v7888_v24 = vld [vmem:[#allocation2 + $0x80] sm:$0xf] }
 0x215   :  { %v8654_v41 = vadd.f32 %v8526_v18, %v8334_v55  ;;  %7690 = vst [vmem:[#allocation2 + $0xb0] sm:$0xff] %v5825_v11  ;;  %7691 = vst [vmem:[#allocation2 + $0xb8] sm:$0xff] %v5827_v14  ;;  %v7889_v25 = vld [vmem:[#allocation2 + $0x88] sm:$0xf]  ;;  %v8655_v27 = vadd.f32 %v8527_v10, %v8335_v8  ;;  %v8082_v31 = vrot.slane %v7954_v63, 4  ;;  %v8208_v34 = vadd.f32 %v8080_v15, %v7888_v24 }
 0x216   :  { %v5748_v12 = vpop.f32.mrb[130].mxu0  ;;  %v8716_v4 = vld [vmem:[#allocation2 + $0x4c0] sm:$0xf]  ;;  %v8718_v9 = vld [vmem:[#allocation2 + $0x4d0] sm:$0xf]  ;;  %v5831_v3 = vpop.f32.mrb[138].mxu1  ;;  %v8209_v40 = vadd.f32 %v8081_v2, %v7889_v25 }
 0x217   :  { %7756 = vst [vmem:[#allocation2 + $0x2c0] sm:$0xff] %v5748_v12  ;;  %v8780_v21 = vadd.f32 %v8716_v4, %v8652_v16  ;;  %v5750_v23 = vpop.f32.mrb[131].mxu0  ;;  %v8782_v26 = vadd.f32 %v8718_v9, %v8654_v41  ;;  %7758 = vst [vmem:[#allocation2 + $0x2d0] sm:$0xff] %v5831_v3  ;;  %v5833_v28 = vpop.f32.mrb[139].mxu1  ;;  %v8717_v29 = vld [vmem:[#allocation2 + $0x4c8] sm:$0xf] }
 0x218   :  { %7757 = vst [vmem:[#allocation2 + $0x2c8] sm:$0xff] %v5750_v23  ;;  %7759 = vst [vmem:[#allocation2 + $0x2d8] sm:$0xff] %v5833_v28  ;;  %v7890_v35 = vld [vmem:[#allocation2 + $0x90] sm:$0xf]  ;;  %v8400_v36 = vld [vmem:[#allocation2 + $0x2b8] sm:$0xf0]  ;;  %v8781_v38 = vadd.f32 %v8717_v29, %v8653_v20 }
 0x219   :  { %v8850_v32 = vadd.f32 %v11153_v22, %v8780_v21  ;;  %v8852_v37 = vadd.f32 %v11153_v22, %v8782_v26  ;;  %v8272_v43 = vld [vmem:[#allocation2 + $0x2b0] sm:$0xf]  ;;  %v8719_v44 = vld [vmem:[#allocation2 + $0x4d8] sm:$0xf]  ;;  %v8210_v51 = vadd.f32 %v8082_v31, %v7890_v35  ;;  %v8528_v52 = vrot.slane %v8400_v36, 4 }
 0x21a   :  { %v5754_v30 = vpop.f32.mrb[132].mxu0  ;;  %v5837_v19 = vpop.f32.mrb[140].mxu1  ;;  %v8273_v42 = vld [vmem:[#allocation2 + $0x2b8] sm:$0xf]  ;;  %v8851_v46 = vadd.f32 %v11153_v22, %v8781_v38  ;;  %v8783_v47 = vadd.f32 %v8719_v44, %v8655_v27  ;;  %v7955_v48 = vld [vmem:[#allocation2 + $0xa0] sm:$0xf0]  ;;  %v8336_v55 = vadd.f32 %v8272_v43, %v8208_v34 }
 0x21b   :  { %7824 = vst [vmem:[#allocation2 + $0x4e0] sm:$0xf] %v5754_v30  ;;  %v5756_v33 = vpop.f32.mrb[133].mxu0  ;;  %7826 = vst [vmem:[#allocation2 + $0x4f0] sm:$0xf] %v5837_v19  ;;  %v5839_v39 = vpop.f32.mrb[141].mxu1  ;;  %v8337_v61 = vadd.f32 %v8273_v42, %v8209_v40 }
 0x21c   :  { %7825 = vst [vmem:[#allocation2 + $0x4e8] sm:$0xf] %v5756_v33  ;;  %7827 = vst [vmem:[#allocation2 + $0x4f8] sm:$0xf] %v5839_v39  ;;  %v8914_v17 = vmax.f32 %v8850_v32, 0.0  ;;  %v8083_v53 = vrot.slane %v7955_v48, 4  ;;  %v8853_v58 = vadd.f32 %v11153_v22, %v8783_v47  ;;  %v8656_v2 = vadd.f32 %v8528_v52, %v8336_v55 }
 0x21d   :  { %v7891_v50 = vld [vmem:[#allocation2 + $0x98] sm:$0xf]  ;;  %v8916_v56 = vmax.f32 %v8852_v37, 0.0  ;;  %v8915_v57 = vmax.f32 %v8851_v46, 0.0  ;;  %v7956_v59 = vld [vmem:[#allocation2 + $0xa8] sm:$0xf0] }
 0x21e   :  { %v5908_v45 = vpop.f32.mrb[134].mxu0  ;;  %v8274_v60 = vld [vmem:[#allocation2 + $0x2c0] sm:$0xf]  ;;  %v8211_v62 = vadd.f32 %v8083_v53, %v7891_v50  ;;  %v8401_v0 = vld [vmem:[#allocation2 + $0x2c0] sm:$0xf0]  ;;  %v8917_v5 = vmax.f32 %v8853_v58, 0.0 }
 0x21f   :  { %7692 = vst [vmem:[#allocation2 + $0xc0] sm:$0xff] %v5908_v45  ;;  %v5910_v49 = vpop.f32.mrb[135].mxu0  ;;  %v5991_v54 = vpop.f32.mrb[142].mxu1  ;;  %v9036_v1 = vcombine.low %v8914_v17, %v8915_v57  ;;  %v7957_v6 = vld [vmem:[#allocation2 + $0xb0] sm:$0xf0]  ;;  %v8338_v7 = vadd.f32 %v8274_v60, %v8210_v51  ;;  %v8529_v8 = vrot.slane %v8401_v0, 4 }
 0x220   :  { %7693 = vst [vmem:[#allocation2 + $0xc8] sm:$0xff] %v5910_v49  ;;  %7694 = vst [vmem:[#allocation2 + $0xd0] sm:$0xff] %v5991_v54  ;;  %v8275_v10 = vld [vmem:[#allocation2 + $0x2c8] sm:$0xf]  ;;  %v8084_v13 = vrot.slane %v7956_v59, 4  ;;  %v5993_v12 = vpop.f32.mrb[143].mxu1  ;;  %v9037_v14 = vcombine.low %v8916_v56, %v8917_v5 }
 0x221   :  { %v7958_v11 = vld [vmem:[#allocation2 + $0xb8] sm:$0xf0]  ;;  %v8339_v16 = vadd.f32 %v8275_v10, %v8211_v62  ;;  %v8402_v41 = vld [vmem:[#allocation2 + $0x2c8] sm:$0xf0]  ;;  %9100 = vst [vmem:[#allocation4 + $0x30] sm:$0xff] %v9036_v1  ;;  %v8657_v21 = vadd.f32 %v8529_v8, %v8337_v61  ;;  %7695 = vst [vmem:[#allocation2 + $0xd8] sm:$0xff] %v5993_v12 }
 0x222   :  { %v5914_v18 = vpop.f32.mrb[136].mxu0  ;;  %v7892_v15 = vld [vmem:[#allocation2 + $0xa0] sm:$0xf]  ;;  %v7893_v63 = vld [vmem:[#allocation2 + $0xa8] sm:$0xf]  ;;  %v8530_v4 = vrot.slane %v8402_v41, 4 }
 0x223   :  { %7760 = vst [vmem:[#allocation2 + $0x2e0] sm:$0xff] %v5914_v18  ;;  %v8403_v20 = vld [vmem:[#allocation2 + $0x2d0] sm:$0xf0]  ;;  %v5916_v9 = vpop.f32.mrb[137].mxu0  ;;  %v8085_v23 = vrot.slane %v7957_v6, 4  ;;  %v5997_v25 = vpop.f32.mrb[144].mxu1  ;;  %v8212_v29 = vadd.f32 %v8084_v13, %v7892_v15 }
 0x224   :  { %v8531_v3 = vrot.slane %v8403_v20, 4  ;;  %v8720_v24 = vld [vmem:[#allocation2 + $0x4e0] sm:$0xf]  ;;  %7761 = vst [vmem:[#allocation2 + $0x2e8] sm:$0xff] %v5916_v9  ;;  %9101 = vst [vmem:[#allocation4 + $0x38] sm:$0xff] %v9037_v14  ;;  %v8086_v26 = vrot.slane %v7958_v11, 4  ;;  %v8658_v28 = vadd.f32 %v8530_v4, %v8338_v7 }
 0x225   :  { %v8784_v27 = vadd.f32 %v8720_v24, %v8656_v2  ;;  %v8722_v30 = vld [vmem:[#allocation2 + $0x4f0] sm:$0xf]  ;;  %v8721_v31 = vld [vmem:[#allocation2 + $0x4e8] sm:$0xf]  ;;  %7762 = vst [vmem:[#allocation2 + $0x2f0] sm:$0xff] %v5997_v25  ;;  %v5999_v32 = vpop.f32.mrb[145].mxu1  ;;  %v8213_v45 = vadd.f32 %v8085_v23, %v7893_v63 }
 0x226   :  { %v7894_v19 = vld [vmem:[#allocation2 + $0xb0] sm:$0xf]  ;;  %v8785_v33 = vadd.f32 %v8721_v31, %v8657_v21  ;;  %v8659_v34 = vadd.f32 %v8531_v3, %v8339_v16  ;;  %v8723_v35 = vld [vmem:[#allocation2 + $0x4f8] sm:$0xf]  ;;  %v7959_v36 = vld [vmem:[#allocation2 + $0xc0] sm:$0xf0]  ;;  %v8786_v40 = vadd.f32 %v8722_v30, %v8658_v28 }
 0x227   :  { %7763 = vst [vmem:[#allocation2 + $0x2f8] sm:$0xff] %v5999_v32  ;;  %v8276_v37 = vld [vmem:[#allocation2 + $0x2d0] sm:$0xf]  ;;  %v8404_v38 = vld [vmem:[#allocation2 + $0x2d8] sm:$0xf0]  ;;  %v8854_v39 = vadd.f32 %v11153_v22, %v8784_v27  ;;  %v8087_v43 = vrot.slane %v7959_v36, 4  ;;  %v8214_v49 = vadd.f32 %v8086_v26, %v7894_v19 }
 0x228   :  { %v5920_v44 = vpop.f32.mrb[138].mxu0  ;;  %v7895_v42 = vld [vmem:[#allocation2 + $0xb8] sm:$0xf]  ;;  %v8855_v46 = vadd.f32 %v11153_v22, %v8785_v33  ;;  %v8787_v47 = vadd.f32 %v8723_v35, %v8659_v34  ;;  %v6003_v48 = vpop.f32.mrb[146].mxu1  ;;  %v8856_v51 = vadd.f32 %v11153_v22, %v8786_v40  ;;  %v8340_v55 = vadd.f32 %v8276_v37, %v8212_v29  ;;  %v11175_v59 = vld [vmem:[#allocation2 + $0xc8] sm:$0xf0] }
 0x229   :  { %v8277_v17 = vld [vmem:[#allocation2 + $0x2d8] sm:$0xf]  ;;  %7828 = vst [vmem:[#allocation2 + $0x500] sm:$0xf] %v5920_v44  ;;  %v8918_v50 = vmax.f32 %v8854_v39, 0.0  ;;  %v8215_v52 = vadd.f32 %v8087_v43, %v7895_v42  ;;  %v8532_v56 = vrot.slane %v8404_v38, 4 }
 0x22a   :  { %v8278_v53 = vld [vmem:[#allocation2 + $0x2e0] sm:$0xf]  ;;  %v8405_v54 = vld [vmem:[#allocation2 + $0x2e0] sm:$0xf0]  ;;  %7830 = vst [vmem:[#allocation2 + $0x510] sm:$0xf] %v6003_v48  ;;  %v8857_v58 = vadd.f32 %v11153_v22, %v8787_v47  ;;  %v8341_v13 = vadd.f32 %v8277_v17, %v8213_v45 }
 0x22b   :  { %v8919_v57 = vmax.f32 %v8855_v46, 0.0  ;;  %v5922_v60 = vpop.f32.mrb[139].mxu0  ;;  %v8920_v61 = vmax.f32 %v8856_v51, 0.0  ;;  %v8342_v62 = vadd.f32 %v8278_v53, %v8214_v49  ;;  %v8533_v0 = vrot.slane %v8405_v54, 4  ;;  %v8279_v18 = vld [vmem:[#allocation2 + $0x2e8] sm:$0xf] }
 0x22c   :  { %7829 = vst [vmem:[#allocation2 + $0x508] sm:$0xf] %v5922_v60  ;;  %v6005_v1 = vpop.f32.mrb[147].mxu1  ;;  %v8921_v6 = vmax.f32 %v8857_v58, 0.0  ;;  %v8343_v7 = vadd.f32 %v8279_v18, %v8215_v52  ;;  %v8406_v8 = vld [vmem:[#allocation2 + $0x2e8] sm:$0xf0]  ;;  %v8660_v4 = vadd.f32 %v8532_v56, %v8340_v55 }
 0x22d   :  { %v9038_v5 = vcombine.low %v8918_v50, %v8919_v57  ;;  %7831 = vst [vmem:[#allocation2 + $0x518] sm:$0xf] %v6005_v1  ;;  %v6074_v10 = vpop.f32.mrb[140].mxu0  ;;  %v7961_v11 = vld [vmem:[#allocation2 + $0xd0] sm:$0xf0]  ;;  %v8534_v16 = vrot.slane %v8406_v8, 4  ;;  %v8661_v25 = vadd.f32 %v8533_v0, %v8341_v13 }
 0x22e   :  { %v8407_v41 = vld [vmem:[#allocation2 + $0x2f0] sm:$0xf0]  ;;  %7696 = vst [vmem:[#allocation2 + $0xe0] sm:$0xff] %v6074_v10  ;;  %v6076_v12 = vpop.f32.mrb[141].mxu0  ;;  %v9039_v14 = vcombine.low %v8920_v61, %v8921_v6  ;;  %v8088_v15 = vrot.slane %v11175_v59, 4  ;;  %v6157_v20 = vpop.f32.mrb[148].mxu1 }
 0x22f   :  { %9102 = vst [vmem:[#allocation4 + $0x40] sm:$0xff] %v9038_v5  ;;  %v8535_v63 = vrot.slane %v8407_v41, 4  ;;  %7697 = vst [vmem:[#allocation2 + $0xe8] sm:$0xff] %v6076_v12  ;;  %v11178_v21 = vld [vmem:[#allocation4 + $0xc] sm:$0xf]  ;;  %v8662_v24 = vadd.f32 %v8534_v16, %v8342_v62  ;;  %v6159_v26 = vpop.f32.mrb[149].mxu1 }
 0x230   :  { %v6080_v2 = vpop.f32.mrb[142].mxu0  ;;  %v11180_v9 = vld [vmem:[#allocation4 + $0x10] sm:$0xf]  ;;  %v7962_v23 = vld [vmem:[#allocation2 + $0xd8] sm:$0xf0]  ;;  %7698 = vst [vmem:[#allocation2 + $0xf0] sm:$0xff] %v6157_v20 }
 0x231   :  { %v8724_v3 = vld [vmem:[#allocation2 + $0x500] sm:$0xf]  ;;  %7764 = vst [vmem:[#allocation2 + $0x300] sm:$0xff] %v6080_v2  ;;  %v6082_v27 = vpop.f32.mrb[143].mxu0  ;;  %9103 = vst [vmem:[#allocation4 + $0x48] sm:$0xff] %v9039_v14  ;;  %v8089_v28 = vrot.slane %v7961_v11, 4  ;;  %v8663_v32 = vadd.f32 %v8535_v63, %v8343_v7  ;;  %v9135_v40 = vmax.f32 %v11178_v21, %v11180_v9 }
 0x232   :  { %v8788_v30 = vadd.f32 %v8724_v3, %v8660_v4  ;;  %v8726_v31 = vld [vmem:[#allocation2 + $0x510] sm:$0xf]  ;;  %7699 = vst [vmem:[#allocation2 + $0xf8] sm:$0xff] %v6159_v26  ;;  %7765 = vst [vmem:[#allocation2 + $0x308] sm:$0xff] %v6082_v27  ;;  %v6163_v29 = vpop.f32.mrb[150].mxu1  ;;  %v8090_v44 = vrot.slane %v7962_v23, 4 }
 0x233   :  { %v7896_v33 = vld [vmem:[#allocation2 + $0xc0] sm:$0xf]  ;;  %v7897_v34 = vld [vmem:[#allocation2 + $0xc8] sm:$0xf]  ;;  %v8790_v35 = vadd.f32 %v8726_v31, %v8662_v24  ;;  %7766 = vst [vmem:[#allocation2 + $0x310] sm:$0xff] %v6163_v29  ;;  %v6165_v36 = vpop.f32.mrb[151].mxu1 }
 0x234   :  { %v6086_v19 = vpop.f32.mrb[144].mxu0  ;;  %v11182_v38 = vld [vmem:[#allocation4] sm:$0xf]  ;;  %v11184_v39 = vld [vmem:[#allocation4 + $0x4] sm:$0xf]  ;;  %v8858_v45 = vadd.f32 %v11153_v22, %v8788_v30  ;;  %7767 = vst [vmem:[#allocation2 + $0x318] sm:$0xff] %v6165_v36  ;;  %v8216_v47 = vadd.f32 %v8088_v15, %v7896_v33  ;;  %v8217_v53 = vadd.f32 %v8089_v28, %v7897_v34 }
 0x235   :  { %7832 = vst [vmem:[#allocation2 + $0x520] sm:$0xf] %v6086_v19  ;;  %v6088_v37 = vpop.f32.mrb[145].mxu0  ;;  %v7898_v43 = vld [vmem:[#allocation2 + $0xd0] sm:$0xf]  ;;  %v6169_v17 = vpop.f32.mrb[152].mxu1  ;;  %v8860_v49 = vadd.f32 %v11153_v22, %v8790_v35  ;;  %v9128_v8 = vmax.f32 %v11182_v38, %v11184_v39 }
 0x236   :  { %v8725_v42 = vld [vmem:[#allocation2 + $0x508] sm:$0xf]  ;;  %7833 = vst [vmem:[#allocation2 + $0x528] sm:$0xf] %v6088_v37  ;;  %v9136_v46 = vld [vmem:[#allocation4 + $0x14] sm:$0xf]  ;;  %v8218_v18 = vadd.f32 %v8090_v44, %v7898_v43 }
 0x237   :  { %v8280_v48 = vld [vmem:[#allocation2 + $0x2f0] sm:$0xf]  ;;  %v8789_v50 = vadd.f32 %v8725_v42, %v8661_v25  ;;  %v8727_v51 = vld [vmem:[#allocation2 + $0x518] sm:$0xf]  ;;  %7834 = vst [vmem:[#allocation2 + $0x530] sm:$0xf] %v6169_v17  ;;  %v11191_v0 = vmax.f32 %v9135_v40, %v9136_v46 }
 0x238   :  { %v6171_v52 = vpop.f32.mrb[153].mxu1  ;;  %v8408_v54 = vld [vmem:[#allocation2 + $0x2f8] sm:$0xf0]  ;;  %v8791_v55 = vadd.f32 %v8727_v51, %v8663_v32  ;;  %v7963_v56 = vld [vmem:[#allocation2 + $0xe0] sm:$0xf0]  ;;  %v8922_v60 = vmax.f32 %v8858_v45, 0.0  ;;  %v8344_v13 = vadd.f32 %v8280_v48, %v8216_v47 }
 0x239   :  { %7835 = vst [vmem:[#allocation2 + $0x538] sm:$0xf] %v6171_v52  ;;  %v6240_v57 = vpop.f32.mrb[146].mxu0  ;;  %v7899_v58 = vld [vmem:[#allocation2 + $0xd8] sm:$0xf]  ;;  %v8859_v61 = vadd.f32 %v11153_v22, %v8789_v50  ;;  %v8091_v62 = vrot.slane %v7963_v56, 4 }
 0x23a   :  { %v8281_v59 = vld [vmem:[#allocation2 + $0x2f8] sm:$0xf]  ;;  %7700 = vst [vmem:[#allocation2 + $0x100] sm:$0xff] %v6240_v57  ;;  %v8924_v1 = vmax.f32 %v8860_v49, 0.0  ;;  %v8861_v5 = vadd.f32 %v11153_v22, %v8791_v55  ;;  %v7964_v6 = vld [vmem:[#allocation2 + $0xe8] sm:$0xf0] }
 0x23b   :  { %v6242_v7 = vpop.f32.mrb[147].mxu0  ;;  %v11196_v10 = vld [vmem:[#allocation4 + $0x20] sm:$0xf]  ;;  %v8536_v11 = vrot.slane %v8408_v54, 4  ;;  %v8923_v16 = vmax.f32 %v8859_v61, 0.0  ;;  %v8219_v41 = vadd.f32 %v8091_v62, %v7899_v58  ;;  %v8345_v15 = vadd.f32 %v8281_v59, %v8217_v53  ;;  %v6323_v27 = vpop.f32.mrb[154].mxu1 }
 0x23c   :  { %v8282_v12 = vld [vmem:[#allocation2 + $0x300] sm:$0xf]  ;;  %v8409_v14 = vld [vmem:[#allocation2 + $0x300] sm:$0xf0]  ;;  %7701 = vst [vmem:[#allocation2 + $0x108] sm:$0xff] %v6242_v7  ;;  %v8925_v63 = vmax.f32 %v8861_v5, 0.0 }
 0x23d   :  { %v8346_v4 = vadd.f32 %v8282_v12, %v8218_v18  ;;  %v8537_v20 = vrot.slane %v8409_v14, 4  ;;  %v9138_v2 = vld [vmem:[#allocation4 + $0x18] sm:$0xf]  ;;  %v9149_v23 = vld [vmem:[#allocation4 + $0x1c] sm:$0xf]  ;;  %v9040_v3 = vcombine.low %v8922_v60, %v8923_v16  ;;  %v8092_v24 = vrot.slane %v7964_v6, 4 }
 0x23e   :  { %v8283_v25 = vld [vmem:[#allocation2 + $0x308] sm:$0xf]  ;;  %v8410_v26 = vld [vmem:[#allocation2 + $0x308] sm:$0xf0]  ;;  %v9139_v30 = vmax.f32 %v11191_v0, %v9138_v2  ;;  %v9151_v31 = vmax.f32 %v9149_v23, %v11196_v10  ;;  %v9041_v32 = vcombine.low %v8924_v1, %v8925_v63  ;;  %v7965_v29 = vld [vmem:[#allocation2 + $0xf0] sm:$0xf0]  ;;  %v8664_v40 = vadd.f32 %v8536_v11, %v8344_v13 }
 0x23f   :  { %v9129_v28 = vld [vmem:[#allocation4 + $0x8] sm:$0xf]  ;;  %v8347_v19 = vadd.f32 %v8283_v25, %v8219_v41  ;;  %v8538_v33 = vrot.slane %v8410_v26, 4  ;;  %v8411_v34 = vld [vmem:[#allocation2 + $0x310] sm:$0xf0]  ;;  %v8665_v35 = vadd.f32 %v8537_v20, %v8345_v15  ;;  %7702 = vst [vmem:[#allocation2 + $0x110] sm:$0xff] %v6323_v27 }
 0x240   :  { %v6246_v36 = vpop.f32.mrb[148].mxu0  ;;  %9104 = vst [vmem:[#allocation4 + $0x50] sm:$0xff] %v9040_v3  ;;  %v7900_v37 = vld [vmem:[#allocation2 + $0xe0] sm:$0xf]  ;;  %v11200_v38 = vld [vmem:[#allocation2 + $0xf8] sm:$0xf0]  ;;  %v11202_v50 = vmax.f32 %v9128_v8, %v9129_v28 }
 0x241   :  { %v8539_v39 = vrot.slane %v8411_v34, 4  ;;  %7768 = vst [vmem:[#allocation2 + $0x320] sm:$0xff] %v6246_v36  ;;  %v6325_v43 = vpop.f32.mrb[155].mxu1  ;;  %v9140_v44 = vld [vmem:[#allocation4 + $0x1c] sm:$0xf]  ;;  %9105 = vst [vmem:[#allocation4 + $0x58] sm:$0xff] %v9041_v32  ;;  %v8666_v47 = vadd.f32 %v8538_v33, %v8346_v4  ;;  %v8220_v51 = vadd.f32 %v8092_v24, %v7900_v37 }
 0x242   :  { %v9142_v45 = vld [vmem:[#allocation4 + $0x20] sm:$0xf]  ;;  %v9152_v42 = vld [vmem:[#allocation4 + $0x24] sm:$0xf]  ;;  %v7901_v17 = vld [vmem:[#allocation2 + $0xe8] sm:$0xf]  ;;  %v9141_v0 = vmax.f32 %v9139_v30, %v9140_v44 }
 0x243   :  { %v8728_v46 = vld [vmem:[#allocation2 + $0x520] sm:$0xf]  ;;  %v8730_v48 = vld [vmem:[#allocation2 + $0x530] sm:$0xf]  ;;  %7703 = vst [vmem:[#allocation2 + $0x118] sm:$0xff] %v6325_v43  ;;  %v6248_v49 = vpop.f32.mrb[149].mxu0  ;;  %v8667_v55 = vadd.f32 %v8539_v39, %v8347_v19  ;;  %v11208_v18 = vmax.f32 %v9151_v31, %v9152_v42 }
 0x244   :  { %v8093_v52 = vrot.slane %v7965_v29, 4  ;;  %v8792_v53 = vadd.f32 %v8728_v46, %v8664_v40  ;;  %v8729_v54 = vld [vmem:[#allocation2 + $0x528] sm:$0xf]  ;;  %v8731_v56 = vld [vmem:[#allocation2 + $0x538] sm:$0xf]  ;;  %7769 = vst [vmem:[#allocation2 + $0x328] sm:$0xff] %v6248_v49  ;;  %v8794_v60 = vadd.f32 %v8730_v48, %v8666_v47  ;;  %v11216_v14 = vmax.f32 %v9141_v0, %v9142_v45 }
 0x245   :  { %v11204_v57 = vld [vmem:[#allocation4 + $0x2c] sm:$0xf]  ;;  %v8284_v58 = vld [vmem:[#allocation2 + $0x310] sm:$0xf]  ;;  %v11206_v59 = vld [vmem:[#allocation2 + $0x318] sm:$0xf0]  ;;  %v8793_v61 = vadd.f32 %v8729_v54, %v8665_v35  ;;  %v8795_v6 = vadd.f32 %v8731_v56, %v8667_v55  ;;  %v9132_v48 = vmax.f32 %v11202_v50, %v11178_v21 }
 0x246   :  { %v7967_v62 = vld [vmem:[#allocation2 + $0x100] sm:$0xf0]  ;;  %v8094_v1 = vrot.slane %v11200_v38, 4  ;;  %v8862_v5 = vadd.f32 %v11153_v22, %v8792_v53  ;;  %v6329_v8 = vpop.f32.mrb[156].mxu1  ;;  %v11212_v10 = vld [vmem:[#allocation4 + $0x30] sm:$0xf]  ;;  %v8864_v41 = vadd.f32 %v11153_v22, %v8794_v60  ;;  %v8221_v4 = vadd.f32 %v8093_v52, %v7901_v17 }
 0x247   :  { %v8095_v7 = vrot.slane %v7967_v62, 4  ;;  %v6252_v13 = vpop.f32.mrb[150].mxu0  ;;  %v7902_v11 = vld [vmem:[#allocation2 + $0xf0] sm:$0xf]  ;;  %v7903_v16 = vld [vmem:[#allocation2 + $0xf8] sm:$0xf]  ;;  %v8863_v12 = vadd.f32 %v11153_v22, %v8793_v61  ;;  %v9160_v63 = vmax.f32 %v11204_v57, %v11212_v10  ;;  %v8348_v20 = vadd.f32 %v8284_v58, %v8220_v51 }
 0x248   :  { %7770 = vst [vmem:[#allocation2 + $0x330] sm:$0xff] %v6329_v8  ;;  %v9154_v15 = vld [vmem:[#allocation4 + $0x28] sm:$0xf]  ;;  %7836 = vst [vmem:[#allocation2 + $0x540] sm:$0xf] %v6252_v13  ;;  %v8926_v23 = vmax.f32 %v8862_v5, 0.0  ;;  %v8865_v3 = vadd.f32 %v11153_v22, %v8795_v6  ;;  %v8222_v19 = vadd.f32 %v8094_v1, %v7902_v11  ;;  %v9145_v21 = vcombine.low %v11216_v14, %v11216_v14 }
 0x249   :  { %v8285_v2 = vld [vmem:[#allocation2 + $0x318] sm:$0xf]  ;;  %v9161_v24 = vld [vmem:[#allocation4 + $0x34] sm:$0xf]  ;;  %v6331_v25 = vpop.f32.mrb[157].mxu1  ;;  %v8540_v26 = vrot.slane %v11206_v59, 4  ;;  %v8223_v34 = vadd.f32 %v8095_v7, %v7903_v16  ;;  %v9155_v36 = vmax.f32 %v11208_v18, %v9154_v15 }
 0x24a   :  { %v8928_v27 = vmax.f32 %v8864_v41, 0.0  ;;  %v8927_v28 = vmax.f32 %v8863_v12, 0.0  ;;  %v11222_v30 = vld [vmem:[#allocation2 + $0x108] sm:$0xf0]  ;;  %v8286_v31 = vld [vmem:[#allocation2 + $0x320] sm:$0xf]  ;;  %v9162_v32 = vmax.f32 %v9160_v63, %v9161_v24  ;;  %v8349_v52 = vadd.f32 %v8285_v2, %v8221_v4 }
 0x24b   :  { %7771 = vst [vmem:[#allocation2 + $0x338] sm:$0xff] %v6331_v25  ;;  %v6335_v29 = vpop.f32.mrb[158].mxu1  ;;  %v8929_v33 = vmax.f32 %v8865_v3, 0.0  ;;  %v8413_v35 = vld [vmem:[#allocation2 + $0x320] sm:$0xf0]  ;;  %v6254_v38 = vpop.f32.mrb[151].mxu0  ;;  %v8350_v46 = vadd.f32 %v8286_v31, %v8222_v19  ;;  %v8668_v56 = vadd.f32 %v8540_v26, %v8348_v20  ;;  %v9157_v50 = vmax.f32 %v9155_v36, %v11204_v57 }
 0x24c   :  { %v9163_v37 = vld [vmem:[#allocation4 + $0x38] sm:$0xf]  ;;  %7838 = vst [vmem:[#allocation2 + $0x550] sm:$0xf] %v6335_v29  ;;  %v9042_v39 = vcombine.low %v8926_v23, %v8927_v28  ;;  %v8541_v40 = vrot.slane %v8413_v35, 4  ;;  %v6337_v42 = vpop.f32.mrb[159].mxu1  ;;  %v9134_v57 = vmax.f32 %v9132_v48, %v11180_v9 }
 0x24d   :  { %v8287_v43 = vld [vmem:[#allocation2 + $0x328] sm:$0xf]  ;;  %v9164_v44 = vmax.f32 %v9162_v32, %v9163_v37  ;;  %v9165_v45 = vld [vmem:[#allocation4 + $0x3c] sm:$0xf]  ;;  %7837 = vst [vmem:[#allocation2 + $0x548] sm:$0xf] %v6254_v38  ;;  %v9043_v17 = vcombine.low %v8928_v27, %v8929_v33  ;;  %v9159_v4 = vmax.f32 %v9157_v50, %v11212_v10 }
 0x24e   :  { %v8414_v47 = vld [vmem:[#allocation2 + $0x328] sm:$0xf0]  ;;  %v9167_v49 = vld [vmem:[#allocation4 + $0x40] sm:$0xf]  ;;  %7839 = vst [vmem:[#allocation2 + $0x558] sm:$0xf] %v6337_v42  ;;  %v8351_v61 = vadd.f32 %v8287_v43, %v8223_v34  ;;  %v8669_v7 = vadd.f32 %v8541_v40, %v8349_v52  ;;  %v9147_v10 = vsel %vm4709_vm2, %v9134_v57, %v9145_v21 }
 0x24f   :  { %v6406_v51 = vpop.f32.mrb[152].mxu0  ;;  %9106 = vst [vmem:[#allocation4 + $0x60] sm:$0xff] %v9042_v39  ;;  %v7969_v53 = vld [vmem:[#allocation2 + $0x110] sm:$0xf0]  ;;  %v8542_v54 = vrot.slane %v8414_v47, 4  ;;  %v9166_v55 = vmax.f32 %v9164_v44, %v9165_v45  ;;  %v6489_v59 = vpop.f32.mrb[160].mxu1 }
 0x250   :  { %7704 = vst [vmem:[#allocation2 + $0x120] sm:$0xff] %v6406_v51  ;;  %v6408_v58 = vpop.f32.mrb[153].mxu0  ;;  %9107 = vst [vmem:[#allocation4 + $0x68] sm:$0xff] %v9043_v17  ;;  %v8096_v60 = vrot.slane %v11222_v30, 4  ;;  %v8415_v62 = vld [vmem:[#allocation2 + $0x330] sm:$0xf0] }
 0x251   :  { %v8732_v0 = vld [vmem:[#allocation2 + $0x540] sm:$0xf]  ;;  %7705 = vst [vmem:[#allocation2 + $0x128] sm:$0xff] %v6408_v58  ;;  %7706 = vst [vmem:[#allocation2 + $0x130] sm:$0xff] %v6489_v59  ;;  %v7970_v18 = vld [vmem:[#allocation2 + $0x118] sm:$0xf0]  ;;  %v9168_v5 = vmax.f32 %v9166_v55, %v9167_v49  ;;  %v8670_v12 = vadd.f32 %v8542_v54, %v8350_v46 }
 0x252   :  { %v8543_v1 = vrot.slane %v8415_v62, 4  ;;  %v8796_v6 = vadd.f32 %v8732_v0, %v8668_v56  ;;  %v6412_v8 = vpop.f32.mrb[154].mxu0  ;;  %v6491_v13 = vpop.f32.mrb[161].mxu1  ;;  %v7904_v11 = vld [vmem:[#allocation2 + $0x100] sm:$0xf]  ;;  %v8097_v41 = vrot.slane %v7969_v53, 4 }
 0x253   :  { %v7905_v16 = vld [vmem:[#allocation2 + $0x108] sm:$0xf]  ;;  %7772 = vst [vmem:[#allocation2 + $0x340] sm:$0xff] %v6412_v8  ;;  %7707 = vst [vmem:[#allocation2 + $0x138] sm:$0xff] %v6491_v13  ;;  %v6414_v15 = vpop.f32.mrb[155].mxu0  ;;  %v6495_v14 = vpop.f32.mrb[162].mxu1  ;;  %v9170_v20 = vcombine.low %v9168_v5, %v9168_v5  ;;  %v8224_v32 = vadd.f32 %v8096_v60, %v7904_v11 }
 0x254   :  { %v7906_v63 = vld [vmem:[#allocation2 + $0x110] sm:$0xf]  ;;  %v8866_v2 = vadd.f32 %v11153_v22, %v8796_v6  ;;  %7773 = vst [vmem:[#allocation2 + $0x348] sm:$0xff] %v6414_v15  ;;  %7774 = vst [vmem:[#allocation2 + $0x350] sm:$0xff] %v6495_v14  ;;  %v6497_v3 = vpop.f32.mrb[163].mxu1  ;;  %v6418_v24 = vpop.f32.mrb[156].mxu0  ;;  %v8671_v28 = vadd.f32 %v8543_v1, %v8351_v61  ;;  %v8225_v36 = vadd.f32 %v8097_v41, %v7905_v16 }
 0x255   :  { %v8734_v23 = vld [vmem:[#allocation2 + $0x550] sm:$0xf]  ;;  %v8098_v25 = vrot.slane %v7970_v18, 4  ;;  %v8733_v27 = vld [vmem:[#allocation2 + $0x548] sm:$0xf]  ;;  %7775 = vst [vmem:[#allocation2 + $0x358] sm:$0xff] %v6497_v3  ;;  %v9172_v29 = vsel %vm4709_vm2, %v9159_v4, %v9170_v20 }
 0x256   :  { %v8798_v26 = vadd.f32 %v8734_v23, %v8670_v12  ;;  %7840 = vst [vmem:[#allocation2 + $0x560] sm:$0xf] %v6418_v24  ;;  %v6501_v30 = vpop.f32.mrb[164].mxu1  ;;  %v6420_v31 = vpop.f32.mrb[157].mxu0  ;;  %v8288_v9 = vld [vmem:[#allocation2 + $0x330] sm:$0xf]  ;;  %v8797_v19 = vadd.f32 %v8733_v27, %v8669_v7  ;;  %v9878_v37 = vpack.c.bf16 %v9172_v29, %v9147_v10 }
 0x257   :  { %v8735_v33 = vld [vmem:[#allocation2 + $0x558] sm:$0xf]  ;;  %7842 = vst [vmem:[#allocation2 + $0x570] sm:$0xf] %v6501_v30  ;;  %7841 = vst [vmem:[#allocation2 + $0x568] sm:$0xf] %v6420_v31  ;;  %v8226_v51 = vadd.f32 %v8098_v25, %v7906_v63  ;;  %v8352_v54 = vadd.f32 %v8288_v9, %v8224_v32 }
 0x258   :  { %v6503_v34 = vpop.f32.mrb[165].mxu1  ;;  %v6572_v35 = vpop.f32.mrb[158].mxu0  ;;  %v8416_v38 = vld [vmem:[#allocation2 + $0x338] sm:$0xf0]  ;;  %v8868_v39 = vadd.f32 %v11153_v22, %v8798_v26  ;;  %v8799_v40 = vadd.f32 %v8735_v33, %v8671_v28  ;;  %v7971_v43 = vld [vmem:[#allocation2 + $0x120] sm:$0xf0]  ;;  %v8867_v46 = vadd.f32 %v11153_v22, %v8797_v19  ;;  %9879 = vmatprep.subr.bf16.mxu0 %v9878_v37 }
 0x259   :  { %7843 = vst [vmem:[#allocation2 + $0x578] sm:$0xf] %v6503_v34  ;;  %7708 = vst [vmem:[#allocation2 + $0x140] sm:$0xff] %v6572_v35  ;;  %v6574_v44 = vpop.f32.mrb[159].mxu0  ;;  %v6655_v45 = vpop.f32.mrb[166].mxu1  ;;  %v8930_v17 = vmax.f32 %v8866_v2, 0.0  ;;  %9881 = vmatpush3.bf16.msra.mxu0 %v9878_v37 }
 0x25a   :  { %v8289_v42 = vld [vmem:[#allocation2 + $0x338] sm:$0xf]  ;;  %v8099_v47 = vrot.slane %v7971_v43, 4  ;;  %7709 = vst [vmem:[#allocation2 + $0x148] sm:$0xff] %v6574_v44  ;;  %7710 = vst [vmem:[#allocation2 + $0x150] sm:$0xff] %v6655_v45  ;;  %v6657_v48 = vpop.f32.mrb[167].mxu1  ;;  %v8869_v53 = vadd.f32 %v11153_v22, %v8799_v40 }
 0x25b   :  { %v7907_v49 = vld [vmem:[#allocation2 + $0x118] sm:$0xf]  ;;  %v8932_v52 = vmax.f32 %v8868_v39, 0.0  ;;  %7711 = vst [vmem:[#allocation2 + $0x158] sm:$0xff] %v6657_v48  ;;  %v8544_v55 = vrot.slane %v8416_v38, 4  ;;  %v8931_v56 = vmax.f32 %v8867_v46, 0.0  ;;  %v8353_v61 = vadd.f32 %v8289_v42, %v8225_v36 }
 0x25c   :  { %v8227_v58 = vadd.f32 %v8099_v47, %v7907_v49  ;;  %v8290_v59 = vld [vmem:[#allocation2 + $0x340] sm:$0xf]  ;;  %v8417_v60 = vld [vmem:[#allocation2 + $0x340] sm:$0xf0]  ;;  %v8933_v62 = vmax.f32 %v8869_v53, 0.0  ;;  %v6578_v7 = vpop.f32.mrb[160].mxu0 }
 0x25d   :  { %v7972_v21 = vld [vmem:[#allocation2 + $0x128] sm:$0xf0]  ;;  %v8354_v50 = vadd.f32 %v8290_v59, %v8226_v51  ;;  %v8545_v0 = vrot.slane %v8417_v60, 4  ;;  %v7974_v18 = vld [vmem:[#allocation2 + $0x138] sm:$0xf0]  ;;  %v9044_v1 = vcombine.low %v8930_v17, %v8931_v56  ;;  %7776 = vst [vmem:[#allocation2 + $0x360] sm:$0xff] %v6578_v7  ;;  %v8672_v57 = vadd.f32 %v8544_v55, %v8352_v54 }
 0x25e   :  { %v8291_v5 = vld [vmem:[#allocation2 + $0x348] sm:$0xf]  ;;  %v8418_v6 = vld [vmem:[#allocation2 + $0x348] sm:$0xf0]  ;;  %v9045_v8 = vcombine.low %v8932_v52, %v8933_v62  ;;  %v8419_v16 = vld [vmem:[#allocation2 + $0x350] sm:$0xf0] }
 0x25f   :  { %v8355_v13 = vadd.f32 %v8291_v5, %v8227_v58  ;;  %v8546_v11 = vrot.slane %v8418_v6, 4  ;;  %v8673_v41 = vadd.f32 %v8545_v0, %v8353_v61  ;;  %v6580_v12 = vpop.f32.mrb[161].mxu0  ;;  %9108 = vst [vmem:[#allocation4 + $0x70] sm:$0xff] %v9044_v1  ;;  %v8100_v15 = vrot.slane %v7972_v21, 4  ;;  %v7973_v14 = vld [vmem:[#allocation2 + $0x130] sm:$0xf0] }
 0x260   :  { %v8547_v63 = vrot.slane %v8419_v16, 4  ;;  %7777 = vst [vmem:[#allocation2 + $0x368] sm:$0xff] %v6580_v12  ;;  %v6661_v4 = vpop.f32.mrb[168].mxu1  ;;  %9109 = vst [vmem:[#allocation4 + $0x78] sm:$0xff] %v9045_v8  ;;  %v8102_v20 = vrot.slane %v7974_v18, 4  ;;  %v8101_v32 = vrot.slane %v7973_v14, 4 }
 0x261   :  { %v8736_v2 = vld [vmem:[#allocation2 + $0x560] sm:$0xf]  ;;  %v8674_v23 = vadd.f32 %v8546_v11, %v8354_v50  ;;  %v8738_v3 = vld [vmem:[#allocation2 + $0x570] sm:$0xf]  ;;  %7778 = vst [vmem:[#allocation2 + $0x370] sm:$0xff] %v6661_v4  ;;  %v6663_v24 = vpop.f32.mrb[169].mxu1 }
 0x262   :  { %v7910_v25 = vld [vmem:[#allocation2 + $0x130] sm:$0xf]  ;;  %v8800_v26 = vadd.f32 %v8736_v2, %v8672_v57  ;;  %v8737_v27 = vld [vmem:[#allocation2 + $0x568] sm:$0xf]  ;;  %v8675_v28 = vadd.f32 %v8547_v63, %v8355_v13  ;;  %v8739_v30 = vld [vmem:[#allocation2 + $0x578] sm:$0xf] }
 0x263   :  { %7779 = vst [vmem:[#allocation2 + $0x378] sm:$0xff] %v6663_v24  ;;  %v7908_v31 = vld [vmem:[#allocation2 + $0x120] sm:$0xf]  ;;  %v8802_v9 = vadd.f32 %v8738_v3, %v8674_v23  ;;  %v8801_v10 = vadd.f32 %v8737_v27, %v8673_v41  ;;  %v7975_v29 = vld [vmem:[#allocation2 + $0x140] sm:$0xf0]  ;;  %v8230_v38 = vadd.f32 %v8102_v20, %v7910_v25  ;;  %v6584_v45 = vpop.f32.mrb[162].mxu0 }
 0x264   :  { %v7909_v19 = vld [vmem:[#allocation2 + $0x128] sm:$0xf]  ;;  %v8228_v33 = vadd.f32 %v8100_v15, %v7908_v31  ;;  %v7911_v34 = vld [vmem:[#allocation2 + $0x138] sm:$0xf]  ;;  %v8870_v35 = vadd.f32 %v11153_v22, %v8800_v26  ;;  %v8803_v36 = vadd.f32 %v8739_v30, %v8675_v28  ;;  %v8103_v37 = vrot.slane %v7975_v29, 4  ;;  %v6667_v51 = vpop.f32.mrb[170].mxu1 }
 0x265   :  { %v8292_v39 = vld [vmem:[#allocation2 + $0x350] sm:$0xf]  ;;  %v8420_v40 = vld [vmem:[#allocation2 + $0x358] sm:$0xf0]  ;;  %v8872_v43 = vadd.f32 %v11153_v22, %v8802_v9  ;;  %v8871_v44 = vadd.f32 %v11153_v22, %v8801_v10  ;;  %v8293_v42 = vld [vmem:[#allocation2 + $0x358] sm:$0xf]  ;;  %v8229_v52 = vadd.f32 %v8101_v32, %v7909_v19 }
 0x266   :  { %v8934_v17 = vmax.f32 %v8870_v35, 0.0  ;;  %v8873_v46 = vadd.f32 %v11153_v22, %v8803_v36  ;;  %v8231_v47 = vadd.f32 %v8103_v37, %v7911_v34  ;;  %v8294_v48 = vld [vmem:[#allocation2 + $0x360] sm:$0xf]  ;;  %v8421_v49 = vld [vmem:[#allocation2 + $0x360] sm:$0xf0]  ;;  %v8356_v59 = vadd.f32 %v8292_v39, %v8228_v33  ;;  %v6586_v21 = vpop.f32.mrb[163].mxu0 }
 0x267   :  { %7844 = vst [vmem:[#allocation2 + $0x580] sm:$0xf] %v6584_v45  ;;  %v8936_v53 = vmax.f32 %v8872_v43, 0.0  ;;  %v8935_v54 = vmax.f32 %v8871_v44, 0.0  ;;  %v8358_v55 = vadd.f32 %v8294_v48, %v8230_v38  ;;  %v8295_v56 = vld [vmem:[#allocation2 + $0x368] sm:$0xf]  ;;  %v8357_v41 = vadd.f32 %v8293_v42, %v8229_v52 }
 0x268   :  { %v8422_v58 = vld [vmem:[#allocation2 + $0x368] sm:$0xf0]  ;;  %7846 = vst [vmem:[#allocation2 + $0x590] sm:$0xf] %v6667_v51  ;;  %v8548_v60 = vrot.slane %v8420_v40, 4  ;;  %v8937_v61 = vmax.f32 %v8873_v46, 0.0  ;;  %v8359_v7 = vadd.f32 %v8295_v56, %v8231_v47 }
 0x269   :  { %v7976_v62 = vld [vmem:[#allocation2 + $0x148] sm:$0xf0]  ;;  %v9046_v50 = vcombine.low %v8934_v17, %v8935_v54  ;;  %v8549_v0 = vrot.slane %v8421_v49, 4  ;;  %v8550_v18 = vrot.slane %v8422_v58, 4  ;;  %v8423_v1 = vld [vmem:[#allocation2 + $0x370] sm:$0xf0] }
 0x26a   :  { %7845 = vst [vmem:[#allocation2 + $0x588] sm:$0xf] %v6586_v21  ;;  %v6669_v5 = vpop.f32.mrb[171].mxu1  ;;  %v9047_v6 = vcombine.low %v8936_v53, %v8937_v61  ;;  %v8551_v8 = vrot.slane %v8423_v1, 4  ;;  %v6738_v13 = vpop.f32.mrb[164].mxu0  ;;  %v9322_v16 = vld [vmem:[%s11391_s5] sm:$0xff]  ;;  %v8676_v4 = vadd.f32 %v8548_v60, %v8356_v59 }
 0x26b   :  { %7847 = vst [vmem:[#allocation2 + $0x598] sm:$0xf] %v6669_v5  ;;  %v6821_v11 = vpop.f32.mrb[172].mxu1  ;;  %9110 = vst [vmem:[#allocation4 + $0x80] sm:$0xff] %v9046_v50  ;;  %v7977_v12 = vld [vmem:[#allocation2 + $0x150] sm:$0xf0]  ;;  %v8678_v15 = vadd.f32 %v8550_v18, %v8358_v55  ;;  %9872 = vmatprep.mubr.msk.f32.mxu0 %vm9358_vm4, %v9322_v16  ;;  %v8677_v24 = vadd.f32 %v8549_v0, %v8357_v41 }
 0x26c   :  { %7712 = vst [vmem:[#allocation2 + $0x160] sm:$0xff] %v6738_v13  ;;  %v6740_v14 = vpop.f32.mrb[165].mxu0  ;;  %7714 = vst [vmem:[#allocation2 + $0x170] sm:$0xff] %v6821_v11  ;;  %v6823_v63 = vpop.f32.mrb[173].mxu1  ;;  %v8104_v57 = vrot.slane %v7976_v62, 4  ;;  %v8105_v27 = vrot.slane %v7977_v12, 4  ;;  %v8679_v31 = vadd.f32 %v8551_v8, %v8359_v7 }
 0x26d   :  { %9111 = vst [vmem:[#allocation4 + $0x88] sm:$0xff] %v9047_v6  ;;  %7713 = vst [vmem:[#allocation2 + $0x168] sm:$0xff] %v6740_v14  ;;  %v6744_v20 = vpop.f32.mrb[166].mxu0  ;;  %v6827_v2 = vpop.f32.mrb[174].mxu1  ;;  %v7978_v23 = vld [vmem:[#allocation2 + $0x158] sm:$0xf0] }
 0x26e   :  { %7715 = vst [vmem:[#allocation2 + $0x178] sm:$0xff] %v6823_v63  ;;  %v8740_v3 = vld [vmem:[#allocation2 + $0x580] sm:$0xf]  ;;  %7780 = vst [vmem:[#allocation2 + $0x380] sm:$0xff] %v6744_v20  ;;  %v6746_v25 = vpop.f32.mrb[167].mxu0  ;;  %v6829_v26 = vpop.f32.mrb[175].mxu1 }
 0x26f   :  { %7782 = vst [vmem:[#allocation2 + $0x390] sm:$0xff] %v6827_v2  ;;  %v8804_v28 = vadd.f32 %v8740_v3, %v8676_v4  ;;  %v8742_v30 = vld [vmem:[#allocation2 + $0x590] sm:$0xf]  ;;  %7781 = vst [vmem:[#allocation2 + $0x388] sm:$0xff] %v6746_v25  ;;  %v6750_v32 = vpop.f32.mrb[168].mxu0  ;;  %v6833_v9 = vpop.f32.mrb[176].mxu1 }
 0x270   :  { %7783 = vst [vmem:[#allocation2 + $0x398] sm:$0xff] %v6829_v26  ;;  %v7912_v10 = vld [vmem:[#allocation2 + $0x140] sm:$0xf]  ;;  %v7913_v29 = vld [vmem:[#allocation2 + $0x148] sm:$0xf]  ;;  %v8806_v19 = vadd.f32 %v8742_v30, %v8678_v15  ;;  %v6752_v33 = vpop.f32.mrb[169].mxu0 }
 0x271   :  { %7848 = vst [vmem:[#allocation2 + $0x5a0] sm:$0xf] %v6750_v32  ;;  %7850 = vst [vmem:[#allocation2 + $0x5b0] sm:$0xf] %v6833_v9  ;;  %v6835_v34 = vpop.f32.mrb[177].mxu1  ;;  %v8106_v35 = vrot.slane %v7978_v23, 4  ;;  %v8874_v36 = vadd.f32 %v11153_v22, %v8804_v28  ;;  %v8232_v40 = vadd.f32 %v8104_v57, %v7912_v10  ;;  %v8233_v47 = vadd.f32 %v8105_v27, %v7913_v29 }
 0x272   :  { %v8741_v37 = vld [vmem:[#allocation2 + $0x588] sm:$0xf]  ;;  %7849 = vst [vmem:[#allocation2 + $0x5a8] sm:$0xf] %v6752_v33  ;;  %7851 = vst [vmem:[#allocation2 + $0x5b8] sm:$0xf] %v6835_v34  ;;  %v8876_v44 = vadd.f32 %v11153_v22, %v8806_v19 }
 0x273   :  { %v6904_v38 = vpop.f32.mrb[170].mxu0  ;;  %v6987_v39 = vpop.f32.mrb[178].mxu1  ;;  %v7914_v43 = vld [vmem:[#allocation2 + $0x150] sm:$0xf]  ;;  %v8805_v45 = vadd.f32 %v8741_v37, %v8677_v24  ;;  %v8743_v42 = vld [vmem:[#allocation2 + $0x598] sm:$0xf] }
 0x274   :  { %7716 = vst [vmem:[#allocation2 + $0x180] sm:$0xff] %v6904_v38  ;;  %v6906_v17 = vpop.f32.mrb[171].mxu0  ;;  %7718 = vst [vmem:[#allocation2 + $0x190] sm:$0xff] %v6987_v39  ;;  %v6989_v46 = vpop.f32.mrb[179].mxu1  ;;  %v8296_v48 = vld [vmem:[#allocation2 + $0x370] sm:$0xf]  ;;  %v8807_v51 = vadd.f32 %v8743_v42, %v8679_v31  ;;  %v8234_v60 = vadd.f32 %v8106_v35, %v7914_v43 }
 0x275   :  { %v8424_v49 = vld [vmem:[#allocation2 + $0x378] sm:$0xf0]  ;;  %v7979_v52 = vld [vmem:[#allocation2 + $0x160] sm:$0xf0]  ;;  %7717 = vst [vmem:[#allocation2 + $0x188] sm:$0xff] %v6906_v17  ;;  %7719 = vst [vmem:[#allocation2 + $0x198] sm:$0xff] %v6989_v46  ;;  %v8875_v58 = vadd.f32 %v11153_v22, %v8805_v45  ;;  %v8360_v1 = vadd.f32 %v8296_v48, %v8232_v40 }
 0x276   :  { %v11249_v53 = vld [vmem:[#allocation4 + $0x40] sm:$0xf]  ;;  %v7915_v54 = vld [vmem:[#allocation2 + $0x158] sm:$0xf]  ;;  %v8938_v56 = vmax.f32 %v8874_v36, 0.0  ;;  %v8107_v59 = vrot.slane %v7979_v52, 4  ;;  %v8877_v62 = vadd.f32 %v11153_v22, %v8807_v51 }
 0x277   :  { %v8297_v55 = vld [vmem:[#allocation2 + $0x378] sm:$0xf]  ;;  %v8940_v61 = vmax.f32 %v8876_v44, 0.0  ;;  %v7980_v21 = vld [vmem:[#allocation2 + $0x168] sm:$0xf0]  ;;  %v6910_v50 = vpop.f32.mrb[172].mxu0 }
 0x278   :  { %v9174_v0 = vld [vmem:[#allocation4 + $0x3c] sm:$0xf]  ;;  %v11253_v18 = vld [vmem:[#allocation4 + $0x50] sm:$0xf]  ;;  %v8552_v5 = vrot.slane %v8424_v49, 4  ;;  %v8939_v6 = vmax.f32 %v8875_v58, 0.0  ;;  %v8235_v7 = vadd.f32 %v8107_v59, %v7915_v54  ;;  %v8361_v11 = vadd.f32 %v8297_v55, %v8233_v47 }
 0x279   :  { %v8298_v8 = vld [vmem:[#allocation2 + $0x380] sm:$0xf]  ;;  %v8425_v13 = vld [vmem:[#allocation2 + $0x380] sm:$0xf0]  ;;  %7784 = vst [vmem:[#allocation2 + $0x3a0] sm:$0xff] %v6910_v50  ;;  %v8941_v16 = vmax.f32 %v8877_v62, 0.0  ;;  %v9176_v23 = vmax.f32 %v9174_v0, %v11249_v53 }
 0x27a   :  { %v7981_v41 = vld [vmem:[#allocation2 + $0x170] sm:$0xf0]  ;;  %v8362_v12 = vadd.f32 %v8298_v8, %v8234_v60  ;;  %v8553_v15 = vrot.slane %v8425_v13, 4  ;;  %v7982_v14 = vld [vmem:[#allocation2 + $0x178] sm:$0xf0]  ;;  %v9048_v63 = vcombine.low %v8938_v56, %v8939_v6  ;;  %v8108_v57 = vrot.slane %v7980_v21, 4 }
 0x27b   :  { %v8299_v4 = vld [vmem:[#allocation2 + $0x388] sm:$0xf]  ;;  %v8426_v20 = vld [vmem:[#allocation2 + $0x388] sm:$0xf0]  ;;  %v6912_v2 = vpop.f32.mrb[173].mxu0  ;;  %v9049_v3 = vcombine.low %v8940_v61, %v8941_v16  ;;  %v6993_v28 = vpop.f32.mrb[180].mxu1  ;;  %v8680_v29 = vadd.f32 %v8552_v5, %v8360_v1 }
 0x27c   :  { %v8363_v24 = vadd.f32 %v8299_v4, %v8235_v7  ;;  %v8554_v25 = vrot.slane %v8426_v20, 4  ;;  %v8427_v26 = vld [vmem:[#allocation2 + $0x390] sm:$0xf0]  ;;  %v8681_v27 = vadd.f32 %v8553_v15, %v8361_v11  ;;  %7785 = vst [vmem:[#allocation2 + $0x3a8] sm:$0xff] %v6912_v2  ;;  %v11256_v30 = vld [vmem:[#allocation4 + $0x4c] sm:$0xf] }
 0x27d   :  { %9112 = vst [vmem:[#allocation4 + $0x90] sm:$0xff] %v9048_v63  ;;  %v7916_v31 = vld [vmem:[#allocation2 + $0x160] sm:$0xf]  ;;  %v7917_v32 = vld [vmem:[#allocation2 + $0x168] sm:$0xf]  ;;  %v8109_v9 = vrot.slane %v7981_v41, 4  ;;  %v9185_v33 = vmax.f32 %v11256_v30, %v11253_v18 }
 0x27e   :  { %v8555_v10 = vrot.slane %v8427_v26, 4  ;;  %7786 = vst [vmem:[#allocation2 + $0x3b0] sm:$0xff] %v6993_v28  ;;  %v9177_v19 = vld [vmem:[#allocation4 + $0x44] sm:$0xf]  ;;  %v6995_v34 = vpop.f32.mrb[181].mxu1  ;;  %9113 = vst [vmem:[#allocation4 + $0x98] sm:$0xff] %v9049_v3  ;;  %v8682_v37 = vadd.f32 %v8554_v25, %v8362_v12  ;;  %v8236_v46 = vadd.f32 %v8108_v57, %v7916_v31 }
 0x27f   :  { %v8110_v35 = vrot.slane %v7982_v14, 4  ;;  %v8744_v36 = vld [vmem:[#allocation2 + $0x5a0] sm:$0xf]  ;;  %v8746_v38 = vld [vmem:[#allocation2 + $0x5b0] sm:$0xf]  ;;  %7787 = vst [vmem:[#allocation2 + $0x3b8] sm:$0xff] %v6995_v34  ;;  %v11260_v52 = vmax.f32 %v9176_v23, %v9177_v19  ;;  %v8237_v61 = vadd.f32 %v8109_v9, %v7917_v32 }
 0x280   :  { %v9186_v39 = vld [vmem:[#allocation4 + $0x54] sm:$0xf]  ;;  %v6916_v40 = vpop.f32.mrb[174].mxu0  ;;  %v7918_v43 = vld [vmem:[#allocation2 + $0x170] sm:$0xf]  ;;  %v8808_v44 = vadd.f32 %v8744_v36, %v8680_v29  ;;  %v8683_v42 = vadd.f32 %v8555_v10, %v8363_v24  ;;  %v8810_v48 = vadd.f32 %v8746_v38, %v8682_v37  ;;  %v6999_v7 = vpop.f32.mrb[182].mxu1 }
 0x281   :  { %v8745_v45 = vld [vmem:[#allocation2 + $0x5a8] sm:$0xf]  ;;  %v8747_v17 = vld [vmem:[#allocation2 + $0x5b8] sm:$0xf]  ;;  %7852 = vst [vmem:[#allocation2 + $0x5c0] sm:$0xf] %v6916_v40  ;;  %v9187_v60 = vmax.f32 %v9185_v33, %v9186_v39  ;;  %v8238_v62 = vadd.f32 %v8110_v35, %v7918_v43 }
 0x282   :  { %v8428_v47 = vld [vmem:[#allocation2 + $0x398] sm:$0xf0]  ;;  %v8809_v49 = vadd.f32 %v8745_v45, %v8681_v27  ;;  %v7983_v51 = vld [vmem:[#allocation2 + $0x180] sm:$0xf0]  ;;  %v11262_v53 = vld [vmem:[#allocation4 + $0x60] sm:$0xf]  ;;  %v8878_v56 = vadd.f32 %v11153_v22, %v8808_v44  ;;  %v8811_v58 = vadd.f32 %v8747_v17, %v8683_v42  ;;  %v8880_v21 = vadd.f32 %v11153_v22, %v8810_v48 }
 0x283   :  { %v7919_v54 = vld [vmem:[#allocation2 + $0x178] sm:$0xf]  ;;  %v8300_v55 = vld [vmem:[#allocation2 + $0x390] sm:$0xf]  ;;  %v8111_v59 = vrot.slane %v7983_v51, 4  ;;  %v8556_v13 = vrot.slane %v8428_v47, 4 }
 0x284   :  { %v8879_v50 = vadd.f32 %v11153_v22, %v8809_v49  ;;  %v8302_v0 = vld [vmem:[#allocation2 + $0x3a0] sm:$0xf]  ;;  %v8429_v1 = vld [vmem:[#allocation2 + $0x3a0] sm:$0xf0]  ;;  %v9188_v5 = vld [vmem:[#allocation4 + $0x58] sm:$0xf]  ;;  %v8881_v16 = vadd.f32 %v11153_v22, %v8811_v58  ;;  %v8364_v15 = vadd.f32 %v8300_v55, %v8236_v46 }
 0x285   :  { %v9199_v6 = vld [vmem:[#allocation4 + $0x5c] sm:$0xf]  ;;  %v8301_v8 = vld [vmem:[#allocation2 + $0x398] sm:$0xf]  ;;  %v8942_v11 = vmax.f32 %v8878_v56, 0.0  ;;  %v8239_v41 = vadd.f32 %v8111_v59, %v7919_v54  ;;  %v6918_v12 = vpop.f32.mrb[175].mxu0  ;;  %v8366_v57 = vadd.f32 %v8302_v0, %v8238_v62  ;;  %v9189_v24 = vmax.f32 %v9187_v60, %v9188_v5 }
 0x286   :  { %7854 = vst [vmem:[#allocation2 + $0x5d0] sm:$0xf] %v6999_v7  ;;  %v8944_v14 = vmax.f32 %v8880_v21, 0.0  ;;  %v8943_v63 = vmax.f32 %v8879_v50, 0.0  ;;  %v8303_v4 = vld [vmem:[#allocation2 + $0x3a8] sm:$0xf]  ;;  %v9201_v25 = vmax.f32 %v9199_v6, %v11262_v53  ;;  %v8365_v27 = vadd.f32 %v8301_v8, %v8237_v61 }
 0x287   :  { %v8430_v20 = vld [vmem:[#allocation2 + $0x3a8] sm:$0xf0]  ;;  %7853 = vst [vmem:[#allocation2 + $0x5c8] sm:$0xf] %v6918_v12  ;;  %v8945_v2 = vmax.f32 %v8881_v16, 0.0  ;;  %v8557_v3 = vrot.slane %v8429_v1, 4  ;;  %v8367_v32 = vadd.f32 %v8303_v4, %v8239_v41  ;;  %v8684_v40 = vadd.f32 %v8556_v13, %v8364_v15 }
 0x288   :  { %v11268_v23 = vld [vmem:[#allocation2 + $0x188] sm:$0xf0]  ;;  %v7001_v26 = vpop.f32.mrb[183].mxu1  ;;  %v9050_v28 = vcombine.low %v8942_v11, %v8943_v63  ;;  %v11271_v31 = vld [vmem:[#allocation2 + $0x190] sm:$0xf0]  ;;  %v8558_v9 = vrot.slane %v8430_v20, 4 }
 0x289   :  { %v8431_v10 = vld [vmem:[#allocation2 + $0x3b0] sm:$0xf0]  ;;  %7855 = vst [vmem:[#allocation2 + $0x5d8] sm:$0xf] %v7001_v26  ;;  %v7070_v29 = vpop.f32.mrb[176].mxu0  ;;  %v9051_v19 = vcombine.low %v8944_v14, %v8945_v2  ;;  %v8685_v44 = vadd.f32 %v8557_v3, %v8365_v27  ;;  %v8112_v45 = vrot.slane %v11268_v23, 4 }
 0x28a   :  { %v8559_v33 = vrot.slane %v8431_v10, 4  ;;  %v9179_v34 = vld [vmem:[#allocation4 + $0x48] sm:$0xf]  ;;  %7720 = vst [vmem:[#allocation2 + $0x1a0] sm:$0xff] %v7070_v29  ;;  %v7072_v35 = vpop.f32.mrb[177].mxu0  ;;  %9114 = vst [vmem:[#allocation4 + $0xa0] sm:$0xff] %v9050_v28  ;;  %v8686_v43 = vadd.f32 %v8558_v9, %v8366_v57 }
 0x28b   :  { %v9180_v36 = vmax.f32 %v11260_v52, %v9179_v34  ;;  %v9202_v37 = vld [vmem:[#allocation4 + $0x64] sm:$0xf]  ;;  %v11274_v38 = vld [vmem:[#allocation4 + $0x6c] sm:$0xf]  ;;  %v11276_v39 = vld [vmem:[#allocation4 + $0x70] sm:$0xf] }
 0x28c   :  { %7721 = vst [vmem:[#allocation2 + $0x1a8] sm:$0xff] %v7072_v35  ;;  %9115 = vst [vmem:[#allocation4 + $0xa8] sm:$0xff] %v9051_v19  ;;  %v8113_v42 = vrot.slane %v11271_v31, 4  ;;  %v9190_v17 = vld [vmem:[#allocation4 + $0x5c] sm:$0xf]  ;;  %v11280_v47 = vmax.f32 %v9201_v25, %v9202_v37  ;;  %v9210_v48 = vmax.f32 %v11274_v38, %v11276_v39  ;;  %v8687_v54 = vadd.f32 %v8559_v33, %v8367_v32  ;;  %v7153_v61 = vpop.f32.mrb[184].mxu1 }
 0x28d   :  { %v9192_v46 = vld [vmem:[#allocation4 + $0x60] sm:$0xf]  ;;  %v9191_v49 = vmax.f32 %v9189_v24, %v9190_v17  ;;  %v9211_v51 = vld [vmem:[#allocation4 + $0x74] sm:$0xf]  ;;  %v8750_v53 = vld [vmem:[#allocation2 + $0x5d0] sm:$0xf]  ;;  %v11289_v13 = vmax.f32 %v9180_v36, %v11256_v30 }
 0x28e   :  { %v8748_v52 = vld [vmem:[#allocation2 + $0x5c0] sm:$0xf]  ;;  %v11284_v56 = vld [vmem:[#allocation2 + $0x198] sm:$0xf0]  ;;  %v9212_v58 = vmax.f32 %v9210_v48, %v9211_v51  ;;  %v8749_v60 = vld [vmem:[#allocation2 + $0x5c8] sm:$0xf]  ;;  %v8814_v5 = vadd.f32 %v8750_v53, %v8686_v43 }
 0x28f   :  { %v7920_v55 = vld [vmem:[#allocation2 + $0x180] sm:$0xf]  ;;  %v8812_v59 = vadd.f32 %v8748_v52, %v8684_v40  ;;  %v7076_v62 = vpop.f32.mrb[178].mxu0  ;;  %v7921_v21 = vld [vmem:[#allocation2 + $0x188] sm:$0xf]  ;;  %v11286_v50 = vmax.f32 %v9191_v49, %v9192_v46  ;;  %v8813_v6 = vadd.f32 %v8749_v60, %v8685_v44  ;;  %7722 = vst [vmem:[#allocation2 + $0x1b0] sm:$0xff] %v7153_v61  ;;  %v9184_v40 = vmax.f32 %v11289_v13, %v11253_v18 }
 0x290   :  { %v9204_v0 = vld [vmem:[#allocation4 + $0x68] sm:$0xf]  ;;  %v9213_v1 = vld [vmem:[#allocation4 + $0x78] sm:$0xf]  ;;  %7788 = vst [vmem:[#allocation2 + $0x3c0] sm:$0xff] %v7076_v62  ;;  %v7155_v7 = vpop.f32.mrb[185].mxu1  ;;  %v8240_v57 = vadd.f32 %v8112_v45, %v7920_v55  ;;  %v8884_v2 = vadd.f32 %v11153_v22, %v8814_v5  ;;  %v8241_v36 = vadd.f32 %v8113_v42, %v7921_v21 }
 0x291   :  { %v7078_v8 = vpop.f32.mrb[179].mxu0  ;;  %v9205_v11 = vmax.f32 %v11280_v47, %v9204_v0  ;;  %v9214_v16 = vmax.f32 %v9212_v58, %v9213_v1  ;;  %v9215_v41 = vld [vmem:[#allocation4 + $0x7c] sm:$0xf]  ;;  %v8882_v12 = vadd.f32 %v11153_v22, %v8812_v59  ;;  %v8751_v15 = vld [vmem:[#allocation2 + $0x5d8] sm:$0xf]  ;;  %7723 = vst [vmem:[#allocation2 + $0x1b8] sm:$0xff] %v7155_v7  ;;  %v8883_v23 = vadd.f32 %v11153_v22, %v8813_v6 }
 0x292   :  { %7789 = vst [vmem:[#allocation2 + $0x3c8] sm:$0xff] %v7078_v8  ;;  %v7159_v14 = vpop.f32.mrb[186].mxu1  ;;  %v7082_v63 = vpop.f32.mrb[180].mxu0  ;;  %v7922_v4 = vld [vmem:[#allocation2 + $0x190] sm:$0xf]  ;;  %v8815_v30 = vadd.f32 %v8751_v15, %v8687_v54  ;;  %v8114_v26 = vrot.slane %v11284_v56, 4  ;;  %v9195_v9 = vcombine.low %v11286_v50, %v11286_v50 }
 0x293   :  { %v9217_v20 = vld [vmem:[#allocation4 + $0x80] sm:$0xf]  ;;  %v7987_v3 = vld [vmem:[#allocation2 + $0x1a0] sm:$0xf0]  ;;  %7790 = vst [vmem:[#allocation2 + $0x3d0] sm:$0xff] %v7159_v14  ;;  %v7161_v24 = vpop.f32.mrb[187].mxu1  ;;  %v9216_v28 = vmax.f32 %v9214_v16, %v9215_v41  ;;  %v9207_v43 = vmax.f32 %v9205_v11, %v11274_v38 }
 0x294   :  { %7856 = vst [vmem:[#allocation2 + $0x5e0] sm:$0xf] %v7082_v63  ;;  %v7084_v25 = vpop.f32.mrb[181].mxu0  ;;  %v8304_v27 = vld [vmem:[#allocation2 + $0x3b0] sm:$0xf]  ;;  %v8946_v31 = vmax.f32 %v8882_v12, 0.0  ;;  %v8885_v33 = vadd.f32 %v11153_v22, %v8815_v30  ;;  %v8242_v38 = vadd.f32 %v8114_v26, %v7922_v4  ;;  %v9197_v60 = vsel %vm4709_vm2, %v9184_v40, %v9195_v9 }
 0x295   :  { %v8115_v32 = vrot.slane %v7987_v3, 4  ;;  %7791 = vst [vmem:[#allocation2 + $0x3d8] sm:$0xff] %v7161_v24  ;;  %7857 = vst [vmem:[#allocation2 + $0x5e8] sm:$0xf] %v7084_v25  ;;  %v11298_v10 = vld [vmem:[#allocation2 + $0x3b8] sm:$0xf0]  ;;  %v9218_v44 = vmax.f32 %v9216_v28, %v9217_v20  ;;  %v8368_v47 = vadd.f32 %v8304_v27, %v8240_v57  ;;  %v9209_v54 = vmax.f32 %v9207_v43, %v11276_v39 }
 0x296   :  { %v8948_v29 = vmax.f32 %v8884_v2, 0.0  ;;  %v8947_v19 = vmax.f32 %v8883_v23, 0.0  ;;  %v7165_v34 = vpop.f32.mrb[188].mxu1  ;;  %v7236_v35 = vpop.f32.mrb[182].mxu0  ;;  %v7923_v37 = vld [vmem:[#allocation2 + $0x198] sm:$0xf] }
 0x297   :  { %v7988_v45 = vld [vmem:[#allocation2 + $0x1a8] sm:$0xf0]  ;;  %7858 = vst [vmem:[#allocation2 + $0x5f0] sm:$0xf] %v7165_v34  ;;  %v7167_v17 = vpop.f32.mrb[189].mxu1  ;;  %7724 = vst [vmem:[#allocation2 + $0x1c0] sm:$0xff] %v7236_v35  ;;  %v8243_v52 = vadd.f32 %v8115_v32, %v7923_v37  ;;  %v9220_v55 = vcombine.low %v9218_v44, %v9218_v44 }
 0x298   :  { %v7238_v46 = vpop.f32.mrb[183].mxu0  ;;  %v8305_v48 = vld [vmem:[#allocation2 + $0x3b8] sm:$0xf]  ;;  %v9052_v49 = vcombine.low %v8946_v31, %v8947_v19  ;;  %v8949_v51 = vmax.f32 %v8885_v33, 0.0  ;;  %7859 = vst [vmem:[#allocation2 + $0x5f8] sm:$0xf] %v7167_v17 }
 0x299   :  { %7725 = vst [vmem:[#allocation2 + $0x1c8] sm:$0xff] %v7238_v46  ;;  %v7319_v42 = vpop.f32.mrb[190].mxu1  ;;  %v7242_v53 = vpop.f32.mrb[184].mxu0  ;;  %v9334_v18 = vld [vmem:[%s11389_s6] sm:$0xff]  ;;  %v8560_v56 = vrot.slane %v11298_v10, 4  ;;  %v8116_v62 = vrot.slane %v7988_v45, 4  ;;  %v9222_v0 = vsel %vm4709_vm2, %v9209_v54, %v9220_v55  ;;  %v8369_v1 = vadd.f32 %v8305_v48, %v8241_v36 }
 0x29a   :  { %v7989_v58 = vld [vmem:[#allocation2 + $0x1b0] sm:$0xf0]  ;;  %v8306_v59 = vld [vmem:[#allocation2 + $0x3c0] sm:$0xf]  ;;  %7726 = vst [vmem:[#allocation2 + $0x1d0] sm:$0xff] %v7319_v42  ;;  %7792 = vst [vmem:[#allocation2 + $0x3e0] sm:$0xff] %v7242_v53  ;;  %9340 = vperm.xlu1 %9899, %v9334_v18   ;;  %v9053_v61 = vcombine.low %v8948_v29, %v8949_v51  ;;  %v9882_v11 = vpack.c.bf16 %v9222_v0, %v9197_v60 }
 0x29b   :  { %9116 = vst [vmem:[#allocation4 + $0xb0] sm:$0xff] %v9052_v49  ;;  %v8433_v21 = vld [vmem:[#allocation2 + $0x3c0] sm:$0xf0]  ;;  %v7321_v50 = vpop.f32.mrb[191].mxu1  ;;  %v7924_v5 = vld [vmem:[#allocation2 + $0x1a0] sm:$0xf]  ;;  %v8370_v39 = vadd.f32 %v8306_v59, %v8242_v38  ;;  %v8688_v2 = vadd.f32 %v8560_v56, %v8368_v47 }
 0x29c   :  { %v8561_v6 = vrot.slane %v8433_v21, 4  ;;  %v7990_v7 = vld [vmem:[#allocation2 + $0x1b8] sm:$0xf0]  ;;  %v8307_v8 = vld [vmem:[#allocation2 + $0x3c8] sm:$0xf]  ;;  %7727 = vst [vmem:[#allocation2 + $0x1d8] sm:$0xff] %v7321_v50  ;;  %9883 = vmatprep.subr.bf16.mxu0 %v9882_v11  ;;  %v8244_v3 = vadd.f32 %v8116_v62, %v7924_v5 }
 0x29d   :  { %v7244_v13 = vpop.f32.mrb[185].mxu0  ;;  %9117 = vst [vmem:[#allocation4 + $0xb8] sm:$0xff] %v9053_v61  ;;  %v7925_v16 = vld [vmem:[#allocation2 + $0x1a8] sm:$0xf]  ;;  %v8117_v41 = vrot.slane %v7989_v58, 4  ;;  %v8371_v12 = vadd.f32 %v8307_v8, %v8243_v52  ;;  %v7325_v14 = vpop.f32.mrb[192].mxu1  ;;  %9885 = vmatpush3.bf16.msra.mxu0 %v9882_v11 }
 0x29e   :  { %v8434_v15 = vld [vmem:[#allocation2 + $0x3c8] sm:$0xf0]  ;;  %7793 = vst [vmem:[#allocation2 + $0x3e8] sm:$0xff] %v7244_v13  ;;  %v7926_v63 = vld [vmem:[#allocation2 + $0x1b0] sm:$0xf]  ;;  %v8118_v57 = vrot.slane %v7990_v7, 4  ;;  %v8689_v23 = vadd.f32 %v8561_v6, %v8369_v1 }
 0x29f   :  { %v8562_v4 = vrot.slane %v8434_v15, 4  ;;  %v8435_v20 = vld [vmem:[#allocation2 + $0x3d0] sm:$0xf0]  ;;  %7794 = vst [vmem:[#allocation2 + $0x3f0] sm:$0xff] %v7325_v14  ;;  %v7327_v30 = vpop.f32.mrb[193].mxu1  ;;  %v7248_v27 = vpop.f32.mrb[186].mxu0  ;;  %v8245_v29 = vadd.f32 %v8117_v41, %v7925_v16 }
 0x2a0   :  { %v8308_v24 = vld [vmem:[#allocation2 + $0x3d0] sm:$0xf]  ;;  %v8563_v25 = vrot.slane %v8435_v20, 4  ;;  %v8752_v26 = vld [vmem:[#allocation2 + $0x5e0] sm:$0xf]  ;;  %7795 = vst [vmem:[#allocation2 + $0x3f8] sm:$0xff] %v7327_v30  ;;  %v8246_v46 = vadd.f32 %v8118_v57, %v7926_v63 }
 0x2a1   :  { %v8816_v28 = vadd.f32 %v8752_v26, %v8688_v2  ;;  %v8690_v31 = vadd.f32 %v8562_v4, %v8370_v39  ;;  %v8754_v32 = vld [vmem:[#allocation2 + $0x5f0] sm:$0xf]  ;;  %v8753_v9 = vld [vmem:[#allocation2 + $0x5e8] sm:$0xf]  ;;  %7860 = vst [vmem:[#allocation2 + $0x600] sm:$0xf] %v7248_v27  ;;  %v8372_v47 = vadd.f32 %v8308_v24, %v8244_v3 }
 0x2a2   :  { %v7331_v10 = vpop.f32.mrb[194].mxu1  ;;  %v8436_v19 = vld [vmem:[#allocation2 + $0x3d8] sm:$0xf0]  ;;  %v8817_v33 = vadd.f32 %v8753_v9, %v8689_v23  ;;  %v8691_v34 = vadd.f32 %v8563_v25, %v8371_v12  ;;  %v8755_v35 = vld [vmem:[#allocation2 + $0x5f8] sm:$0xf]  ;;  %v7250_v45 = vpop.f32.mrb[187].mxu0 }
 0x2a3   :  { %v7991_v36 = vld [vmem:[#allocation2 + $0x1c0] sm:$0xf0]  ;;  %7862 = vst [vmem:[#allocation2 + $0x610] sm:$0xf] %v7331_v10  ;;  %v8309_v37 = vld [vmem:[#allocation2 + $0x3d8] sm:$0xf]  ;;  %v8886_v40 = vadd.f32 %v11153_v22, %v8816_v28  ;;  %v8818_v43 = vadd.f32 %v8754_v32, %v8690_v31 }
 0x2a4   :  { %v8119_v44 = vrot.slane %v7991_v36, 4  ;;  %v7927_v17 = vld [vmem:[#allocation2 + $0x1b8] sm:$0xf]  ;;  %v8887_v48 = vadd.f32 %v11153_v22, %v8817_v33  ;;  %v8819_v49 = vadd.f32 %v8755_v35, %v8691_v34  ;;  %v7992_v51 = vld [vmem:[#allocation2 + $0x1c8] sm:$0xf0]  ;;  %v7333_v52 = vpop.f32.mrb[195].mxu1  ;;  %v8373_v56 = vadd.f32 %v8309_v37, %v8245_v29 }
 0x2a5   :  { %7861 = vst [vmem:[#allocation2 + $0x608] sm:$0xf] %v7250_v45  ;;  %v8564_v42 = vrot.slane %v8436_v19, 4  ;;  %v8950_v53 = vmax.f32 %v8886_v40, 0.0  ;;  %v8888_v18 = vadd.f32 %v11153_v22, %v8818_v43  ;;  %v8310_v54 = vld [vmem:[#allocation2 + $0x3e0] sm:$0xf] }
 0x2a6   :  { %v8247_v38 = vadd.f32 %v8119_v44, %v7927_v17  ;;  %v8437_v55 = vld [vmem:[#allocation2 + $0x3e0] sm:$0xf0]  ;;  %7863 = vst [vmem:[#allocation2 + $0x618] sm:$0xf] %v7333_v52  ;;  %v8951_v58 = vmax.f32 %v8887_v48, 0.0  ;;  %v8889_v59 = vadd.f32 %v11153_v22, %v8819_v49  ;;  %v7402_v61 = vpop.f32.mrb[188].mxu0  ;;  %v8374_v50 = vadd.f32 %v8310_v54, %v8246_v46 }
 0x2a7   :  { %v7993_v60 = vld [vmem:[#allocation2 + $0x1d0] sm:$0xf0]  ;;  %v8952_v62 = vmax.f32 %v8888_v18, 0.0  ;;  %v8120_v21 = vrot.slane %v7992_v51, 4  ;;  %v8565_v0 = vrot.slane %v8437_v55, 4  ;;  %7728 = vst [vmem:[#allocation2 + $0x1e0] sm:$0xff] %v7402_v61  ;;  %v8692_v63 = vadd.f32 %v8564_v42, %v8372_v47 }
 0x2a8   :  { %v8311_v1 = vld [vmem:[#allocation2 + $0x3e8] sm:$0xf]  ;;  %v7404_v5 = vpop.f32.mrb[189].mxu0  ;;  %v9054_v39 = vcombine.low %v8950_v53, %v8951_v58  ;;  %v8953_v6 = vmax.f32 %v8889_v59, 0.0  ;;  %v7994_v7 = vld [vmem:[#allocation2 + $0x1d8] sm:$0xf0] }
 0x2a9   :  { %v8375_v8 = vadd.f32 %v8311_v1, %v8247_v38  ;;  %v8438_v13 = vld [vmem:[#allocation2 + $0x3e8] sm:$0xf0]  ;;  %7729 = vst [vmem:[#allocation2 + $0x1e8] sm:$0xff] %v7404_v5  ;;  %v7485_v11 = vpop.f32.mrb[196].mxu1  ;;  %v11315_v16 = vld [vmem:[#allocation4 + $0x90] sm:$0xf]  ;;  %v8693_v57 = vadd.f32 %v8565_v0, %v8373_v56 }
 0x2aa   :  { %v7928_v41 = vld [vmem:[#allocation2 + $0x1c0] sm:$0xf]  ;;  %v7929_v12 = vld [vmem:[#allocation2 + $0x1c8] sm:$0xf]  ;;  %v8566_v15 = vrot.slane %v8438_v13, 4  ;;  %7730 = vst [vmem:[#allocation2 + $0x1f0] sm:$0xff] %v7485_v11  ;;  %v9055_v20 = vcombine.low %v8952_v62, %v8953_v6 }
 0x2ab   :  { %v8439_v14 = vld [vmem:[#allocation2 + $0x3f0] sm:$0xf0]  ;;  %v7408_v4 = vpop.f32.mrb[190].mxu0  ;;  %9118 = vst [vmem:[#allocation4 + $0xc0] sm:$0xff] %v9054_v39  ;;  %v8121_v2 = vrot.slane %v7993_v60, 4  ;;  %v7487_v3 = vpop.f32.mrb[197].mxu1  ;;  %v8248_v9 = vadd.f32 %v8120_v21, %v7928_v41 }
 0x2ac   :  { %v8567_v23 = vrot.slane %v8439_v14, 4  ;;  %v8756_v30 = vld [vmem:[#allocation2 + $0x600] sm:$0xf]  ;;  %7796 = vst [vmem:[#allocation2 + $0x400] sm:$0xff] %v7408_v4  ;;  %v11317_v24 = vld [vmem:[#allocation4 + $0x8c] sm:$0xf]  ;;  %v8694_v27 = vadd.f32 %v8566_v15, %v8374_v50 }
 0x2ad   :  { %v8122_v25 = vrot.slane %v7994_v7, 4  ;;  %v8820_v26 = vadd.f32 %v8756_v30, %v8692_v63  ;;  %v8758_v28 = vld [vmem:[#allocation2 + $0x610] sm:$0xf]  ;;  %v8757_v31 = vld [vmem:[#allocation2 + $0x608] sm:$0xf]  ;;  %7731 = vst [vmem:[#allocation2 + $0x1f8] sm:$0xff] %v7487_v3  ;;  %v9235_v17 = vmax.f32 %v11317_v24, %v11315_v16  ;;  %v8249_v46 = vadd.f32 %v8121_v2, %v7929_v12 }
 0x2ae   :  { %v7410_v32 = vpop.f32.mrb[191].mxu0  ;;  %9119 = vst [vmem:[#allocation4 + $0xc8] sm:$0xff] %v9055_v20  ;;  %v7930_v10 = vld [vmem:[#allocation2 + $0x1d0] sm:$0xf]  ;;  %v8821_v29 = vadd.f32 %v8757_v31, %v8693_v57  ;;  %v8695_v19 = vadd.f32 %v8567_v23, %v8375_v8  ;;  %v8759_v33 = vld [vmem:[#allocation2 + $0x618] sm:$0xf]  ;;  %v8822_v43 = vadd.f32 %v8758_v28, %v8694_v27 }
 0x2af   :  { %7797 = vst [vmem:[#allocation2 + $0x408] sm:$0xff] %v7410_v32  ;;  %v7491_v34 = vpop.f32.mrb[198].mxu1  ;;  %v7414_v35 = vpop.f32.mrb[192].mxu0  ;;  %v8312_v36 = vld [vmem:[#allocation2 + $0x3f0] sm:$0xf]  ;;  %v8890_v40 = vadd.f32 %v11153_v22, %v8820_v26  ;;  %v8250_v53 = vadd.f32 %v8122_v25, %v7930_v10 }
 0x2b0   :  { %v8440_v37 = vld [vmem:[#allocation2 + $0x3f8] sm:$0xf0]  ;;  %7798 = vst [vmem:[#allocation2 + $0x410] sm:$0xff] %v7491_v34  ;;  %v7493_v44 = vpop.f32.mrb[199].mxu1  ;;  %7864 = vst [vmem:[#allocation2 + $0x620] sm:$0xf] %v7414_v35  ;;  %v8891_v47 = vadd.f32 %v11153_v22, %v8821_v29  ;;  %v8823_v48 = vadd.f32 %v8759_v33, %v8695_v19  ;;  %v8892_v38 = vadd.f32 %v11153_v22, %v8822_v43 }
 0x2b1   :  { %v7416_v45 = vpop.f32.mrb[193].mxu0  ;;  %v7995_v49 = vld [vmem:[#allocation2 + $0x1e0] sm:$0xf0]  ;;  %7799 = vst [vmem:[#allocation2 + $0x418] sm:$0xff] %v7493_v44  ;;  %v7497_v51 = vpop.f32.mrb[200].mxu1  ;;  %v8954_v18 = vmax.f32 %v8890_v40, 0.0  ;;  %v8376_v56 = vadd.f32 %v8312_v36, %v8248_v9 }
 0x2b2   :  { %7865 = vst [vmem:[#allocation2 + $0x628] sm:$0xf] %v7416_v45  ;;  %v7568_v52 = vpop.f32.mrb[194].mxu0  ;;  %v7931_v42 = vld [vmem:[#allocation2 + $0x1d8] sm:$0xf]  ;;  %v8123_v54 = vrot.slane %v7995_v49, 4  ;;  %v8893_v61 = vadd.f32 %v11153_v22, %v8823_v48 }
 0x2b3   :  { %7866 = vst [vmem:[#allocation2 + $0x630] sm:$0xf] %v7497_v51  ;;  %7732 = vst [vmem:[#allocation2 + $0x200] sm:$0xff] %v7568_v52  ;;  %v11324_v55 = vld [vmem:[#allocation4 + $0x80] sm:$0xf]  ;;  %v8568_v59 = vrot.slane %v8440_v37, 4 }
 0x2b4   :  { %v8313_v58 = vld [vmem:[#allocation2 + $0x3f8] sm:$0xf]  ;;  %v8955_v60 = vmax.f32 %v8891_v47, 0.0  ;;  %v9224_v62 = vld [vmem:[#allocation4 + $0x7c] sm:$0xf]  ;;  %v8956_v50 = vmax.f32 %v8892_v38, 0.0  ;;  %v8251_v0 = vadd.f32 %v8123_v54, %v7931_v42 }
 0x2b5   :  { %v9236_v21 = vld [vmem:[#allocation4 + $0x94] sm:$0xf]  ;;  %v8314_v1 = vld [vmem:[#allocation2 + $0x400] sm:$0xf]  ;;  %v8441_v5 = vld [vmem:[#allocation2 + $0x400] sm:$0xf0]  ;;  %v8377_v12 = vadd.f32 %v8313_v58, %v8249_v46  ;;  %v9226_v57 = vmax.f32 %v9224_v62, %v11324_v55  ;;  %v8696_v30 = vadd.f32 %v8568_v59, %v8376_v56 }
 0x2b6   :  { %v9237_v39 = vmax.f32 %v9235_v17, %v9236_v21  ;;  %v9056_v6 = vcombine.low %v8954_v18, %v8955_v60  ;;  %v8957_v7 = vmax.f32 %v8893_v61, 0.0  ;;  %v7996_v8 = vld [vmem:[#allocation2 + $0x1e8] sm:$0xf0]  ;;  %v11327_v13 = vld [vmem:[#allocation2 + $0x1f0] sm:$0xf0]  ;;  %v8378_v11 = vadd.f32 %v8314_v1, %v8250_v53  ;;  %v7499_v41 = vpop.f32.mrb[201].mxu1 }
 0x2b7   :  { %v8569_v15 = vrot.slane %v8441_v5, 4  ;;  %v8315_v14 = vld [vmem:[#allocation2 + $0x408] sm:$0xf]  ;;  %v8442_v63 = vld [vmem:[#allocation2 + $0x408] sm:$0xf0]  ;;  %v7570_v3 = vpop.f32.mrb[195].mxu0 }
 0x2b8   :  { %7867 = vst [vmem:[#allocation2 + $0x638] sm:$0xf] %v7499_v41  ;;  %9120 = vst [vmem:[#allocation4 + $0xd0] sm:$0xff] %v9056_v6  ;;  %v9057_v4 = vcombine.low %v8956_v50, %v8957_v7  ;;  %v8379_v20 = vadd.f32 %v8315_v14, %v8251_v0  ;;  %v8570_v2 = vrot.slane %v8442_v63, 4  ;;  %v8443_v23 = vld [vmem:[#allocation2 + $0x410] sm:$0xf0] }
 0x2b9   :  { %v9238_v25 = vld [vmem:[#allocation4 + $0x98] sm:$0xf]  ;;  %v8124_v26 = vrot.slane %v7996_v8, 4  ;;  %v7998_v27 = vld [vmem:[#allocation2 + $0x1f8] sm:$0xf0]  ;;  %v8571_v28 = vrot.slane %v8443_v23, 4  ;;  %v8697_v31 = vadd.f32 %v8569_v15, %v8377_v12 }
 0x2ba   :  { %v7651_v32 = vpop.f32.mrb[202].mxu1  ;;  %v9239_v9 = vmax.f32 %v9237_v39, %v9238_v25  ;;  %9121 = vst [vmem:[#allocation4 + $0xd8] sm:$0xff] %v9057_v4  ;;  %v7933_v10 = vld [vmem:[#allocation2 + $0x1e8] sm:$0xf]  ;;  %v8125_v29 = vrot.slane %v11327_v13, 4  ;;  %v8698_v33 = vadd.f32 %v8570_v2, %v8378_v11  ;;  %v7574_v35 = vpop.f32.mrb[196].mxu0 }
 0x2bb   :  { %v8760_v19 = vld [vmem:[#allocation2 + $0x620] sm:$0xf]  ;;  %v8762_v34 = vld [vmem:[#allocation2 + $0x630] sm:$0xf]  ;;  %v9227_v36 = vld [vmem:[#allocation4 + $0x84] sm:$0xf]  ;;  %v8699_v45 = vadd.f32 %v8571_v28, %v8379_v20 }
 0x2bc   :  { %v9240_v37 = vld [vmem:[#allocation4 + $0x9c] sm:$0xf]  ;;  %v7932_v40 = vld [vmem:[#allocation2 + $0x1e0] sm:$0xf]  ;;  %v8824_v43 = vadd.f32 %v8760_v19, %v8696_v30  ;;  %v8761_v44 = vld [vmem:[#allocation2 + $0x628] sm:$0xf]  ;;  %v8826_v51 = vadd.f32 %v8762_v34, %v8698_v33  ;;  %v11334_v55 = vmax.f32 %v9226_v57, %v9227_v36  ;;  %v8253_v5 = vadd.f32 %v8125_v29, %v7933_v10 }
 0x2bd   :  { %v7999_v17 = vld [vmem:[#allocation2 + $0x200] sm:$0xf0]  ;;  %7800 = vst [vmem:[#allocation2 + $0x420] sm:$0xff] %v7574_v35  ;;  %v7653_v46 = vpop.f32.mrb[203].mxu1  ;;  %v7576_v47 = vpop.f32.mrb[197].mxu0  ;;  %v8126_v49 = vrot.slane %v7998_v27, 4  ;;  %v8825_v52 = vadd.f32 %v8761_v44, %v8697_v31  ;;  %v9241_v56 = vmax.f32 %v9239_v9, %v9240_v37  ;;  %v8252_v60 = vadd.f32 %v8124_v26, %v7932_v40 }
 0x2be   :  { %v7934_v48 = vld [vmem:[#allocation2 + $0x1f0] sm:$0xf]  ;;  %v8127_v42 = vrot.slane %v7999_v17, 4  ;;  %7801 = vst [vmem:[#allocation2 + $0x428] sm:$0xff] %v7576_v47  ;;  %v7657_v53 = vpop.f32.mrb[204].mxu1  ;;  %v8894_v54 = vadd.f32 %v11153_v22, %v8824_v43  ;;  %v8896_v61 = vadd.f32 %v11153_v22, %v8826_v51  ;;  %v7580_v27 = vpop.f32.mrb[198].mxu0 }
 0x2bf   :  { %v7935_v18 = vld [vmem:[#allocation2 + $0x1f8] sm:$0xf]  ;;  %v11331_v38 = vld [vmem:[#allocation2 + $0x418] sm:$0xf0]  ;;  %7802 = vst [vmem:[#allocation2 + $0x430] sm:$0xff] %v7657_v53  ;;  %v8895_v62 = vadd.f32 %v11153_v22, %v8825_v52  ;;  %v7659_v12 = vpop.f32.mrb[205].mxu1  ;;  %v8254_v15 = vadd.f32 %v8126_v49, %v7934_v48 }
 0x2c0   :  { %v9249_v58 = vld [vmem:[#allocation4 + $0x9c] sm:$0xf]  ;;  %v9250_v59 = vld [vmem:[#allocation4 + $0xa0] sm:$0xf]  ;;  %v8763_v21 = vld [vmem:[#allocation2 + $0x638] sm:$0xf]  ;;  %v8255_v57 = vadd.f32 %v8127_v42, %v7935_v18 }
 0x2c1   :  { %v9251_v50 = vmax.f32 %v9249_v58, %v9250_v59  ;;  %v9256_v0 = vld [vmem:[#allocation4 + $0xac] sm:$0xf]  ;;  %v11338_v1 = vld [vmem:[#allocation4 + $0xb0] sm:$0xf]  ;;  %v8958_v6 = vmax.f32 %v8894_v54, 0.0  ;;  %v8827_v7 = vadd.f32 %v8763_v21, %v8699_v45  ;;  %v8959_v63 = vmax.f32 %v8895_v62, 0.0 }
 0x2c2   :  { %v8316_v39 = vld [vmem:[#allocation2 + $0x410] sm:$0xf]  ;;  %v9229_v8 = vld [vmem:[#allocation4 + $0x88] sm:$0xf]  ;;  %v9242_v13 = vld [vmem:[#allocation4 + $0xa0] sm:$0xf]  ;;  %v9260_v41 = vmax.f32 %v9256_v0, %v11338_v1 }
 0x2c3   :  { %v9252_v11 = vld [vmem:[#allocation4 + $0xa4] sm:$0xf]  ;;  %v8317_v14 = vld [vmem:[#allocation2 + $0x418] sm:$0xf]  ;;  %v9254_v20 = vld [vmem:[#allocation4 + $0xa8] sm:$0xf]  ;;  %v8897_v3 = vadd.f32 %v11153_v22, %v8827_v7  ;;  %v9058_v31 = vcombine.low %v8958_v6, %v8959_v63  ;;  %v9230_v10 = vmax.f32 %v11334_v55, %v9229_v8  ;;  %v9243_v29 = vmax.f32 %v9241_v56, %v9242_v13 }
 0x2c4   :  { %v9253_v4 = vmax.f32 %v9251_v50, %v9252_v11  ;;  %v9261_v2 = vld [vmem:[#allocation4 + $0xb4] sm:$0xf]  ;;  %v8572_v23 = vrot.slane %v11331_v38, 4  ;;  %v8960_v30 = vmax.f32 %v8896_v61, 0.0  ;;  %v9263_v26 = vld [vmem:[#allocation4 + $0xb8] sm:$0xf]  ;;  %v8380_v17 = vadd.f32 %v8316_v39, %v8252_v60 }
 0x2c5   :  { %v9262_v25 = vmax.f32 %v9260_v41, %v9261_v2  ;;  %v7663_v28 = vpop.f32.mrb[206].mxu1  ;;  %v8318_v32 = vld [vmem:[#allocation2 + $0x420] sm:$0xf]  ;;  %v8445_v9 = vld [vmem:[#allocation2 + $0x420] sm:$0xf0]  ;;  %v7582_v34 = vpop.f32.mrb[199].mxu0  ;;  %v8381_v52 = vadd.f32 %v8317_v14, %v8253_v5  ;;  %v9232_v38 = vmax.f32 %v9230_v10, %v11317_v24  ;;  %v9245_v54 = vcombine.low %v9243_v29, %v9243_v29 }
 0x2c6   :  { %v9255_v19 = vmax.f32 %v9253_v4, %v9254_v20  ;;  %v9265_v33 = vld [vmem:[#allocation4 + $0xbc] sm:$0xf]  ;;  %7868 = vst [vmem:[#allocation2 + $0x640] sm:$0xf] %v7580_v27  ;;  %7870 = vst [vmem:[#allocation2 + $0x650] sm:$0xf] %v7663_v28  ;;  %v8382_v37 = vadd.f32 %v8318_v32, %v8254_v15  ;;  %v8700_v62 = vadd.f32 %v8572_v23, %v8380_v17 }
 0x2c7   :  { %v7665_v35 = vpop.f32.mrb[207].mxu1  ;;  %v8961_v36 = vmax.f32 %v8897_v3, 0.0  ;;  %v8573_v40 = vrot.slane %v8445_v9, 4  ;;  %v8319_v43 = vld [vmem:[#allocation2 + $0x428] sm:$0xf]  ;;  %v9264_v45 = vmax.f32 %v9262_v25, %v9263_v26  ;;  %9122 = vst [vmem:[#allocation4 + $0xe0] sm:$0xff] %v9058_v31  ;;  %v9234_v21 = vmax.f32 %v9232_v38, %v11315_v16 }
 0x2c8   :  { %v8446_v44 = vld [vmem:[#allocation2 + $0x428] sm:$0xf0]  ;;  %7869 = vst [vmem:[#allocation2 + $0x648] sm:$0xf] %v7582_v34  ;;  %7871 = vst [vmem:[#allocation2 + $0x658] sm:$0xf] %v7665_v35  ;;  %v8383_v46 = vadd.f32 %v8319_v43, %v8255_v57  ;;  %v9257_v59 = vmax.f32 %v9255_v19, %v9256_v0 }
 0x2c9   :  { %v8574_v47 = vrot.slane %v8446_v44, 4  ;;  %v8447_v48 = vld [vmem:[#allocation2 + $0x430] sm:$0xf0]  ;;  %v9267_v49 = vld [vmem:[#allocation4 + $0xc0] sm:$0xf]  ;;  %v9335_v51 = vld [vmem:[%s11389_s6 + $0x8] sm:$0xff]  ;;  %v9059_v42 = vcombine.low %v8960_v30, %v8961_v36  ;;  %v9266_v18 = vmax.f32 %v9264_v45, %v9265_v33  ;;  %v8701_v61 = vadd.f32 %v8573_v40, %v8381_v52 }
 0x2ca   :  { %v8575_v53 = vrot.slane %v8447_v48, 4  ;;  %9345 = vperm.xlu1 %9899, %v9335_v51   ;;  %v9337_v56 = vld [vmem:[%s11389_s6 + $0x18] sm:$0xff]  ;;  %v9259_v50 = vmax.f32 %v9257_v59, %v11338_v1  ;;  %v9247_v11 = vsel %vm4709_vm2, %v9234_v21, %v9245_v54  ;;  %v9283_v1 = vld [vmem:[#allocation4 + $0xd0] sm:$0xf]  ;;  %v9281_v2 = vld [vmem:[#allocation4 + $0xcc] sm:$0xf] }
 0x2cb   :  { %v8702_v55 = vadd.f32 %v8574_v47, %v8382_v37  ;;  %9123 = vst [vmem:[#allocation4 + $0xe8] sm:$0xff] %v9059_v42  ;;  %v9268_v60 = vmax.f32 %v9266_v18, %v9267_v49  ;;  %v9285_v3 = vmax.f32 %v9281_v2, %v9283_v1  ;;  %v9275_v27 = vld [vmem:[#allocation4 + $0xc0] sm:$0xf]  ;;  %v9286_v28 = vld [vmem:[#allocation4 + $0xd4] sm:$0xf] }
 0x2cc   :  { %v8703_v58 = vadd.f32 %v8575_v53, %v8383_v46  ;;  %v9274_v9 = vld [vmem:[#allocation4 + $0xbc] sm:$0xf]  ;;  %v9288_v19 = vld [vmem:[#allocation4 + $0xd8] sm:$0xf]  ;;  %v9277_v34 = vld [vmem:[#allocation4 + $0xc4] sm:$0xf] }
 0x2cd   :  { %v9270_v5 = vcombine.low %v9268_v60, %v9268_v60  ;;  %v8764_v39 = vld [vmem:[#allocation2 + $0x640] sm:$0xf]  ;;  %v8766_v6 = vld [vmem:[#allocation2 + $0x650] sm:$0xf]  ;;  %v9287_v32 = vmax.f32 %v9285_v3, %v9286_v28  ;;  %v9299_v10 = vld [vmem:[#allocation4 + $0xdc] sm:$0xf]  ;;  %v9276_v29 = vmax.f32 %v9274_v9, %v9275_v27 }
 0x2ce   :  { %9355 = vperm.xlu1 %9899, %v9337_v56   ;;  %v8828_v24 = vadd.f32 %v8764_v39, %v8700_v62  ;;  %v8830_v7 = vadd.f32 %v8766_v6, %v8702_v55  ;;  %v9300_v31 = vld [vmem:[#allocation4 + $0xe0] sm:$0xf]  ;;  %v9302_v35 = vld [vmem:[#allocation4 + $0xe4] sm:$0xf]  ;;  %v9290_v37 = vld [vmem:[#allocation4 + $0xdc] sm:$0xf] }
 0x2cf   :  { %v8765_v8 = vld [vmem:[#allocation2 + $0x648] sm:$0xf]  ;;  %v8767_v13 = vld [vmem:[#allocation2 + $0x658] sm:$0xf]  ;;  %v9272_v41 = vsel %vm4709_vm2, %v9259_v50, %v9270_v5  ;;  %v9289_v33 = vmax.f32 %v9287_v32, %v9288_v19  ;;  %v9278_v36 = vmax.f32 %v9276_v29, %v9277_v34  ;;  %v9292_v43 = vld [vmem:[#allocation4 + $0xe0] sm:$0xf] }
 0x2d0   :  { %v8829_v0 = vadd.f32 %v8765_v8, %v8701_v61  ;;  %v8831_v12 = vadd.f32 %v8767_v13, %v8703_v58  ;;  %v9886_v15 = vpack.c.bf16 %v9272_v41, %v9247_v11  ;;  %v8898_v14 = vadd.f32 %v11153_v22, %v8828_v24  ;;  %v9279_v47 = vld [vmem:[#allocation4 + $0xc8] sm:$0xf]  ;;  %v9324_v6 = vld [vmem:[%s11391_s5 + $0x10] sm:$0xff]  ;;  %v9325_v24 = vld [vmem:[%s11391_s5 + $0x18] sm:$0xff] }
 0x2d1   :  { %v8900_v16 = vadd.f32 %v11153_v22, %v8830_v7  ;;  %v9291_v17 = vmax.f32 %v9289_v33, %v9290_v37  ;;  %v9280_v51 = vmax.f32 %v9278_v36, %v9279_v47  ;;  %v9323_v39 = vld [vmem:[%s11391_s5 + $0x8] sm:$0xff] }
 0x2d2   :  { %v8899_v63 = vadd.f32 %v11153_v22, %v8829_v0  ;;  %v8901_v57 = vadd.f32 %v11153_v22, %v8831_v12  ;;  %9887 = vmatprep.subr.bf16.mxu0 %v9886_v15  ;;  %v8962_v4 = vmax.f32 %v8898_v14, 0.0  ;;  %v9301_v22 = vmax.f32 %v9299_v10, %v9300_v31  ;;  %v9306_v44 = vld [vmem:[#allocation4 + $0xec] sm:$0xf]  ;;  %v9304_v48 = vld [vmem:[#allocation4 + $0xe8] sm:$0xf] }
 0x2d3   :  { %v8964_v20 = vmax.f32 %v8900_v16, 0.0  ;;  %9889 = vmatpush3.bf16.msra.mxu0 %v9886_v15  ;;  %v9293_v52 = vmax.f32 %v9291_v17, %v9292_v43  ;;  %v9282_v55 = vmax.f32 %v9280_v51, %v9281_v2 }
 0x2d4   :  { %v8963_v23 = vmax.f32 %v8899_v63, 0.0  ;;  %v8965_v30 = vmax.f32 %v8901_v57, 0.0  ;;  %v9303_v40 = vmax.f32 %v9301_v22, %v9302_v35 }
 0x2d5   :  { %v9295_v56 = vcombine.low %v9293_v52, %v9293_v52  ;;  %v9284_v60 = vmax.f32 %v9282_v55, %v9283_v1  ;;  %v9351_v1 = vpop.permute.xlu0 %9350 }
 0x2d6   :  { %v9060_v25 = vcombine.low %v8962_v4, %v8963_v23  ;;  %v9061_v26 = vcombine.low %v8964_v20, %v8965_v30  ;;  %v9305_v42 = vmax.f32 %v9303_v40, %v9304_v48 }
 0x2d7   :  { %v9297_v21 = vsel %vm4709_vm2, %v9284_v60, %v9295_v56 }
 0x2d8   :  { %9124 = vst [vmem:[#allocation4 + $0xf0] sm:$0xff] %v9060_v25  ;;  %9125 = vst [vmem:[#allocation4 + $0xf8] sm:$0xff] %v9061_v26  ;;  %v9307_v58 = vmax.f32 %v9305_v42, %v9306_v44 }
 0x2df   :  { %v9308_v45 = vld [vmem:[#allocation4 + $0xf0] sm:$0xf]  ;;  %v9311_v49 = vld [vmem:[#allocation4 + $0xf4] sm:$0xf]  ;;  %v9313_v18 = vld [vmem:[#allocation4 + $0xf8] sm:$0xf] }
 0x2e0   :  { %v9310_v46 = vmax.f32 %v9306_v44, %v9308_v45  ;;  %v9315_v54 = vld [vmem:[#allocation4 + $0xfc] sm:$0xf]  ;;  %v9309_v61 = vmax.f32 %v9307_v58, %v9308_v45 }
 0x2e2   :  { %v9312_v53 = vmax.f32 %v9310_v46, %v9311_v49 }
 0x2e4   :  { %v9314_v38 = vmax.f32 %v9312_v53, %v9313_v18 }
 0x2e6   :  { %v9316_v59 = vmax.f32 %v9314_v38, %v9315_v54 }
 0x2e8   :  { %v9318_v62 = vcombine.low %v9316_v59, %v9316_v59 }
 0x2ea   :  { %v9320_v50 = vsel %vm4709_vm2, %v9309_v61, %v9318_v62 }
 0x2eb   :  { %v9890_v5 = vpack.c.bf16 %v9320_v50, %v9297_v21 }
 0x2ed   :  { %9891 = vmatprep.subr.bf16.mxu0 %v9890_v5 }
 0x2ee   :  { %9893 = vmatpush3.bf16.msra.mxu0 %v9890_v5 }
 0x2f1   :  { %9873 = vmatmul.mubr.msk.f32.vlgmr.msra.gmra.mrb[200].mxu0 %vm9358_vm4, %v9323_v39 }
 0x2f2   :  { %9875 = vmatprep.mubr.msk.f32.mxu0 %vm9358_vm4, %v9324_v6 }
 0x2f5   :  { %9876 = vmatmul.mubr.msk.f32.gmra.mrb[202].mxu0 %vm9358_vm4, %v9325_v24 }
 0x319   :  { %v9341_v7 = vpop.permute.xlu1 %9340 }
 0x349   :  { %v9346_v8 = vpop.permute.xlu1 %9345 }
 0x34d   :  { %v9356_v16 = vpop.permute.xlu1 %9355 }
 0x3c4   :  { %v9874_v13 = vpop.f32.mrb[200].mxu0 }
 0x3c5   :  { %v9437_v11 = vpop.f32.mrb[201].mxu0  ;;  %v9443_v41 = vadd.f32 %v9874_v13, %v9346_v8 }
 0x3c6   :  { %v9438_v0 = vadd.f32 %v9437_v11, %v9341_v7 }
 0x3c7   :  { %v9457_v12 = vmax.f32 %v9443_v41, 0.0 }
 0x3c8   :  { %v9456_v15 = vmax.f32 %v9438_v0, 0.0  ;;  %v9877_v14 = vpop.f32.mrb[202].mxu0 }
 0x3c9   :  { %9461 = vst [vmem:[%s11392_s7 + $0x8] sm:$0xff] %v9457_v12  ;;  %v9447_v63 = vpop.f32.mrb[203].mxu0  ;;  %v9453_v57 = vadd.f32 %v9877_v14, %v9356_v16 }
 0x3ca   :  { %9460 = vst [vmem:[%s11392_s7] sm:$0xff] %v9456_v15  ;;  %v9448_v4 = vadd.f32 %v9447_v63, %v9351_v1 }
 0x3cb   :  { %v9459_v20 = vmax.f32 %v9453_v57, 0.0 }
 0x3cc   :  { %v9458_v2 = vmax.f32 %v9448_v4, 0.0 }
 0x3cd   :  { %9463 = vst [vmem:[%s11392_s7 + $0x18] sm:$0xff] %v9459_v20 }
 0x3ce   :  { %9462 = vst [vmem:[%s11392_s7 + $0x10] sm:$0xff] %v9458_v2 }

</bundles_post_ra>
